<compile_context>
chip_gen: v5e
topology: v5e:2x2
jax: 0.10.0
libtpu: 0.0.40
codegen_flags: <defaults>
</compile_context>

<pallas_src>
import functools

import jax
import jax.numpy as jnp
from jax.experimental import pallas as pl
from jax.experimental.pallas import tpu as pltpu

EPS = 1e-5
LANE = 128


# ------------------------------ small helpers ------------------------------ #

def _round_up(x, m):
    return (x + m - 1) // m * m


def _pad_axis(a, axis, target):
    pad = target - a.shape[axis]
    if pad == 0:
        return a
    cfg = [(0, 0)] * a.ndim
    cfg[axis] = (0, pad)
    return jnp.pad(a, cfg)


def _fold_bn(gamma, beta, mean, var, eps=EPS):
    scale = (gamma / jnp.sqrt(var + eps)).astype(jnp.float32)
    bias = (beta - mean * scale).astype(jnp.float32)
    return scale, bias


# ----------------------------- Pallas kernels ------------------------------ #

def conv1x1_bn_relu_kernel(x_ref, w_ref, b_ref, o_ref):
    """Per-tile: relu(x @ W + b).  x:[TM,Cin] bf16, W:[Cin,P] bf16 (BN scale
    folded), b:[1,P] f32.  Output stored bf16 (feeds the next matmul)."""
    y = jnp.dot(x_ref[...], w_ref[...], preferred_element_type=jnp.float32)
    o_ref[...] = jnp.maximum(y + b_ref[...], 0.0).astype(o_ref.dtype)


def conv3x3_expand_pool_kernel(patches_ref, w2_ref, b2_ref, w3_ref, b3_ref,
                               out3_ref, pool_ref, *, hw, ts):
    """Per (batch, spatial-tile):
       h    = relu(patches @ W2 + b2)          (3x3 conv via im2col, BN2 folded)
       out3 = h @ W3 + b3                      (expand 1x1 conv, BN3 folded)
       pool += sum_rows(out3)                  (per-batch SE pool accumulator)
    """
    t = pl.program_id(1)

    h = jnp.dot(patches_ref[0], w2_ref[...], preferred_element_type=jnp.float32)
    h = jnp.maximum(h + b2_ref[...], 0.0)                          # [TS, Pp] f32

    out3 = jnp.dot(h.astype(w3_ref.dtype), w3_ref[...],
                   preferred_element_type=jnp.float32) + b3_ref[...]  # [TS, C4p]
    out3_ref[0] = out3.astype(out3_ref.dtype)

    @pl.when(t == 0)
    def _():
        pool_ref[...] = jnp.zeros_like(pool_ref)

    partial = out3
    if hw % ts != 0:  # mask out-of-range rows of the (padded) edge tile
        row = jax.lax.broadcasted_iota(jnp.int32, (ts, 1), 0) + t * ts
        partial = jnp.where(row < hw, out3, 0.0)
    pool_ref[0] = pool_ref[0] + jnp.sum(partial, axis=0, keepdims=True)


def se_scale_residual_kernel(out3_ref, res_ref, gate_ref, o_ref):
    """Per (batch, spatial-tile): relu(out3 * gate_b + residual)."""
    o = (out3_ref[0].astype(jnp.float32) * gate_ref[0]
         + res_ref[0].astype(jnp.float32))
    o_ref[0] = jnp.maximum(o, 0.0)


# ------------------------------- forward pass ------------------------------- #

def se_bottleneck_forward(x_nchw, p):
    B, Cin, H, W = x_nchw.shape
    P = p["w1"].shape[1]
    C4 = p["w3"].shape[1]
    assert Cin == C4, "downsample=None requires inplanes == 4*planes"
    HW = H * W
    N = B * HW

    Cin_p = _round_up(Cin, LANE)
    Pp = _round_up(P, LANE)
    C4p = _round_up(C4, LANE)

    # ---- fold BN into conv weights, pad channels to lane width, cast bf16 ----
    s1, b1 = _fold_bn(p["bn1_g"], p["bn1_b"], p["bn1_m"], p["bn1_v"])
    s2, b2 = _fold_bn(p["bn2_g"], p["bn2_b"], p["bn2_m"], p["bn2_v"])
    s3, b3 = _fold_bn(p["bn3_g"], p["bn3_b"], p["bn3_m"], p["bn3_v"])

    w1 = _pad_axis(_pad_axis(p["w1"] * s1[None, :], 0, Cin_p), 1, Pp)
    w1 = w1.astype(jnp.bfloat16)                                   # [Cin_p, Pp]
    w2 = _pad_axis(_pad_axis(p["w2"] * s2[None, None, :], 1, Pp), 2, Pp)
    w2 = w2.reshape(9 * Pp, Pp).astype(jnp.bfloat16)               # [9*Pp, Pp]
    w3 = _pad_axis(_pad_axis(p["w3"] * s3[None, :], 0, Pp), 1, C4p)
    w3 = w3.astype(jnp.bfloat16)                                   # [Pp, C4p]

    b1p = _pad_axis(b1, 0, Pp)[None, :]                            # [1, Pp] f32
    b2p = _pad_axis(b2, 0, Pp)[None, :]
    b3p = _pad_axis(b3, 0, C4p)[None, :]

    x_nhwc = jnp.transpose(x_nchw, (0, 2, 3, 1)).astype(jnp.float32)
    x2d = _pad_axis(x_nhwc.reshape(N, Cin), 1, Cin_p).astype(jnp.bfloat16)
    residual = _pad_axis(x_nhwc.reshape(B, HW, C4), 2, C4p)        # f32 (accuracy)

    # --------------- pass A: conv1x1 + BN1 + ReLU (tiled over rows) -----------
    TM = N if N < 1024 else 1024
    out1_2d = pl.pallas_call(
        conv1x1_bn_relu_kernel,
        out_shape=jax.ShapeDtypeStruct((N, Pp), jnp.bfloat16),
        grid=(pl.cdiv(N, TM),),
        in_specs=[
            pl.BlockSpec((TM, Cin_p), lambda i: (i, 0)),
            pl.BlockSpec((Cin_p, Pp), lambda i: (0, 0)),
            pl.BlockSpec((1, Pp), lambda i: (0, 0)),
        ],
        out_specs=pl.BlockSpec((TM, Pp), lambda i: (i, 0)),
        compiler_params=pltpu.CompilerParams(dimension_semantics=("parallel",)),
    )(x2d, w1, b1p)

    # -------- im2col (pad=1, stride=1): [B, HW, 9*Pp] bf16, built once --------
    out1 = out1_2d.reshape(B, H, W, Pp)
    xp = jnp.pad(out1, ((0, 0), (1, 1), (1, 1), (0, 0)))
    patches = jnp.concatenate(
        [xp[:, dy:dy + H, dx:dx + W, :] for dy in range(3) for dx in range(3)],
        axis=-1).reshape(B, HW, 9 * Pp)

    # ---- pass B: conv3x3+BN2+ReLU, expand conv1x1+BN3, SE-pool accumulate ----
    TS = HW if HW < 1024 else 1024
    nt = pl.cdiv(HW, TS)
    kern_b = functools.partial(conv3x3_expand_pool_kernel, hw=HW, ts=TS)
    out3, pool = pl.pallas_call(
        kern_b,
        out_shape=(jax.ShapeDtypeStruct((B, HW, C4p), jnp.bfloat16),
                   jax.ShapeDtypeStruct((B, 1, C4p), jnp.float32)),
        grid=(B, nt),
        in_specs=[
            pl.BlockSpec((1, TS, 9 * Pp), lambda b, t: (b, t, 0)),
            pl.BlockSpec((9 * Pp, Pp), lambda b, t: (0, 0)),
            pl.BlockSpec((1, Pp), lambda b, t: (0, 0)),
            pl.BlockSpec((Pp, C4p), lambda b, t: (0, 0)),
            pl.BlockSpec((1, C4p), lambda b, t: (0, 0)),
        ],
        out_specs=(
            pl.BlockSpec((1, TS, C4p), lambda b, t: (b, t, 0)),
            pl.BlockSpec((1, 1, C4p), lambda b, t: (b, 0, 0)),
        ),
        compiler_params=pltpu.CompilerParams(
            dimension_semantics=("parallel", "arbitrary")),
    )(patches, w2, b2p, w3, b3p)

    # ------------- SE MLP (tiny [B,C4] matmuls) in plain JAX ------------------
    y = pool[:, 0, :C4] / float(HW)                                # [B, C4]
    gate = jax.nn.sigmoid(jax.nn.relu(y @ p["se_w1"]) @ p["se_w2"])
    gate_p = _pad_axis(gate, 1, C4p)[:, None, :].astype(jnp.float32)  # [B,1,C4p]

    # ----- pass C: gate * out3 + residual, ReLU (tiled, gate per batch) -------
    out = pl.pallas_call(
        se_scale_residual_kernel,
        out_shape=jax.ShapeDtypeStruct((B, HW, C4p), jnp.float32),
        grid=(B, nt),
        in_specs=[
            pl.BlockSpec((1, TS, C4p), lambda b, t: (b, t, 0)),
            pl.BlockSpec((1, TS, C4p), lambda b, t: (b, t, 0)),
            pl.BlockSpec((1, 1, C4p), lambda b, t: (b, 0, 0)),
        ],
        out_specs=pl.BlockSpec((1, TS, C4p), lambda b, t: (b, t, 0)),
        compiler_params=pltpu.CompilerParams(
            dimension_semantics=("parallel", "parallel")),
    )(out3, residual, gate_p)

    out = out[:, :, :C4].reshape(B, H, W, C4)
    return jnp.transpose(out, (0, 3, 1, 2))


# ------------------------------ pure-JAX reference -------------------------- #

def se_bottleneck_reference(x_nchw, p):
    x = jnp.transpose(x_nchw, (0, 2, 3, 1)).astype(jnp.float32)
    P = p["w1"].shape[1]

    def bn(y, g, b, m, v):
        return (y - m) / jnp.sqrt(v + EPS) * g + b

    o = jnp.einsum("bhwc,cd->bhwd", x, p["w1"])
    o = jax.nn.relu(bn(o, p["bn1_g"], p["bn1_b"], p["bn1_m"], p["bn1_v"]))
    w2 = p["w2"].reshape(3, 3, P, P)
    o = jax.lax.conv_general_dilated(o, w2, (1, 1), "SAME",
                                     dimension_numbers=("NHWC", "HWIO", "NHWC"))
    o = jax.nn.relu(bn(o, p["bn2_g"], p["bn2_b"], p["bn2_m"], p["bn2_v"]))
    o = jnp.einsum("bhwc,cd->bhwd", o, p["w3"])
    o = bn(o, p["bn3_g"], p["bn3_b"], p["bn3_m"], p["bn3_v"])
    y = o.mean(axis=(1, 2))
    gate = jax.nn.sigmoid(jax.nn.relu(y @ p["se_w1"]) @ p["se_w2"])
    o = o * gate[:, None, None, :]
    o = jax.nn.relu(o + x)
    return jnp.transpose(o, (0, 3, 1, 2))


# ---------------------------------- main ------------------------------------ #

def make_params(key, inplanes, planes, reduction=16):
    C4 = planes * 4
    cr = max(C4 // reduction, 1)
    ks = jax.random.split(key, 20)
    n = lambda k, s, sc=0.1: (jax.random.normal(k, s, jnp.float32) * sc)
    u = lambda k, s: jax.random.uniform(k, s, jnp.float32, 0.5, 1.5)
    return {
        # conv weights, stored input-major so kernels do x @ W
        "w1": n(ks[0], (inplanes, planes)),
        "w2": n(ks[1], (9, planes, planes)),       # 3x3, taps flattened (HWIO)
        "w3": n(ks[2], (planes, C4)),
        # BatchNorm params (inference mode)
        "bn1_g": u(ks[3], (planes,)), "bn1_b": n(ks[4], (planes,)),
        "bn1_m": n(ks[5], (planes,)), "bn1_v": u(ks[6], (planes,)),
        "bn2_g": u(ks[7], (planes,)), "bn2_b": n(ks[8], (planes,)),
        "bn2_m": n(ks[9], (planes,)), "bn2_v": u(ks[10], (planes,)),
        "bn3_g": u(ks[11], (C4,)), "bn3_b": n(ks[12], (C4,)),
        "bn3_m": n(ks[13], (C4,)), "bn3_v": u(ks[14], (C4,)),
        # SE FC weights (bias=False), stored input-major
        "se_w1": n(ks[15], (C4, cr), 0.3),
        "se_w2": n(ks[16], (cr, C4), 0.3),
    }


if __name__ == "__main__":
    key = jax.random.PRNGKey(0)
    k_x, k_p = jax.random.split(key)

    B, planes, H, W = 2, 4, 16, 16
    inplanes = planes * 4              # 16; downsample=None => inplanes == 4*planes
    x = jax.random.normal(k_x, (B, inplanes, H, W), jnp.float32)  # NCHW like PyTorch
    params = make_params(k_p, inplanes, planes, reduction=16)

    fwd = jax.jit(se_bottleneck_forward)
    out = jax.block_until_ready(fwd(x, params))
    ref = jax.block_until_ready(se_bottleneck_reference(x, params))

    assert out.shape == (B, inplanes, H, W), out.shape
    # bf16 MXU operands => looser tolerance vs the f32 reference (per perf review).
    err = float(jnp.abs(out - ref).max())
    assert jnp.allclose(out, ref, atol=3e-2, rtol=3e-2), err
    print("KERNEL_OK")
</pallas_src>

<mosaic_0001>
module attributes {stable_mosaic.version = 11 : i64} {
  func.func @conv1x1_bn_relu_kernel(%arg0: i32, %arg1: memref<512x128xbf16, #tpu.memory_space<vmem>>, %arg2: memref<128x128xbf16, #tpu.memory_space<vmem>>, %arg3: memref<1x128xf32, #tpu.memory_space<vmem>>, %arg4: memref<512x128xbf16, #tpu.memory_space<vmem>>) attributes {dimension_semantics = [#tpu.dimension_semantics<parallel>], iteration_bounds = array<i64: 1>, scalar_prefetch = 0 : i64, scratch_operands = 0 : i64, tpu.core_type = #tpu.core_type<tc>, window_params = [{transform_indices = @transform_0, window_bounds = array<i64: 512, 128>}, {pipeline_mode = #tpu.pipeline_mode<synchronous>, transform_indices = @transform_1, window_bounds = array<i64: 128, 128>}, {pipeline_mode = #tpu.pipeline_mode<synchronous>, transform_indices = @transform_2, window_bounds = array<i64: 1, 128>}, {transform_indices = @transform_3, window_bounds = array<i64: 512, 128>}]} {
    %c0 = arith.constant 0 : index
    %c0_0 = arith.constant 0 : index
    %0 = vector.load %arg1[%c0, %c0_0] : memref<512x128xbf16, #tpu.memory_space<vmem>>, vector<512x128xbf16>
    %c0_1 = arith.constant 0 : index
    %c0_2 = arith.constant 0 : index
    %1 = vector.load %arg2[%c0_1, %c0_2] : memref<128x128xbf16, #tpu.memory_space<vmem>>, vector<128x128xbf16>
    %cst = arith.constant dense<0.000000e+00> : vector<512x128xf32>
    %2 = tpu.matmul %0, %1, %cst {dimension_numbers = #tpu.dot_dimension_numbers<[1], [0], [0], [1], [0, 0, 1, 1], [], []>} : vector<512x128xbf16>, vector<128x128xbf16>, vector<512x128xf32> -> vector<512x128xf32>
    %c0_3 = arith.constant 0 : index
    %c0_4 = arith.constant 0 : index
    %3 = vector.load %arg3[%c0_3, %c0_4] : memref<1x128xf32, #tpu.memory_space<vmem>>, vector<1x128xf32>
    %4 = vector.broadcast %3 : vector<1x128xf32> to vector<512x128xf32>
    %5 = arith.addf %2, %4 : vector<512x128xf32>
    %cst_5 = arith.constant 0.000000e+00 : f32
    %6 = vector.broadcast %cst_5 : f32 to vector<512x128xf32>
    %7 = arith.maximumf %5, %6 : vector<512x128xf32>
    %8 = arith.truncf %7 : vector<512x128xf32> to vector<512x128xbf16>
    %c0_6 = arith.constant 0 : index
    %c0_7 = arith.constant 0 : index
    %9 = vector.load %arg4[%c0_6, %c0_7] : memref<512x128xbf16, #tpu.memory_space<vmem>>, vector<512x128xbf16>
    tpu.vector_store %arg4[%c0_6, %c0_7], %8 {strides = array<i32>} : memref<512x128xbf16, #tpu.memory_space<vmem>>, vector<512x128xbf16>,
    return
  }
  func.func @transform_0(%arg0: i32) -> (i32, i32) {
    %c0_i32 = arith.constant 0 : i32
    %c0_i32_0 = arith.constant 0 : i32
    return %arg0, %c0_i32 : i32, i32
  }
  func.func @transform_1(%arg0: i32) -> (i32, i32) {
    %c0_i32 = arith.constant 0 : i32
    %c0_i32_0 = arith.constant 0 : i32
    %c0_i32_1 = arith.constant 0 : i32
    return %c0_i32, %c0_i32_0 : i32, i32
  }
  func.func @transform_2(%arg0: i32) -> (i32, i32) {
    %c0_i32 = arith.constant 0 : i32
    %c0_i32_0 = arith.constant 0 : i32
    %c0_i32_1 = arith.constant 0 : i32
    return %c0_i32, %c0_i32_0 : i32, i32
  }
  func.func @transform_3(%arg0: i32) -> (i32, i32) {
    %c0_i32 = arith.constant 0 : i32
    %c0_i32_0 = arith.constant 0 : i32
    return %arg0, %c0_i32 : i32, i32
  }
}

module attributes {stable_mosaic.version = 11 : i64} {
  func.func @conv3x3_expand_pool_kernel(%arg0: i32, %arg1: i32, %arg2: memref<1x256x1152xbf16, #tpu.memory_space<vmem>>, %arg3: memref<1152x128xbf16, #tpu.memory_space<vmem>>, %arg4: memref<1x128xf32, #tpu.memory_space<vmem>>, %arg5: memref<128x128xbf16, #tpu.memory_space<vmem>>, %arg6: memref<1x128xf32, #tpu.memory_space<vmem>>, %arg7: memref<1x256x128xbf16, #tpu.memory_space<vmem>>, %arg8: memref<1x1x128xf32, #tpu.memory_space<vmem>>) attributes {dimension_semantics = [#tpu.dimension_semantics<parallel>, #tpu.dimension_semantics<arbitrary>], iteration_bounds = array<i64: 2, 1>, scalar_prefetch = 0 : i64, scratch_operands = 0 : i64, tpu.core_type = #tpu.core_type<tc>, window_params = [{transform_indices = @transform_0, window_bounds = array<i64: 1, 256, 1152>}, {pipeline_mode = #tpu.pipeline_mode<synchronous>, transform_indices = @transform_1, window_bounds = array<i64: 1152, 128>}, {pipeline_mode = #tpu.pipeline_mode<synchronous>, transform_indices = @transform_2, window_bounds = array<i64: 1, 128>}, {pipeline_mode = #tpu.pipeline_mode<synchronous>, transform_indices = @transform_3, window_bounds = array<i64: 128, 128>}, {pipeline_mode = #tpu.pipeline_mode<synchronous>, transform_indices = @transform_4, window_bounds = array<i64: 1, 128>}, {transform_indices = @transform_5, window_bounds = array<i64: 1, 256, 128>}, {transform_indices = @transform_6, window_bounds = array<i64: 1, 1, 128>}]} {
    %c0 = arith.constant 0 : index
    %c0_0 = arith.constant 0 : index
    %c0_1 = arith.constant 0 : index
    %0 = vector.load %arg2[%c0, %c0_0, %c0_1] : memref<1x256x1152xbf16, #tpu.memory_space<vmem>>, vector<1x256x1152xbf16>
    %1 = vector.shape_cast %0 : vector<1x256x1152xbf16> to vector<256x1152xbf16>
    %c0_2 = arith.constant 0 : index
    %c0_3 = arith.constant 0 : index
    %2 = vector.load %arg3[%c0_2, %c0_3] : memref<1152x128xbf16, #tpu.memory_space<vmem>>, vector<1152x128xbf16>
    %cst = arith.constant dense<0.000000e+00> : vector<256x128xf32>
    %3 = tpu.matmul %1, %2, %cst {dimension_numbers = #tpu.dot_dimension_numbers<[1], [0], [0], [1], [0, 0, 1, 1], [], []>} : vector<256x1152xbf16>, vector<1152x128xbf16>, vector<256x128xf32> -> vector<256x128xf32>
    %c0_4 = arith.constant 0 : index
    %c0_5 = arith.constant 0 : index
    %4 = vector.load %arg4[%c0_4, %c0_5] : memref<1x128xf32, #tpu.memory_space<vmem>>, vector<1x128xf32>
    %5 = vector.broadcast %4 : vector<1x128xf32> to vector<256x128xf32>
    %6 = arith.addf %3, %5 : vector<256x128xf32>
    %cst_6 = arith.constant 0.000000e+00 : f32
    %7 = vector.broadcast %cst_6 : f32 to vector<256x128xf32>
    %8 = arith.maximumf %6, %7 : vector<256x128xf32>
    %9 = arith.truncf %8 : vector<256x128xf32> to vector<256x128xbf16>
    %c0_7 = arith.constant 0 : index
    %c0_8 = arith.constant 0 : index
    %10 = vector.load %arg5[%c0_7, %c0_8] : memref<128x128xbf16, #tpu.memory_space<vmem>>, vector<128x128xbf16>
    %cst_9 = arith.constant dense<0.000000e+00> : vector<256x128xf32>
    %11 = tpu.matmul %9, %10, %cst_9 {dimension_numbers = #tpu.dot_dimension_numbers<[1], [0], [0], [1], [0, 0, 1, 1], [], []>} : vector<256x128xbf16>, vector<128x128xbf16>, vector<256x128xf32> -> vector<256x128xf32>
    %c0_10 = arith.constant 0 : index
    %c0_11 = arith.constant 0 : index
    %12 = vector.load %arg6[%c0_10, %c0_11] : memref<1x128xf32, #tpu.memory_space<vmem>>, vector<1x128xf32>
    %13 = vector.broadcast %12 : vector<1x128xf32> to vector<256x128xf32>
    %14 = arith.addf %11, %13 : vector<256x128xf32>
    %15 = arith.truncf %14 : vector<256x128xf32> to vector<256x128xbf16>
    %c0_12 = arith.constant 0 : index
    %c0_13 = arith.constant 0 : index
    %c0_14 = arith.constant 0 : index
    %16 = vector.load %arg7[%c0_12, %c0_13, %c0_14] : memref<1x256x128xbf16, #tpu.memory_space<vmem>>, vector<1x256x128xbf16>
    %17 = vector.shape_cast %16 : vector<1x256x128xbf16> to vector<256x128xbf16>
    %18 = vector.shape_cast %15 : vector<256x128xbf16> to vector<1x256x128xbf16>
    tpu.vector_store %arg7[%c0_12, %c0_13, %c0_14], %18 {strides = array<i32>} : memref<1x256x128xbf16, #tpu.memory_space<vmem>>, vector<1x256x128xbf16>,
    %c0_i32 = arith.constant 0 : i32
    %19 = arith.cmpi eq, %arg1, %c0_i32 : i32
    %20 = arith.extui %19 : i1 to i32
    %c0_i32_15 = arith.constant 0 : i32
    %21 = arith.cmpi ne, %20, %c0_i32_15 : i32
    scf.if %21 {
      %cst_23 = arith.constant 0.000000e+00 : f32
      %30 = vector.broadcast %cst_23 : f32 to vector<1x1x128xf32>
      %c0_24 = arith.constant 0 : index
      %c0_25 = arith.constant 0 : index
      %c0_26 = arith.constant 0 : index
      %31 = vector.load %arg8[%c0_24, %c0_25, %c0_26] : memref<1x1x128xf32, #tpu.memory_space<vmem>>, vector<1x1x128xf32>
      tpu.vector_store %arg8[%c0_24, %c0_25, %c0_26], %30 {strides = array<i32>} : memref<1x1x128xf32, #tpu.memory_space<vmem>>, vector<1x1x128xf32>,
    } else {
    }
    %c0_16 = arith.constant 0 : index
    %c0_17 = arith.constant 0 : index
    %c0_18 = arith.constant 0 : index
    %22 = vector.load %arg8[%c0_16, %c0_17, %c0_18] : memref<1x1x128xf32, #tpu.memory_space<vmem>>, vector<1x1x128xf32>
    %23 = vector.shape_cast %22 : vector<1x1x128xf32> to vector<1x128xf32>
    %cst_19 = arith.constant dense<0.000000e+00> : vector<128xf32>
    %24 = vector.multi_reduction <add>, %14, %cst_19 [0] : vector<256x128xf32> to vector<128xf32>
    %25 = vector.shape_cast %24 : vector<128xf32> to vector<1x128xf32>
    %26 = arith.addf %23, %25 : vector<1x128xf32>
    %c0_20 = arith.constant 0 : index
    %c0_21 = arith.constant 0 : index
    %c0_22 = arith.constant 0 : index
    %27 = vector.load %arg8[%c0_20, %c0_21, %c0_22] : memref<1x1x128xf32, #tpu.memory_space<vmem>>, vector<1x1x128xf32>
    %28 = vector.shape_cast %27 : vector<1x1x128xf32> to vector<1x128xf32>
    %29 = vector.shape_cast %26 : vector<1x128xf32> to vector<1x1x128xf32>
    tpu.vector_store %arg8[%c0_20, %c0_21, %c0_22], %29 {strides = array<i32>} : memref<1x1x128xf32, #tpu.memory_space<vmem>>, vector<1x1x128xf32>,
    return
  }
  func.func @transform_0(%arg0: i32, %arg1: i32) -> (i32, i32, i32) {
    %c0_i32 = arith.constant 0 : i32
    %c0_i32_0 = arith.constant 0 : i32
    return %arg0, %arg1, %c0_i32 : i32, i32, i32
  }
  func.func @transform_1(%arg0: i32, %arg1: i32) -> (i32, i32) {
    %c0_i32 = arith.constant 0 : i32
    %c0_i32_0 = arith.constant 0 : i32
    %c0_i32_1 = arith.constant 0 : i32
    return %c0_i32, %c0_i32_0 : i32, i32
  }
  func.func @transform_2(%arg0: i32, %arg1: i32) -> (i32, i32) {
    %c0_i32 = arith.constant 0 : i32
    %c0_i32_0 = arith.constant 0 : i32
    %c0_i32_1 = arith.constant 0 : i32
    return %c0_i32, %c0_i32_0 : i32, i32
  }
  func.func @transform_3(%arg0: i32, %arg1: i32) -> (i32, i32) {
    %c0_i32 = arith.constant 0 : i32
    %c0_i32_0 = arith.constant 0 : i32
    %c0_i32_1 = arith.constant 0 : i32
    return %c0_i32, %c0_i32_0 : i32, i32
  }
  func.func @transform_4(%arg0: i32, %arg1: i32) -> (i32, i32) {
    %c0_i32 = arith.constant 0 : i32
    %c0_i32_0 = arith.constant 0 : i32
    %c0_i32_1 = arith.constant 0 : i32
    return %c0_i32, %c0_i32_0 : i32, i32
  }
  func.func @transform_5(%arg0: i32, %arg1: i32) -> (i32, i32, i32) {
    %c0_i32 = arith.constant 0 : i32
    %c0_i32_0 = arith.constant 0 : i32
    return %arg0, %arg1, %c0_i32 : i32, i32, i32
  }
  func.func @transform_6(%arg0: i32, %arg1: i32) -> (i32, i32, i32) {
    %c0_i32 = arith.constant 0 : i32
    %c0_i32_0 = arith.constant 0 : i32
    %c0_i32_1 = arith.constant 0 : i32
    return %arg0, %c0_i32, %c0_i32_0 : i32, i32, i32
  }
}

module attributes {stable_mosaic.version = 11 : i64} {
  func.func @se_scale_residual_kernel(%arg0: i32, %arg1: i32, %arg2: memref<1x256x128xbf16, #tpu.memory_space<vmem>>, %arg3: memref<1x256x128xf32, #tpu.memory_space<vmem>>, %arg4: memref<1x1x128xf32, #tpu.memory_space<vmem>>, %arg5: memref<1x256x128xf32, #tpu.memory_space<vmem>>) attributes {dimension_semantics = [#tpu.dimension_semantics<parallel>, #tpu.dimension_semantics<parallel>], iteration_bounds = array<i64: 2, 1>, scalar_prefetch = 0 : i64, scratch_operands = 0 : i64, tpu.core_type = #tpu.core_type<tc>, window_params = [{transform_indices = @transform_0, window_bounds = array<i64: 1, 256, 128>}, {transform_indices = @transform_1, window_bounds = array<i64: 1, 256, 128>}, {transform_indices = @transform_2, window_bounds = array<i64: 1, 1, 128>}, {transform_indices = @transform_3, window_bounds = array<i64: 1, 256, 128>}]} {
    %c0 = arith.constant 0 : index
    %c0_0 = arith.constant 0 : index
    %c0_1 = arith.constant 0 : index
    %0 = vector.load %arg2[%c0, %c0_0, %c0_1] : memref<1x256x128xbf16, #tpu.memory_space<vmem>>, vector<1x256x128xbf16>
    %1 = vector.shape_cast %0 : vector<1x256x128xbf16> to vector<256x128xbf16>
    %2 = arith.extf %1 : vector<256x128xbf16> to vector<256x128xf32>
    %c0_2 = arith.constant 0 : index
    %c0_3 = arith.constant 0 : index
    %c0_4 = arith.constant 0 : index
    %3 = vector.load %arg4[%c0_2, %c0_3, %c0_4] : memref<1x1x128xf32, #tpu.memory_space<vmem>>, vector<1x1x128xf32>
    %4 = vector.shape_cast %3 : vector<1x1x128xf32> to vector<1x128xf32>
    %5 = vector.broadcast %4 : vector<1x128xf32> to vector<256x128xf32>
    %6 = arith.mulf %2, %5 : vector<256x128xf32>
    %c0_5 = arith.constant 0 : index
    %c0_6 = arith.constant 0 : index
    %c0_7 = arith.constant 0 : index
    %7 = vector.load %arg3[%c0_5, %c0_6, %c0_7] : memref<1x256x128xf32, #tpu.memory_space<vmem>>, vector<1x256x128xf32>
    %8 = vector.shape_cast %7 : vector<1x256x128xf32> to vector<256x128xf32>
    %9 = arith.addf %6, %8 : vector<256x128xf32>
    %cst = arith.constant 0.000000e+00 : f32
    %10 = vector.broadcast %cst : f32 to vector<256x128xf32>
    %11 = arith.maximumf %9, %10 : vector<256x128xf32>
    %c0_8 = arith.constant 0 : index
    %c0_9 = arith.constant 0 : index
    %c0_10 = arith.constant 0 : index
    %12 = vector.load %arg5[%c0_8, %c0_9, %c0_10] : memref<1x256x128xf32, #tpu.memory_space<vmem>>, vector<1x256x128xf32>
    %13 = vector.shape_cast %12 : vector<1x256x128xf32> to vector<256x128xf32>
    %14 = vector.shape_cast %11 : vector<256x128xf32> to vector<1x256x128xf32>
    tpu.vector_store %arg5[%c0_8, %c0_9, %c0_10], %14 {strides = array<i32>} : memref<1x256x128xf32, #tpu.memory_space<vmem>>, vector<1x256x128xf32>,
    return
  }
  func.func @transform_0(%arg0: i32, %arg1: i32) -> (i32, i32, i32) {
    %c0_i32 = arith.constant 0 : i32
    %c0_i32_0 = arith.constant 0 : i32
    return %arg0, %arg1, %c0_i32 : i32, i32, i32
  }
  func.func @transform_1(%arg0: i32, %arg1: i32) -> (i32, i32, i32) {
    %c0_i32 = arith.constant 0 : i32
    %c0_i32_0 = arith.constant 0 : i32
    return %arg0, %arg1, %c0_i32 : i32, i32, i32
  }
  func.func @transform_2(%arg0: i32, %arg1: i32) -> (i32, i32, i32) {
    %c0_i32 = arith.constant 0 : i32
    %c0_i32_0 = arith.constant 0 : i32
    %c0_i32_1 = arith.constant 0 : i32
    return %arg0, %c0_i32, %c0_i32_0 : i32, i32, i32
  }
  func.func @transform_3(%arg0: i32, %arg1: i32) -> (i32, i32, i32) {
    %c0_i32 = arith.constant 0 : i32
    %c0_i32_0 = arith.constant 0 : i32
    return %arg0, %arg1, %c0_i32 : i32, i32, i32
  }
}

</mosaic_0001>

<bundles_post_ra>
// kernel: se_bottleneck_forward.3
= control target key start
LH: loop header
LB: loop body
LE: loop exit
PB: predicated region body
PF: predicated region fallthrough
CT: control target
= control target key end

     0   :  { %s1424_s1 = inlined_call_operand.vmem [shape: bf16[128,128], index: 1, kind: input, shape index: {}]   ;;  %s1425_s2 = inlined_call_operand.vmem [shape: f32[1,128], index: 2, kind: input, shape index: {}]   ;;  %s1426_s0 = inlined_call_operand.vmem [shape: bf16[512,128], index: 0, kind: input, shape index: {}]   ;;  %s1427_s3 = inlined_call_operand.vmem [shape: bf16[512,128], index: 3, kind: output, shape index: {}]  }
   0x1   :  { %v902_v0 = vld [vmem:[%s1424_s1 + $0x38] sm:$0xff]  ;;  %v901_v1 = vld [vmem:[%s1424_s1 + $0x30] sm:$0xff]  ;;  %v900_v2 = vld [vmem:[%s1424_s1 + $0x28] sm:$0xff] }
   0x2   :  { %338 = vmatpush.bf16.msra.mxu0 %v902_v0  ;;  %1094 = vmatpush.bf16.msra.mxu1 %v902_v0  ;;  %v899_v3 = vld [vmem:[%s1424_s1 + $0x20] sm:$0xff]  ;;  %v898_v4 = vld [vmem:[%s1424_s1 + $0x18] sm:$0xff]  ;;  %v897_v5 = vld [vmem:[%s1424_s1 + $0x10] sm:$0xff] }
   0x3   :  { %1095 = vmatpush.bf16.msra.mxu2 %v902_v0  ;;  %1096 = vmatpush.bf16.msra.mxu3 %v902_v0  ;;  %v896_v6 = vld [vmem:[%s1424_s1 + $0x8] sm:$0xff]  ;;  %v895_v7 = vld [vmem:[%s1424_s1] sm:$0xff]  ;;  %v865_v16 = vld [vmem:[%s1426_s0 + $0x10] sm:$0xff] }
   0x4   :  { %v863_v8 = vld [vmem:[%s1426_s0] sm:$0xff]  ;;  %v864_v12 = vld [vmem:[%s1426_s0 + $0x8] sm:$0xff]  ;;  %v873_v17 = vld [vmem:[%s1426_s0 + $0x50] sm:$0xff] }
   0x5   :  { %v871_v9 = vld [vmem:[%s1426_s0 + $0x40] sm:$0xff]  ;;  %v872_v13 = vld [vmem:[%s1426_s0 + $0x48] sm:$0xff]  ;;  %v881_v18 = vld [vmem:[%s1426_s0 + $0x90] sm:$0xff] }
   0x6   :  { %339 = vmatpush.bf16.msra.mxu0 %v901_v1  ;;  %1097 = vmatpush.bf16.msra.mxu1 %v901_v1  ;;  %v879_v10 = vld [vmem:[%s1426_s0 + $0x80] sm:$0xff]  ;;  %v880_v14 = vld [vmem:[%s1426_s0 + $0x88] sm:$0xff]  ;;  %v889_v19 = vld [vmem:[%s1426_s0 + $0xd0] sm:$0xff] }
   0x7   :  { %1098 = vmatpush.bf16.msra.mxu2 %v901_v1  ;;  %1099 = vmatpush.bf16.msra.mxu3 %v901_v1  ;;  %v887_v11 = vld [vmem:[%s1426_s0 + $0xc0] sm:$0xff]  ;;  %v888_v15 = vld [vmem:[%s1426_s0 + $0xc8] sm:$0xff]  ;;  %v866_v20 = vld [vmem:[%s1426_s0 + $0x18] sm:$0xff] }
   0x8   :  { %v874_v21 = vld [vmem:[%s1426_s0 + $0x58] sm:$0xff]  ;;  %v867_v24 = vld [vmem:[%s1426_s0 + $0x20] sm:$0xff]  ;;  %v868_v28 = vld [vmem:[%s1426_s0 + $0x28] sm:$0xff] }
   0x9   :  { %v882_v22 = vld [vmem:[%s1426_s0 + $0x98] sm:$0xff]  ;;  %v875_v25 = vld [vmem:[%s1426_s0 + $0x60] sm:$0xff]  ;;  %v876_v29 = vld [vmem:[%s1426_s0 + $0x68] sm:$0xff] }
   0xa   :  { %340 = vmatpush.bf16.msra.mxu0 %v900_v2  ;;  %1100 = vmatpush.bf16.msra.mxu1 %v900_v2  ;;  %v890_v23 = vld [vmem:[%s1426_s0 + $0xd8] sm:$0xff]  ;;  %v883_v26 = vld [vmem:[%s1426_s0 + $0xa0] sm:$0xff]  ;;  %v884_v30 = vld [vmem:[%s1426_s0 + $0xa8] sm:$0xff] }
   0xb   :  { %1101 = vmatpush.bf16.msra.mxu2 %v900_v2  ;;  %1102 = vmatpush.bf16.msra.mxu3 %v900_v2  ;;  %v891_v27 = vld [vmem:[%s1426_s0 + $0xe0] sm:$0xff]  ;;  %v892_v31 = vld [vmem:[%s1426_s0 + $0xe8] sm:$0xff]  ;;  %v869_v32 = vld [vmem:[%s1426_s0 + $0x30] sm:$0xff] }
   0xc   :  { %v877_v33 = vld [vmem:[%s1426_s0 + $0x70] sm:$0xff]  ;;  %v870_v36 = vld [vmem:[%s1426_s0 + $0x38] sm:$0xff]  ;;  %v1262_v42 = vld [vmem:[%s1425_s2] ss:$0 sm:$0xff] }
   0xd   :  { %v885_v34 = vld [vmem:[%s1426_s0 + $0xb0] sm:$0xff]  ;;  %v878_v37 = vld [vmem:[%s1426_s0 + $0x78] sm:$0xff] }
   0xe   :  { %341 = vmatpush.bf16.msra.mxu0 %v899_v3  ;;  %1103 = vmatpush.bf16.msra.mxu1 %v899_v3  ;;  %v893_v35 = vld [vmem:[%s1426_s0 + $0xf0] sm:$0xff]  ;;  %v886_v38 = vld [vmem:[%s1426_s0 + $0xb8] sm:$0xff] }
   0xf   :  { %1104 = vmatpush.bf16.msra.mxu2 %v899_v3  ;;  %1105 = vmatpush.bf16.msra.mxu3 %v899_v3  ;;  %v894_v39 = vld [vmem:[%s1426_s0 + $0xf8] sm:$0xff] }
  0x12   :  { %342 = vmatpush.bf16.msra.mxu0 %v898_v4  ;;  %1106 = vmatpush.bf16.msra.mxu1 %v898_v4 }
  0x13   :  { %1107 = vmatpush.bf16.msra.mxu2 %v898_v4  ;;  %1108 = vmatpush.bf16.msra.mxu3 %v898_v4 }
  0x16   :  { %343 = vmatpush.bf16.msra.mxu0 %v897_v5  ;;  %1109 = vmatpush.bf16.msra.mxu1 %v897_v5 }
  0x17   :  { %1110 = vmatpush.bf16.msra.mxu2 %v897_v5  ;;  %1111 = vmatpush.bf16.msra.mxu3 %v897_v5 }
  0x1a   :  { %344 = vmatpush.bf16.msra.mxu0 %v896_v6  ;;  %1112 = vmatpush.bf16.msra.mxu1 %v896_v6 }
  0x1b   :  { %1113 = vmatpush.bf16.msra.mxu2 %v896_v6  ;;  %1114 = vmatpush.bf16.msra.mxu3 %v896_v6 }
  0x1e   :  { %345 = vmatpush.bf16.msra.mxu0 %v895_v7  ;;  %1115 = vmatpush.bf16.msra.mxu1 %v895_v7 }
  0x1f   :  { %1116 = vmatpush.bf16.msra.mxu2 %v895_v7  ;;  %1117 = vmatpush.bf16.msra.mxu3 %v895_v7 }
  0x21   :  { %346 = vmatmul.bf16.vlgmr.msra.gmra.mxu0 %v863_v8  ;;  %386 = vmatmul.bf16.vlgmr.msra.gmra.mxu1 %v871_v9 }
  0x22   :  { %426 = vmatmul.bf16.vlgmr.msra.gmra.mxu2 %v879_v10  ;;  %466 = vmatmul.bf16.vlgmr.msra.gmra.mxu3 %v887_v11 }
  0x31   :  { %351 = vmatmul.bf16.gmra.mxu0 %v864_v12  ;;  %391 = vmatmul.bf16.gmra.mxu1 %v872_v13 }
  0x32   :  { %431 = vmatmul.bf16.gmra.mxu2 %v880_v14  ;;  %471 = vmatmul.bf16.gmra.mxu3 %v888_v15 }
  0x41   :  { %356 = vmatmul.bf16.gmra.mxu0 %v865_v16  ;;  %396 = vmatmul.bf16.gmra.mxu1 %v873_v17 }
  0x42   :  { %436 = vmatmul.bf16.gmra.mxu2 %v881_v18  ;;  %476 = vmatmul.bf16.gmra.mxu3 %v889_v19 }
  0x51   :  { %361 = vmatmul.bf16.gmra.mxu0 %v866_v20  ;;  %401 = vmatmul.bf16.gmra.mxu1 %v874_v21 }
  0x52   :  { %441 = vmatmul.bf16.gmra.mxu2 %v882_v22  ;;  %481 = vmatmul.bf16.gmra.mxu3 %v890_v23 }
  0x61   :  { %366 = vmatmul.bf16.gmra.mxu0 %v867_v24  ;;  %406 = vmatmul.bf16.gmra.mxu1 %v875_v25 }
  0x62   :  { %446 = vmatmul.bf16.gmra.mxu2 %v883_v26  ;;  %486 = vmatmul.bf16.gmra.mxu3 %v891_v27 }
  0x71   :  { %371 = vmatmul.bf16.gmra.mxu0 %v868_v28  ;;  %411 = vmatmul.bf16.gmra.mxu1 %v876_v29 }
  0x72   :  { %451 = vmatmul.bf16.gmra.mxu2 %v884_v30  ;;  %491 = vmatmul.bf16.gmra.mxu3 %v892_v31 }
  0x81   :  { %376 = vmatmul.bf16.gmra.mxu0 %v869_v32  ;;  %416 = vmatmul.bf16.gmra.mxu1 %v877_v33 }
  0x82   :  { %456 = vmatmul.bf16.gmra.mxu2 %v885_v34  ;;  %496 = vmatmul.bf16.gmra.mxu3 %v893_v35 }
  0x91   :  { %381 = vmatmul.bf16.gmra.mxu0 %v870_v36  ;;  %421 = vmatmul.bf16.gmra.mxu1 %v878_v37 }
  0x92   :  { %461 = vmatmul.bf16.gmra.mxu2 %v886_v38  ;;  %501 = vmatmul.bf16.gmra.mxu3 %v894_v39 }
  0x9e   :  { %v347_v40 = vpop.f32.mrf.mxu0  ;;  %v387_v41 = vpop.f32.mrf.mxu1 }
  0x9f   :  { %v348_v43 = vadd.f32 %v1262_v42, %v347_v40  ;;  %v388_v44 = vadd.f32 %v1262_v42, %v387_v41 }
  0xa1   :  { %v507_v51 = vmax.f32 %v348_v43, 0.0  ;;  %v523_v52 = vmax.f32 %v388_v44, 0.0 }
  0xa5   :  { %v427_v45 = vpop.f32.mrf.mxu2  ;;  %v467_v46 = vpop.f32.mrf.mxu3 }
  0xa6   :  { %v349_v47 = vpop.f32.mrf.mxu0  ;;  %v389_v48 = vpop.f32.mrf.mxu1  ;;  %v428_v57 = vadd.f32 %v1262_v42, %v427_v45  ;;  %v468_v58 = vadd.f32 %v1262_v42, %v467_v46 }
  0xa7   :  { %v350_v49 = vadd.f32 %v1262_v42, %v349_v47  ;;  %v390_v50 = vadd.f32 %v1262_v42, %v389_v48 }
  0xa8   :  { %v539_v1 = vmax.f32 %v428_v57, 0.0  ;;  %v555_v2 = vmax.f32 %v468_v58, 0.0 }
  0xa9   :  { %v508_v53 = vmax.f32 %v350_v49, 0.0  ;;  %v524_v54 = vmax.f32 %v390_v50, 0.0 }
  0xab   :  { %v906_v55 = vpack.c.bf16 %v508_v53, %v507_v51  ;;  %v946_v56 = vpack.c.bf16 %v524_v54, %v523_v52 }
  0xad   :  { %907 = vst [vmem:[%s1427_s3] sm:$0xff] %v906_v55   ;;  %v429_v59 = vpop.f32.mrf.mxu2  ;;  %v469_v60 = vpop.f32.mrf.mxu3 }
  0xae   :  { %1070 = vst [vmem:[%s1427_s3 + $0x40] sm:$0xff] %v946_v56   ;;  %v430_v61 = vadd.f32 %v1262_v42, %v429_v59  ;;  %v470_v62 = vadd.f32 %v1262_v42, %v469_v60  ;;  %v352_v63 = vpop.f32.mrf.mxu0  ;;  %v392_v0 = vpop.f32.mrf.mxu1 }
  0xaf   :  { %v353_v7 = vadd.f32 %v1262_v42, %v352_v63  ;;  %v393_v8 = vadd.f32 %v1262_v42, %v392_v0 }
  0xb0   :  { %v540_v3 = vmax.f32 %v430_v61, 0.0  ;;  %v556_v4 = vmax.f32 %v470_v62, 0.0 }
  0xb1   :  { %v509_v15 = vmax.f32 %v353_v7, 0.0  ;;  %v525_v16 = vmax.f32 %v393_v8, 0.0 }
  0xb2   :  { %v986_v5 = vpack.c.bf16 %v540_v3, %v539_v1  ;;  %v1026_v6 = vpack.c.bf16 %v556_v4, %v555_v2 }
  0xb4   :  { %1078 = vst [vmem:[%s1427_s3 + $0x80] sm:$0xff] %v986_v5  }
  0xb5   :  { %1086 = vst [vmem:[%s1427_s3 + $0xc0] sm:$0xff] %v1026_v6   ;;  %v432_v9 = vpop.f32.mrf.mxu2  ;;  %v472_v10 = vpop.f32.mrf.mxu3 }
  0xb6   :  { %v354_v11 = vpop.f32.mrf.mxu0  ;;  %v394_v12 = vpop.f32.mrf.mxu1  ;;  %v433_v21 = vadd.f32 %v1262_v42, %v432_v9  ;;  %v473_v22 = vadd.f32 %v1262_v42, %v472_v10 }
  0xb7   :  { %v355_v13 = vadd.f32 %v1262_v42, %v354_v11  ;;  %v395_v14 = vadd.f32 %v1262_v42, %v394_v12 }
  0xb8   :  { %v541_v29 = vmax.f32 %v433_v21, 0.0  ;;  %v557_v30 = vmax.f32 %v473_v22, 0.0 }
  0xb9   :  { %v510_v17 = vmax.f32 %v355_v13, 0.0  ;;  %v526_v18 = vmax.f32 %v395_v14, 0.0 }
  0xbb   :  { %v911_v19 = vpack.c.bf16 %v510_v17, %v509_v15  ;;  %v951_v20 = vpack.c.bf16 %v526_v18, %v525_v16 }
  0xbd   :  { %1063 = vst [vmem:[%s1427_s3 + $0x8] sm:$0xff] %v911_v19   ;;  %v434_v23 = vpop.f32.mrf.mxu2  ;;  %v474_v24 = vpop.f32.mrf.mxu3 }
  0xbe   :  { %1071 = vst [vmem:[%s1427_s3 + $0x48] sm:$0xff] %v951_v20   ;;  %v435_v25 = vadd.f32 %v1262_v42, %v434_v23  ;;  %v475_v26 = vadd.f32 %v1262_v42, %v474_v24  ;;  %v357_v27 = vpop.f32.mrf.mxu0  ;;  %v397_v28 = vpop.f32.mrf.mxu1 }
  0xbf   :  { %v358_v35 = vadd.f32 %v1262_v42, %v357_v27  ;;  %v398_v36 = vadd.f32 %v1262_v42, %v397_v28 }
  0xc0   :  { %v542_v31 = vmax.f32 %v435_v25, 0.0  ;;  %v558_v32 = vmax.f32 %v475_v26, 0.0 }
  0xc1   :  { %v511_v44 = vmax.f32 %v358_v35, 0.0  ;;  %v527_v45 = vmax.f32 %v398_v36, 0.0 }
  0xc2   :  { %v991_v33 = vpack.c.bf16 %v542_v31, %v541_v29  ;;  %v1031_v34 = vpack.c.bf16 %v558_v32, %v557_v30 }
  0xc4   :  { %1079 = vst [vmem:[%s1427_s3 + $0x88] sm:$0xff] %v991_v33  }
  0xc5   :  { %1087 = vst [vmem:[%s1427_s3 + $0xc8] sm:$0xff] %v1031_v34   ;;  %v437_v37 = vpop.f32.mrf.mxu2  ;;  %v477_v38 = vpop.f32.mrf.mxu3 }
  0xc6   :  { %v359_v39 = vpop.f32.mrf.mxu0  ;;  %v399_v40 = vpop.f32.mrf.mxu1  ;;  %v438_v50 = vadd.f32 %v1262_v42, %v437_v37  ;;  %v478_v51 = vadd.f32 %v1262_v42, %v477_v38 }
  0xc7   :  { %v360_v41 = vadd.f32 %v1262_v42, %v359_v39  ;;  %v400_v43 = vadd.f32 %v1262_v42, %v399_v40 }
  0xc8   :  { %v543_v58 = vmax.f32 %v438_v50, 0.0  ;;  %v559_v59 = vmax.f32 %v478_v51, 0.0 }
  0xc9   :  { %v512_v46 = vmax.f32 %v360_v41, 0.0  ;;  %v528_v47 = vmax.f32 %v400_v43, 0.0 }
  0xcb   :  { %v916_v48 = vpack.c.bf16 %v512_v46, %v511_v44  ;;  %v956_v49 = vpack.c.bf16 %v528_v47, %v527_v45 }
  0xcd   :  { %1064 = vst [vmem:[%s1427_s3 + $0x10] sm:$0xff] %v916_v48   ;;  %v439_v52 = vpop.f32.mrf.mxu2  ;;  %v479_v53 = vpop.f32.mrf.mxu3 }
  0xce   :  { %1072 = vst [vmem:[%s1427_s3 + $0x50] sm:$0xff] %v956_v49   ;;  %v440_v54 = vadd.f32 %v1262_v42, %v439_v52  ;;  %v480_v55 = vadd.f32 %v1262_v42, %v479_v53  ;;  %v362_v56 = vpop.f32.mrf.mxu0  ;;  %v402_v57 = vpop.f32.mrf.mxu1 }
  0xcf   :  { %v363_v0 = vadd.f32 %v1262_v42, %v362_v56  ;;  %v403_v1 = vadd.f32 %v1262_v42, %v402_v57 }
  0xd0   :  { %v544_v60 = vmax.f32 %v440_v54, 0.0  ;;  %v560_v61 = vmax.f32 %v480_v55, 0.0 }
  0xd1   :  { %v513_v8 = vmax.f32 %v363_v0, 0.0  ;;  %v529_v9 = vmax.f32 %v403_v1, 0.0 }
  0xd2   :  { %v996_v62 = vpack.c.bf16 %v544_v60, %v543_v58  ;;  %v1036_v63 = vpack.c.bf16 %v560_v61, %v559_v59 }
  0xd4   :  { %1080 = vst [vmem:[%s1427_s3 + $0x90] sm:$0xff] %v996_v62  }
  0xd5   :  { %1088 = vst [vmem:[%s1427_s3 + $0xd0] sm:$0xff] %v1036_v63   ;;  %v442_v2 = vpop.f32.mrf.mxu2  ;;  %v482_v3 = vpop.f32.mrf.mxu3 }
  0xd6   :  { %v364_v4 = vpop.f32.mrf.mxu0  ;;  %v404_v5 = vpop.f32.mrf.mxu1  ;;  %v443_v14 = vadd.f32 %v1262_v42, %v442_v2  ;;  %v483_v15 = vadd.f32 %v1262_v42, %v482_v3 }
  0xd7   :  { %v365_v6 = vadd.f32 %v1262_v42, %v364_v4  ;;  %v405_v7 = vadd.f32 %v1262_v42, %v404_v5 }
  0xd8   :  { %v545_v22 = vmax.f32 %v443_v14, 0.0  ;;  %v561_v23 = vmax.f32 %v483_v15, 0.0 }
  0xd9   :  { %v514_v10 = vmax.f32 %v365_v6, 0.0  ;;  %v530_v11 = vmax.f32 %v405_v7, 0.0 }
  0xdb   :  { %v921_v12 = vpack.c.bf16 %v514_v10, %v513_v8  ;;  %v961_v13 = vpack.c.bf16 %v530_v11, %v529_v9 }
  0xdd   :  { %1065 = vst [vmem:[%s1427_s3 + $0x18] sm:$0xff] %v921_v12   ;;  %v444_v16 = vpop.f32.mrf.mxu2  ;;  %v484_v17 = vpop.f32.mrf.mxu3 }
  0xde   :  { %1073 = vst [vmem:[%s1427_s3 + $0x58] sm:$0xff] %v961_v13   ;;  %v445_v18 = vadd.f32 %v1262_v42, %v444_v16  ;;  %v485_v19 = vadd.f32 %v1262_v42, %v484_v17  ;;  %v367_v20 = vpop.f32.mrf.mxu0  ;;  %v407_v21 = vpop.f32.mrf.mxu1 }
  0xdf   :  { %v368_v28 = vadd.f32 %v1262_v42, %v367_v20  ;;  %v408_v29 = vadd.f32 %v1262_v42, %v407_v21 }
  0xe0   :  { %v546_v24 = vmax.f32 %v445_v18, 0.0  ;;  %v562_v25 = vmax.f32 %v485_v19, 0.0 }
  0xe1   :  { %v515_v36 = vmax.f32 %v368_v28, 0.0  ;;  %v531_v37 = vmax.f32 %v408_v29, 0.0 }
  0xe2   :  { %v1001_v26 = vpack.c.bf16 %v546_v24, %v545_v22  ;;  %v1041_v27 = vpack.c.bf16 %v562_v25, %v561_v23 }
  0xe4   :  { %1081 = vst [vmem:[%s1427_s3 + $0x98] sm:$0xff] %v1001_v26  }
  0xe5   :  { %1089 = vst [vmem:[%s1427_s3 + $0xd8] sm:$0xff] %v1041_v27   ;;  %v447_v30 = vpop.f32.mrf.mxu2  ;;  %v487_v31 = vpop.f32.mrf.mxu3 }
  0xe6   :  { %v369_v32 = vpop.f32.mrf.mxu0  ;;  %v409_v33 = vpop.f32.mrf.mxu1  ;;  %v448_v43 = vadd.f32 %v1262_v42, %v447_v30  ;;  %v488_v44 = vadd.f32 %v1262_v42, %v487_v31 }
  0xe7   :  { %v370_v34 = vadd.f32 %v1262_v42, %v369_v32  ;;  %v410_v35 = vadd.f32 %v1262_v42, %v409_v33 }
  0xe8   :  { %v547_v51 = vmax.f32 %v448_v43, 0.0  ;;  %v563_v52 = vmax.f32 %v488_v44, 0.0 }
  0xe9   :  { %v516_v38 = vmax.f32 %v370_v34, 0.0  ;;  %v532_v39 = vmax.f32 %v410_v35, 0.0 }
  0xeb   :  { %v926_v40 = vpack.c.bf16 %v516_v38, %v515_v36  ;;  %v966_v41 = vpack.c.bf16 %v532_v39, %v531_v37 }
  0xed   :  { %1066 = vst [vmem:[%s1427_s3 + $0x20] sm:$0xff] %v926_v40   ;;  %v449_v45 = vpop.f32.mrf.mxu2  ;;  %v489_v46 = vpop.f32.mrf.mxu3 }
  0xee   :  { %1074 = vst [vmem:[%s1427_s3 + $0x60] sm:$0xff] %v966_v41   ;;  %v450_v47 = vadd.f32 %v1262_v42, %v449_v45  ;;  %v490_v48 = vadd.f32 %v1262_v42, %v489_v46  ;;  %v372_v49 = vpop.f32.mrf.mxu0  ;;  %v412_v50 = vpop.f32.mrf.mxu1 }
  0xef   :  { %v373_v57 = vadd.f32 %v1262_v42, %v372_v49  ;;  %v413_v58 = vadd.f32 %v1262_v42, %v412_v50 }
  0xf0   :  { %v548_v53 = vmax.f32 %v450_v47, 0.0  ;;  %v564_v54 = vmax.f32 %v490_v48, 0.0 }
  0xf1   :  { %v517_v1 = vmax.f32 %v373_v57, 0.0  ;;  %v533_v2 = vmax.f32 %v413_v58, 0.0 }
  0xf2   :  { %v1006_v55 = vpack.c.bf16 %v548_v53, %v547_v51  ;;  %v1046_v56 = vpack.c.bf16 %v564_v54, %v563_v52 }
  0xf4   :  { %1082 = vst [vmem:[%s1427_s3 + $0xa0] sm:$0xff] %v1006_v55  }
  0xf5   :  { %1090 = vst [vmem:[%s1427_s3 + $0xe0] sm:$0xff] %v1046_v56   ;;  %v452_v59 = vpop.f32.mrf.mxu2  ;;  %v492_v60 = vpop.f32.mrf.mxu3 }
  0xf6   :  { %v374_v61 = vpop.f32.mrf.mxu0  ;;  %v414_v62 = vpop.f32.mrf.mxu1  ;;  %v453_v7 = vadd.f32 %v1262_v42, %v452_v59  ;;  %v493_v8 = vadd.f32 %v1262_v42, %v492_v60 }
  0xf7   :  { %v375_v63 = vadd.f32 %v1262_v42, %v374_v61  ;;  %v415_v0 = vadd.f32 %v1262_v42, %v414_v62 }
  0xf8   :  { %v549_v15 = vmax.f32 %v453_v7, 0.0  ;;  %v565_v16 = vmax.f32 %v493_v8, 0.0 }
  0xf9   :  { %v518_v3 = vmax.f32 %v375_v63, 0.0  ;;  %v534_v4 = vmax.f32 %v415_v0, 0.0 }
  0xfb   :  { %v931_v5 = vpack.c.bf16 %v518_v3, %v517_v1  ;;  %v971_v6 = vpack.c.bf16 %v534_v4, %v533_v2 }
  0xfd   :  { %1067 = vst [vmem:[%s1427_s3 + $0x28] sm:$0xff] %v931_v5   ;;  %v454_v9 = vpop.f32.mrf.mxu2  ;;  %v494_v10 = vpop.f32.mrf.mxu3 }
  0xfe   :  { %1075 = vst [vmem:[%s1427_s3 + $0x68] sm:$0xff] %v971_v6   ;;  %v455_v11 = vadd.f32 %v1262_v42, %v454_v9  ;;  %v495_v12 = vadd.f32 %v1262_v42, %v494_v10  ;;  %v377_v13 = vpop.f32.mrf.mxu0  ;;  %v417_v14 = vpop.f32.mrf.mxu1 }
  0xff   :  { %v378_v21 = vadd.f32 %v1262_v42, %v377_v13  ;;  %v418_v22 = vadd.f32 %v1262_v42, %v417_v14 }
 0x100   :  { %v550_v17 = vmax.f32 %v455_v11, 0.0  ;;  %v566_v18 = vmax.f32 %v495_v12, 0.0 }
 0x101   :  { %v519_v29 = vmax.f32 %v378_v21, 0.0  ;;  %v535_v30 = vmax.f32 %v418_v22, 0.0 }
 0x102   :  { %v1011_v19 = vpack.c.bf16 %v550_v17, %v549_v15  ;;  %v1051_v20 = vpack.c.bf16 %v566_v18, %v565_v16 }
 0x104   :  { %1083 = vst [vmem:[%s1427_s3 + $0xa8] sm:$0xff] %v1011_v19  }
 0x105   :  { %1091 = vst [vmem:[%s1427_s3 + $0xe8] sm:$0xff] %v1051_v20   ;;  %v457_v23 = vpop.f32.mrf.mxu2  ;;  %v497_v24 = vpop.f32.mrf.mxu3 }
 0x106   :  { %v379_v25 = vpop.f32.mrf.mxu0  ;;  %v419_v26 = vpop.f32.mrf.mxu1  ;;  %v458_v35 = vadd.f32 %v1262_v42, %v457_v23  ;;  %v498_v36 = vadd.f32 %v1262_v42, %v497_v24 }
 0x107   :  { %v380_v27 = vadd.f32 %v1262_v42, %v379_v25  ;;  %v420_v28 = vadd.f32 %v1262_v42, %v419_v26 }
 0x108   :  { %v551_v44 = vmax.f32 %v458_v35, 0.0  ;;  %v567_v45 = vmax.f32 %v498_v36, 0.0 }
 0x109   :  { %v520_v31 = vmax.f32 %v380_v27, 0.0  ;;  %v536_v32 = vmax.f32 %v420_v28, 0.0 }
 0x10b   :  { %v936_v33 = vpack.c.bf16 %v520_v31, %v519_v29  ;;  %v976_v34 = vpack.c.bf16 %v536_v32, %v535_v30 }
 0x10d   :  { %1068 = vst [vmem:[%s1427_s3 + $0x30] sm:$0xff] %v936_v33   ;;  %v459_v37 = vpop.f32.mrf.mxu2  ;;  %v499_v38 = vpop.f32.mrf.mxu3 }
 0x10e   :  { %1076 = vst [vmem:[%s1427_s3 + $0x70] sm:$0xff] %v976_v34   ;;  %v460_v39 = vadd.f32 %v1262_v42, %v459_v37  ;;  %v500_v40 = vadd.f32 %v1262_v42, %v499_v38  ;;  %v382_v41 = vpop.f32.mrf.mxu0  ;;  %v422_v43 = vpop.f32.mrf.mxu1 }
 0x10f   :  { %v383_v50 = vadd.f32 %v1262_v42, %v382_v41  ;;  %v423_v51 = vadd.f32 %v1262_v42, %v422_v43 }
 0x110   :  { %v552_v46 = vmax.f32 %v460_v39, 0.0  ;;  %v568_v47 = vmax.f32 %v500_v40, 0.0 }
 0x111   :  { %v521_v58 = vmax.f32 %v383_v50, 0.0  ;;  %v537_v59 = vmax.f32 %v423_v51, 0.0 }
 0x112   :  { %v1016_v48 = vpack.c.bf16 %v552_v46, %v551_v44  ;;  %v1056_v49 = vpack.c.bf16 %v568_v47, %v567_v45 }
 0x114   :  { %1084 = vst [vmem:[%s1427_s3 + $0xb0] sm:$0xff] %v1016_v48  }
 0x115   :  { %1092 = vst [vmem:[%s1427_s3 + $0xf0] sm:$0xff] %v1056_v49   ;;  %v462_v52 = vpop.f32.mrf.mxu2  ;;  %v502_v53 = vpop.f32.mrf.mxu3 }
 0x116   :  { %v384_v54 = vpop.f32.mrf.mxu0  ;;  %v424_v55 = vpop.f32.mrf.mxu1  ;;  %v463_v0 = vadd.f32 %v1262_v42, %v462_v52  ;;  %v503_v1 = vadd.f32 %v1262_v42, %v502_v53 }
 0x117   :  { %v385_v56 = vadd.f32 %v1262_v42, %v384_v54  ;;  %v425_v57 = vadd.f32 %v1262_v42, %v424_v55 }
 0x118   :  { %v553_v6 = vmax.f32 %v463_v0, 0.0  ;;  %v569_v7 = vmax.f32 %v503_v1, 0.0 }
 0x119   :  { %v522_v60 = vmax.f32 %v385_v56, 0.0  ;;  %v538_v61 = vmax.f32 %v425_v57, 0.0 }
 0x11b   :  { %v941_v62 = vpack.c.bf16 %v522_v60, %v521_v58  ;;  %v981_v63 = vpack.c.bf16 %v538_v61, %v537_v59 }
 0x11d   :  { %1069 = vst [vmem:[%s1427_s3 + $0x38] sm:$0xff] %v941_v62   ;;  %v464_v2 = vpop.f32.mrf.mxu2  ;;  %v504_v3 = vpop.f32.mrf.mxu3 }
 0x11e   :  { %1077 = vst [vmem:[%s1427_s3 + $0x78] sm:$0xff] %v981_v63   ;;  %v465_v4 = vadd.f32 %v1262_v42, %v464_v2  ;;  %v505_v5 = vadd.f32 %v1262_v42, %v504_v3 }
 0x120   :  { %v554_v8 = vmax.f32 %v465_v4, 0.0  ;;  %v570_v9 = vmax.f32 %v505_v5, 0.0 }
 0x122   :  { %v1021_v10 = vpack.c.bf16 %v554_v8, %v553_v6  ;;  %v1061_v11 = vpack.c.bf16 %v570_v9, %v569_v7 }
 0x124   :  { %1085 = vst [vmem:[%s1427_s3 + $0xb8] sm:$0xff] %v1021_v10  }
 0x125   :  { %1093 = vst [vmem:[%s1427_s3 + $0xf8] sm:$0xff] %v1061_v11  }

// kernel: se_bottleneck_forward.5
= control target key start
LH: loop header
LB: loop body
LE: loop exit
PB: predicated region body
PF: predicated region fallthrough
CT: control target
= control target key end

     0   :  { %s766_s12 = smov 0   ;;  %s768_s13 = smov 0   ;;  %s934_s0 = inlined_call_operand.vmem [shape: bf16[2,256,128], index: 0, kind: input, shape index: {}]   ;;  %s935_s1 = inlined_call_operand.vmem [shape: f32[2,256,128], index: 1, kind: input, shape index: {}]   ;;  %s936_s2 = inlined_call_operand.vmem [shape: f32[2,1,128], index: 2, kind: input, shape index: {}]   ;;  %s937_s3 = inlined_call_operand.vmem [shape: f32[2,256,128], index: 3, kind: output, shape index: {}]  }
   0x1   :  { %s770_s14 = smov 0  }
   0x2 LB: > { %s25_s15 = sadd.s32 1, %s740_s13  ;;  %p606_p0 = scmp.ge.s32.totalorder %s744_s14, 1  ;;  %s744_s14 = sphi %s770_s14, %s13_s14   ;;  %s740_s13 = sphi %s768_s13, %s939_s13   ;;  %s736_s12 = sphi %s766_s12, %s938_s12  }
   0x3   : > { %p27_p1 = scmp.ge.s32.totalorder %s25_s15, 2  ;;  %p183_p2 = scmp.lt.s32.totalorder %s744_s14, 3 }
   0x5   : > { %s941_s15 = smov (%p27_p1, %s25_s15), 0  ;;  %p184_p3 = pnand %p606_p0, %p183_p2 }
   0x6   : > { %p228_p4 = scmp.lt.s32.totalorder (!%p184_p3), %s736_s12, 1 }
   0x7   : > { %187 = sbr.rel (%p184_p3) target bundleno = 56 (0x38), region = 32 }
   0xc   : > { %s943_s12 = smov (!%p228_p4, %s736_s12), 1 }
   0xd   : > { %s615_s16 = sshll.u32 %s943_s12, 7  ;;  %s616_s17 = sshll.u32 %s943_s12, 8 }
   0xe   : > { %s791_s20 = scalar_lea.vmem %s934_s0, %s615_s16  ;;  %s798_s23 = scalar_lea.vmem %s935_s1, %s616_s17 }
   0xf   : > { %s249_s26 = scalar_lea.vmem %s936_s2, %s943_s12  ;;  %v619_v0 = vld [vmem:[%s791_s20] sm:$0xff]   ;;  %v682_v4 = vld [vmem:[%s791_s20 + $0x8] sm:$0xff]   ;;  %v683_v9 = vld [vmem:[%s791_s20 + $0x10] sm:$0xff]   ;;  %s829_s29 = scalar_lea.vmem %s937_s3, %s616_s17 }
  0x10   : > { %v620_v1 = vunpack.c.l.bf16 %v619_v0  ;;  %v805_v2 = vld [vmem:[%s249_s26] ss:$0 sm:$0xff]  ;;  %v621_v3 = vunpack.c.h.bf16 %v619_v0  ;;  %v361_v6 = vld [vmem:[%s798_s23 + $0x8] sm:$0xff]  ;;  %v624_v7 = vunpack.c.l.bf16 %v682_v4  ;;  %v625_v8 = vunpack.c.h.bf16 %v682_v4  ;;  %v362_v12 = vld [vmem:[%s798_s23 + $0x10] sm:$0xff] }
  0x11   : > { %v360_v5 = vld [vmem:[%s798_s23] sm:$0xff]  ;;  %v363_v13 = vld [vmem:[%s798_s23 + $0x18] sm:$0xff]  ;;  %v628_v14 = vunpack.c.l.bf16 %v683_v9  ;;  %v629_v15 = vunpack.c.h.bf16 %v683_v9  ;;  %v365_v20 = vld [vmem:[%s798_s23 + $0x28] sm:$0xff] }
  0x12   : > { %v328_v10 = vmul.f32 %v805_v2, %v620_v1  ;;  %v329_v11 = vmul.f32 %v805_v2, %v621_v3  ;;  %v684_v16 = vld [vmem:[%s791_s20 + $0x18] sm:$0xff]   ;;  %v330_v17 = vmul.f32 %v805_v2, %v624_v7  ;;  %v331_v18 = vmul.f32 %v805_v2, %v625_v8  ;;  %v364_v19 = vld [vmem:[%s798_s23 + $0x20] sm:$0xff]  ;;  %v366_v27 = vld [vmem:[%s798_s23 + $0x30] sm:$0xff] }
  0x13   : > { %v632_v21 = vunpack.c.l.bf16 %v684_v16  ;;  %v633_v22 = vunpack.c.h.bf16 %v684_v16  ;;  %v332_v25 = vmul.f32 %v805_v2, %v628_v14  ;;  %v333_v26 = vmul.f32 %v805_v2, %v629_v15  ;;  %v367_v28 = vld [vmem:[%s798_s23 + $0x38] sm:$0xff]  ;;  %v685_v33 = vld [vmem:[%s791_s20 + $0x20] sm:$0xff]   ;;  %v686_v38 = vld [vmem:[%s791_s20 + $0x28] sm:$0xff]  }
  0x14   : > { %v392_v23 = vadd.f32 %v360_v5, %v328_v10  ;;  %v393_v24 = vadd.f32 %v361_v6, %v329_v11  ;;  %v394_v29 = vadd.f32 %v362_v12, %v330_v17  ;;  %v395_v30 = vadd.f32 %v363_v13, %v331_v18  ;;  %v687_v43 = vld [vmem:[%s791_s20 + $0x30] sm:$0xff]   ;;  %v688_v48 = vld [vmem:[%s791_s20 + $0x38] sm:$0xff]   ;;  %v368_v51 = vld [vmem:[%s798_s23 + $0x40] sm:$0xff] }
  0x15   : > { %v334_v31 = vmul.f32 %v805_v2, %v632_v21  ;;  %v335_v32 = vmul.f32 %v805_v2, %v633_v22  ;;  %v396_v36 = vadd.f32 %v364_v19, %v332_v25  ;;  %v397_v37 = vadd.f32 %v365_v20, %v333_v26  ;;  %v369_v52 = vld [vmem:[%s798_s23 + $0x48] sm:$0xff]  ;;  %v370_v57 = vld [vmem:[%s798_s23 + $0x50] sm:$0xff]  ;;  %v371_v58 = vld [vmem:[%s798_s23 + $0x58] sm:$0xff] }
  0x16   : > { %v424_v34 = vmax.f32 %v392_v23, 0.0  ;;  %v425_v35 = vmax.f32 %v393_v24, 0.0  ;;  %v426_v39 = vmax.f32 %v394_v29, 0.0  ;;  %v427_v40 = vmax.f32 %v395_v30, 0.0  ;;  %v372_v63 = vld [vmem:[%s798_s23 + $0x60] sm:$0xff]  ;;  %v373_v0 = vld [vmem:[%s798_s23 + $0x68] sm:$0xff] }
  0x17   : > { %v398_v41 = vadd.f32 %v366_v27, %v334_v31  ;;  %v399_v42 = vadd.f32 %v367_v28, %v335_v32  ;;  %v428_v44 = vmax.f32 %v396_v36, 0.0  ;;  %v429_v45 = vmax.f32 %v397_v37, 0.0  ;;  %v374_v8 = vld [vmem:[%s798_s23 + $0x70] sm:$0xff]  ;;  %v375_v9 = vld [vmem:[%s798_s23 + $0x78] sm:$0xff]  ;;  %v689_v14 = vld [vmem:[%s791_s20 + $0x40] sm:$0xff]  }
  0x18   : > { %456 = vst [vmem:[%s829_s29] sm:$0xff] %v424_v34  ;;  %v636_v46 = vunpack.c.l.bf16 %v685_v33  ;;  %v637_v47 = vunpack.c.h.bf16 %v685_v33  ;;  %v640_v53 = vunpack.c.l.bf16 %v686_v38  ;;  %v641_v54 = vunpack.c.h.bf16 %v686_v38  ;;  %v690_v19 = vld [vmem:[%s791_s20 + $0x48] sm:$0xff]   ;;  %v691_v24 = vld [vmem:[%s791_s20 + $0x50] sm:$0xff]   ;;  %v692_v29 = vld [vmem:[%s791_s20 + $0x58] sm:$0xff]  }
  0x19   : > { %457 = vst [vmem:[%s829_s29 + $0x8] sm:$0xff] %v425_v35  ;;  %v430_v49 = vmax.f32 %v398_v41, 0.0  ;;  %v431_v50 = vmax.f32 %v399_v42, 0.0  ;;  %v644_v59 = vunpack.c.l.bf16 %v687_v43  ;;  %v645_v60 = vunpack.c.h.bf16 %v687_v43  ;;  %v376_v32 = vld [vmem:[%s798_s23 + $0x80] sm:$0xff]  ;;  %v377_v33 = vld [vmem:[%s798_s23 + $0x88] sm:$0xff]  ;;  %v378_v38 = vld [vmem:[%s798_s23 + $0x90] sm:$0xff] }
  0x1a   : > { %458 = vst [vmem:[%s829_s29 + $0x10] sm:$0xff] %v426_v39  ;;  %v336_v55 = vmul.f32 %v805_v2, %v636_v46  ;;  %v337_v56 = vmul.f32 %v805_v2, %v637_v47  ;;  %v338_v61 = vmul.f32 %v805_v2, %v640_v53  ;;  %v339_v62 = vmul.f32 %v805_v2, %v641_v54  ;;  %v379_v39 = vld [vmem:[%s798_s23 + $0x98] sm:$0xff] }
  0x1b   : > { %459 = vst [vmem:[%s829_s29 + $0x18] sm:$0xff] %v427_v40  ;;  %v648_v1 = vunpack.c.l.bf16 %v688_v48  ;;  %v649_v3 = vunpack.c.h.bf16 %v688_v48  ;;  %v340_v6 = vmul.f32 %v805_v2, %v644_v59  ;;  %v341_v7 = vmul.f32 %v805_v2, %v645_v60  ;;  %v383_v53 = vld [vmem:[%s798_s23 + $0xb8] sm:$0xff] }
  0x1c   : > { %460 = vst [vmem:[%s829_s29 + $0x20] sm:$0xff] %v428_v44  ;;  %v400_v4 = vadd.f32 %v368_v51, %v336_v55  ;;  %v401_v5 = vadd.f32 %v369_v52, %v337_v56  ;;  %v402_v10 = vadd.f32 %v370_v57, %v338_v61  ;;  %v403_v11 = vadd.f32 %v371_v58, %v339_v62  ;;  %v380_v44 = vld [vmem:[%s798_s23 + $0xa0] sm:$0xff]  ;;  %v382_v52 = vld [vmem:[%s798_s23 + $0xb0] sm:$0xff] }
  0x1d   : > { %461 = vst [vmem:[%s829_s29 + $0x28] sm:$0xff] %v429_v45  ;;  %v342_v12 = vmul.f32 %v805_v2, %v648_v1  ;;  %v343_v13 = vmul.f32 %v805_v2, %v649_v3  ;;  %v404_v17 = vadd.f32 %v372_v63, %v340_v6  ;;  %v405_v18 = vadd.f32 %v373_v0, %v341_v7  ;;  %v381_v45 = vld [vmem:[%s798_s23 + $0xa8] sm:$0xff]  ;;  %v693_v58 = vld [vmem:[%s791_s20 + $0x60] sm:$0xff]  }
  0x1e   : > { %462 = vst [vmem:[%s829_s29 + $0x30] sm:$0xff] %v430_v49  ;;  %v432_v15 = vmax.f32 %v400_v4, 0.0  ;;  %v433_v16 = vmax.f32 %v401_v5, 0.0  ;;  %v434_v20 = vmax.f32 %v402_v10, 0.0  ;;  %v435_v21 = vmax.f32 %v403_v11, 0.0  ;;  %v694_v63 = vld [vmem:[%s791_s20 + $0x68] sm:$0xff]  }
  0x1f   : > { %463 = vst [vmem:[%s829_s29 + $0x38] sm:$0xff] %v431_v50  ;;  %v406_v22 = vadd.f32 %v374_v8, %v342_v12  ;;  %v407_v23 = vadd.f32 %v375_v9, %v343_v13  ;;  %v436_v25 = vmax.f32 %v404_v17, 0.0  ;;  %v437_v26 = vmax.f32 %v405_v18, 0.0  ;;  %v695_v5 = vld [vmem:[%s791_s20 + $0x70] sm:$0xff]   ;;  %v696_v10 = vld [vmem:[%s791_s20 + $0x78] sm:$0xff]   ;;  %v384_v13 = vld [vmem:[%s798_s23 + $0xc0] sm:$0xff] }
  0x20   : > { %464 = vst [vmem:[%s829_s29 + $0x40] sm:$0xff] %v432_v15  ;;  %v652_v27 = vunpack.c.l.bf16 %v689_v14  ;;  %v653_v28 = vunpack.c.h.bf16 %v689_v14  ;;  %v656_v34 = vunpack.c.l.bf16 %v690_v19  ;;  %v657_v35 = vunpack.c.h.bf16 %v690_v19  ;;  %v385_v14 = vld [vmem:[%s798_s23 + $0xc8] sm:$0xff]  ;;  %v386_v19 = vld [vmem:[%s798_s23 + $0xd0] sm:$0xff] }
  0x21   : > { %465 = vst [vmem:[%s829_s29 + $0x48] sm:$0xff] %v433_v16  ;;  %v438_v30 = vmax.f32 %v406_v22, 0.0  ;;  %v439_v31 = vmax.f32 %v407_v23, 0.0  ;;  %v660_v40 = vunpack.c.l.bf16 %v691_v24  ;;  %v661_v41 = vunpack.c.h.bf16 %v691_v24 }
  0x22   : > { %466 = vst [vmem:[%s829_s29 + $0x50] sm:$0xff] %v434_v20  ;;  %v344_v36 = vmul.f32 %v805_v2, %v652_v27  ;;  %v345_v37 = vmul.f32 %v805_v2, %v653_v28  ;;  %v346_v42 = vmul.f32 %v805_v2, %v656_v34  ;;  %v347_v43 = vmul.f32 %v805_v2, %v657_v35  ;;  %v387_v20 = vld [vmem:[%s798_s23 + $0xd8] sm:$0xff] }
  0x23   : > { %467 = vst [vmem:[%s829_s29 + $0x58] sm:$0xff] %v435_v21  ;;  %v664_v46 = vunpack.c.l.bf16 %v692_v29  ;;  %v665_v47 = vunpack.c.h.bf16 %v692_v29  ;;  %v348_v50 = vmul.f32 %v805_v2, %v660_v40  ;;  %v349_v51 = vmul.f32 %v805_v2, %v661_v41  ;;  %v391_v34 = vld [vmem:[%s798_s23 + $0xf8] sm:$0xff] }
  0x24   : > { %468 = vst [vmem:[%s829_s29 + $0x60] sm:$0xff] %v436_v25  ;;  %v408_v48 = vadd.f32 %v376_v32, %v344_v36  ;;  %v409_v49 = vadd.f32 %v377_v33, %v345_v37  ;;  %v410_v54 = vadd.f32 %v378_v38, %v346_v42  ;;  %v411_v55 = vadd.f32 %v379_v39, %v347_v43  ;;  %v388_v25 = vld [vmem:[%s798_s23 + $0xe0] sm:$0xff]  ;;  %v390_v33 = vld [vmem:[%s798_s23 + $0xf0] sm:$0xff] }
  0x25   : > { %469 = vst [vmem:[%s829_s29 + $0x68] sm:$0xff] %v437_v26  ;;  %v350_v56 = vmul.f32 %v805_v2, %v664_v46  ;;  %v351_v57 = vmul.f32 %v805_v2, %v665_v47  ;;  %v412_v61 = vadd.f32 %v380_v44, %v348_v50  ;;  %v413_v62 = vadd.f32 %v381_v45, %v349_v51  ;;  %v389_v26 = vld [vmem:[%s798_s23 + $0xe8] sm:$0xff] }
  0x26   : > { %470 = vst [vmem:[%s829_s29 + $0x70] sm:$0xff] %v438_v30  ;;  %v440_v59 = vmax.f32 %v408_v48, 0.0  ;;  %v441_v60 = vmax.f32 %v409_v49, 0.0  ;;  %v442_v0 = vmax.f32 %v410_v54, 0.0  ;;  %v443_v1 = vmax.f32 %v411_v55, 0.0 }
  0x27   : > { %471 = vst [vmem:[%s829_s29 + $0x78] sm:$0xff] %v439_v31  ;;  %v414_v3 = vadd.f32 %v382_v52, %v350_v56  ;;  %v415_v4 = vadd.f32 %v383_v53, %v351_v57  ;;  %v444_v6 = vmax.f32 %v412_v61, 0.0  ;;  %v445_v7 = vmax.f32 %v413_v62, 0.0 }
  0x28   : > { %472 = vst [vmem:[%s829_s29 + $0x80] sm:$0xff] %v440_v59  ;;  %v668_v8 = vunpack.c.l.bf16 %v693_v58  ;;  %v669_v9 = vunpack.c.h.bf16 %v693_v58  ;;  %v672_v15 = vunpack.c.l.bf16 %v694_v63  ;;  %v673_v16 = vunpack.c.h.bf16 %v694_v63 }
  0x29   : > { %473 = vst [vmem:[%s829_s29 + $0x88] sm:$0xff] %v441_v60  ;;  %v446_v11 = vmax.f32 %v414_v3, 0.0  ;;  %v447_v12 = vmax.f32 %v415_v4, 0.0  ;;  %v676_v21 = vunpack.c.l.bf16 %v695_v5  ;;  %v677_v22 = vunpack.c.h.bf16 %v695_v5 }
  0x2a   : > { %474 = vst [vmem:[%s829_s29 + $0x90] sm:$0xff] %v442_v0  ;;  %v352_v17 = vmul.f32 %v805_v2, %v668_v8  ;;  %v353_v18 = vmul.f32 %v805_v2, %v669_v9  ;;  %v354_v23 = vmul.f32 %v805_v2, %v672_v15  ;;  %v355_v24 = vmul.f32 %v805_v2, %v673_v16 }
  0x2b   : > { %475 = vst [vmem:[%s829_s29 + $0x98] sm:$0xff] %v443_v1  ;;  %v680_v27 = vunpack.c.l.bf16 %v696_v10  ;;  %v681_v28 = vunpack.c.h.bf16 %v696_v10  ;;  %v356_v31 = vmul.f32 %v805_v2, %v676_v21  ;;  %v357_v32 = vmul.f32 %v805_v2, %v677_v22 }
  0x2c   : > { %476 = vst [vmem:[%s829_s29 + $0xa0] sm:$0xff] %v444_v6  ;;  %v416_v29 = vadd.f32 %v384_v13, %v352_v17  ;;  %v417_v30 = vadd.f32 %v385_v14, %v353_v18  ;;  %v418_v35 = vadd.f32 %v386_v19, %v354_v23  ;;  %v419_v36 = vadd.f32 %v387_v20, %v355_v24 }
  0x2d   : > { %477 = vst [vmem:[%s829_s29 + $0xa8] sm:$0xff] %v445_v7  ;;  %v358_v37 = vmul.f32 %v805_v2, %v680_v27  ;;  %v359_v38 = vmul.f32 %v805_v2, %v681_v28  ;;  %v420_v41 = vadd.f32 %v388_v25, %v356_v31  ;;  %v421_v42 = vadd.f32 %v389_v26, %v357_v32 }
  0x2e   : > { %478 = vst [vmem:[%s829_s29 + $0xb0] sm:$0xff] %v446_v11  ;;  %v448_v39 = vmax.f32 %v416_v29, 0.0  ;;  %v449_v40 = vmax.f32 %v417_v30, 0.0  ;;  %v450_v43 = vmax.f32 %v418_v35, 0.0  ;;  %v451_v44 = vmax.f32 %v419_v36, 0.0 }
  0x2f   : > { %479 = vst [vmem:[%s829_s29 + $0xb8] sm:$0xff] %v447_v12  ;;  %v422_v45 = vadd.f32 %v390_v33, %v358_v37  ;;  %v423_v46 = vadd.f32 %v391_v34, %v359_v38  ;;  %v452_v47 = vmax.f32 %v420_v41, 0.0  ;;  %v453_v48 = vmax.f32 %v421_v42, 0.0 }
  0x30   : > { %480 = vst [vmem:[%s829_s29 + $0xc0] sm:$0xff] %v448_v39 }
  0x31   : > { %481 = vst [vmem:[%s829_s29 + $0xc8] sm:$0xff] %v449_v40  ;;  %v454_v2 = vmax.f32 %v422_v45, 0.0  ;;  %v455_v49 = vmax.f32 %v423_v46, 0.0 }
  0x32   : > { %482 = vst [vmem:[%s829_s29 + $0xd0] sm:$0xff] %v450_v43 }
  0x33   : > { %483 = vst [vmem:[%s829_s29 + $0xd8] sm:$0xff] %v451_v44 }
  0x34   : > { %484 = vst [vmem:[%s829_s29 + $0xe0] sm:$0xff] %v452_v47 }
  0x35   : > { %485 = vst [vmem:[%s829_s29 + $0xe8] sm:$0xff] %v453_v48 }
  0x36   : > { %486 = vst [vmem:[%s829_s29 + $0xf0] sm:$0xff] %v454_v2 }
  0x37   : > { %487 = vst [vmem:[%s829_s29 + $0xf8] sm:$0xff] %v455_v49 }
  0x38 PF: > { %s13_s14 = sadd.s32 1, %s744_s14   ;;  %s938_s12 = smov %s740_s13 }
  0x39   : > { %p10_p5 = scmp.ge.s32.totalorder %s13_s14, 4   ;;  %s939_s13 = smov %s941_s15 }
  0x3b   :  { %12 = sbr.rel (!%p10_p5) target bundleno = 2 (0x2), region = 68 }

// kernel: se_bottleneck_forward.4
= control target key start
LH: loop header
LB: loop body
LE: loop exit
PB: predicated region body
PF: predicated region fallthrough
CT: control target
= control target key end

     0   :  { %s4339_s21 = smov 0   ;;  %s4341_s22 = smov 0   ;;  %s5239_s0 = inlined_call_operand.vmem [shape: bf16[2,256,1152], index: 0, kind: input, shape index: {}]   ;;  %s5240_s1 = inlined_call_operand.vmem [shape: bf16[1152,128], index: 1, kind: input, shape index: {}]   ;;  %s5241_s2 = inlined_call_operand.vmem [shape: f32[1,128], index: 2, kind: input, shape index: {}]   ;;  %s5242_s3 = inlined_call_operand.vmem [shape: bf16[128,128], index: 3, kind: input, shape index: {}]   ;;  %s5243_s4 = inlined_call_operand.vmem [shape: f32[1,128], index: 4, kind: input, shape index: {}]   ;;  %s5244_s5 = inlined_call_operand.vmem [shape: bf16[2,256,128], index: 5, kind: output, shape index: {0}]   ;;  %s5245_s6 = inlined_call_operand.vmem [shape: f32[2,1,128], index: 6, kind: output, shape index: {1}]  }
   0x1   :  { %s4343_s23 = smov 0  }
   0x2 LB: > { %s29_s24 = sadd.s32 1, %s4297_s22  ;;  %p3013_p0 = scmp.ge.s32.totalorder %s4301_s23, 1  ;;  %s4301_s23 = sphi %s4343_s23, %s17_s23   ;;  %s4297_s22 = sphi %s4341_s22, %s5247_s22   ;;  %s4293_s21 = sphi %s4339_s21, %s5246_s21  }
   0x3   : > { %p31_p1 = scmp.ge.s32.totalorder %s29_s24, 2  ;;  %p237_p2 = scmp.lt.s32.totalorder %s4301_s23, 3 }
   0x5   : > { %s5249_s24 = smov (%p31_p1, %s29_s24), 0  ;;  %p238_p3 = pnand %p3013_p0, %p237_p2 }
   0x6   : > { %p280_p4 = scmp.lt.s32.totalorder (!%p238_p3), %s4293_s21, 1 }
   0x7   : > { %241 = sbr.rel (%p238_p3) target bundleno = 971 (0x3cb), region = 40 }
   0xc   : > { %v4067_v0 = vld [vmem:[%s5240_s1 + $0x38] sm:$0xff]  ;;  %v4066_v2 = vld [vmem:[%s5240_s1 + $0x30] sm:$0xff]  ;;  %v4065_v4 = vld [vmem:[%s5240_s1 + $0x28] sm:$0xff]  ;;  %s5251_s21 = smov (!%p280_p4, %s4293_s21), 1 }
   0xd   : > { %v4075_v1 = vld [vmem:[%s5240_s1 + $0x78] sm:$0xff]  ;;  %4235 = vmatpush.bf16.msra.mxu2 %v4067_v0  ;;  %v4074_v3 = vld [vmem:[%s5240_s1 + $0x70] sm:$0xff]  ;;  %1779 = vmatpush.bf16.msra.mxu0 %v4067_v0  ;;  %v4073_v5 = vld [vmem:[%s5240_s1 + $0x68] sm:$0xff]  ;;  %s4251_s29 = smul.u32 1152, %s5251_s21  ;;  %s3915_s15 = sshll.u32 %s5251_s21, 7 }
   0xe   : > { %4243 = vmatpush.bf16.msra.mxu3 %v4075_v1  ;;  %1868 = vmatpush.bf16.msra.mxu1 %v4075_v1  ;;  %v4064_v6 = vld [vmem:[%s5240_s1 + $0x20] sm:$0xff]  ;;  %v4063_v8 = vld [vmem:[%s5240_s1 + $0x18] sm:$0xff]  ;;  %v4062_v10 = vld [vmem:[%s5240_s1 + $0x10] sm:$0xff]  ;;  %s5155_s18 = scalar_lea.vmem %s5244_s5, %s3915_s15  ;;  %s5218_s25 = scalar_lea.vmem %s5245_s6, %s5251_s21 }
   0xf   : > { %v4072_v7 = vld [vmem:[%s5240_s1 + $0x60] sm:$0xff]  ;;  %v4071_v9 = vld [vmem:[%s5240_s1 + $0x58] sm:$0xff]  ;;  %v4070_v11 = vld [vmem:[%s5240_s1 + $0x50] sm:$0xff]  ;;  %s4409_s12 = scalar_lea.vmem %s5239_s0, %s4251_s29 }
  0x10   : > { %v4061_v12 = vld [vmem:[%s5240_s1 + $0x8] sm:$0xff]  ;;  %v4060_v14 = vld [vmem:[%s5240_s1] sm:$0xff]  ;;  %v4083_v20 = vld [vmem:[%s5240_s1 + $0xb8] sm:$0xff] }
  0x11   : > { %4236 = vmatpush.bf16.msra.mxu2 %v4066_v2  ;;  %1780 = vmatpush.bf16.msra.mxu0 %v4066_v2  ;;  %v4069_v13 = vld [vmem:[%s5240_s1 + $0x48] sm:$0xff]  ;;  %v4068_v15 = vld [vmem:[%s5240_s1 + $0x40] sm:$0xff]  ;;  %v4091_v23 = vld [vmem:[%s5240_s1 + $0xf8] sm:$0xff] }
  0x12   : > { %4244 = vmatpush.bf16.msra.mxu3 %v4074_v3  ;;  %1869 = vmatpush.bf16.msra.mxu1 %v4074_v3  ;;  %v3307_v16 = vld [vmem:[%s4409_s12 + $0x240] sm:$0xf]  ;;  %v3992_v17 = vld [vmem:[%s4409_s12 + $0x260] sm:$0xf0]  ;;  %v3309_v19 = vld [vmem:[%s4409_s12 + $0x264] sm:$0xf0] }
  0x13   : > { %v3988_v18 = vld [vmem:[%s4409_s12 + $0x244] sm:$0xf]  ;;  %v3019_v21 = vld [vmem:[%s4409_s12] sm:$0xf]  ;;  %v3021_v25 = vld [vmem:[%s4409_s12 + $0x24] sm:$0xf0]  ;;  %v3308_v26 = vor.u32 %v3992_v17, %v3307_v16 }
  0x14   : > { %v3920_v22 = vld [vmem:[%s4409_s12 + $0x20] sm:$0xf0]  ;;  %v3312_v27 = vor.u32 %v3988_v18, %v3309_v19  ;;  %v4099_v30 = vld [vmem:[%s5240_s1 + $0x138] sm:$0xff]  ;;  %v4082_v31 = vld [vmem:[%s5240_s1 + $0xb0] sm:$0xff] }
  0x15   : > { %4237 = vmatpush.bf16.msra.mxu2 %v4065_v4  ;;  %1781 = vmatpush.bf16.msra.mxu0 %v4065_v4  ;;  %v3916_v24 = vld [vmem:[%s4409_s12 + $0x4] sm:$0xf]  ;;  %v3020_v28 = vor.u32 %v3920_v22, %v3019_v21  ;;  %v4090_v32 = vld [vmem:[%s5240_s1 + $0xf0] sm:$0xff]  ;;  %v4081_v34 = vld [vmem:[%s5240_s1 + $0xa8] sm:$0xff] }
  0x16   : > { %4245 = vmatpush.bf16.msra.mxu3 %v4073_v5  ;;  %1870 = vmatpush.bf16.msra.mxu1 %v4073_v5  ;;  %v3024_v29 = vor.u32 %v3916_v24, %v3021_v25  ;;  %v4098_v33 = vld [vmem:[%s5240_s1 + $0x130] sm:$0xff]  ;;  %v4089_v35 = vld [vmem:[%s5240_s1 + $0xe8] sm:$0xff]  ;;  %v4080_v49 = vld [vmem:[%s5240_s1 + $0xa0] sm:$0xff] }
  0x17   : > { %v4097_v36 = vld [vmem:[%s5240_s1 + $0x128] sm:$0xff]  ;;  %v3345_v40 = vld [vmem:[%s4409_s12 + $0x2ac] sm:$0xf0]  ;;  %v4088_v50 = vld [vmem:[%s5240_s1 + $0xe0] sm:$0xff] }
  0x18   : > { %v3343_v37 = vld [vmem:[%s4409_s12 + $0x288] sm:$0xf]  ;;  %v4001_v38 = vld [vmem:[%s4409_s12 + $0x2a8] sm:$0xf0]  ;;  %v3057_v44 = vld [vmem:[%s4409_s12 + $0x6c] sm:$0xf0] }
  0x19   : > { %4238 = vmatpush.bf16.msra.mxu2 %v4064_v6  ;;  %1782 = vmatpush.bf16.msra.mxu0 %v4064_v6  ;;  %v3997_v39 = vld [vmem:[%s4409_s12 + $0x28c] sm:$0xf]  ;;  %v3055_v41 = vld [vmem:[%s4409_s12 + $0x48] sm:$0xf]  ;;  %v3344_v45 = vor.u32 %v4001_v38, %v3343_v37  ;;  %v4096_v51 = vld [vmem:[%s5240_s1 + $0x120] sm:$0xff] }
  0x1a   : > { %4246 = vmatpush.bf16.msra.mxu3 %v4072_v7  ;;  %1871 = vmatpush.bf16.msra.mxu1 %v4072_v7  ;;  %v3929_v42 = vld [vmem:[%s4409_s12 + $0x68] sm:$0xf0]  ;;  %v3348_v46 = vor.u32 %v3997_v39, %v3345_v40  ;;  %v3379_v52 = vld [vmem:[%s4409_s12 + $0x2d0] sm:$0xf]  ;;  %v4010_v53 = vld [vmem:[%s4409_s12 + $0x2f0] sm:$0xf0] }
  0x1b   : > { %v3925_v43 = vld [vmem:[%s4409_s12 + $0x4c] sm:$0xf]  ;;  %v3056_v47 = vor.u32 %v3929_v42, %v3055_v41  ;;  %v4006_v54 = vld [vmem:[%s4409_s12 + $0x2d4] sm:$0xf]  ;;  %v3381_v55 = vld [vmem:[%s4409_s12 + $0x2f4] sm:$0xf0]  ;;  %v3380_v60 = vor.u32 %v4010_v53, %v3379_v52 }
  0x1c   : > { %v3060_v48 = vor.u32 %v3925_v43, %v3057_v44  ;;  %v3091_v56 = vld [vmem:[%s4409_s12 + $0x90] sm:$0xf]  ;;  %v3938_v57 = vld [vmem:[%s4409_s12 + $0xb0] sm:$0xf0]  ;;  %v3093_v59 = vld [vmem:[%s4409_s12 + $0xb4] sm:$0xf0]  ;;  %v3384_v61 = vor.u32 %v4006_v54, %v3381_v55 }
  0x1d   : > { %4239 = vmatpush.bf16.msra.mxu2 %v4063_v8  ;;  %1783 = vmatpush.bf16.msra.mxu0 %v4063_v8  ;;  %v3934_v58 = vld [vmem:[%s4409_s12 + $0x94] sm:$0xf]  ;;  %v3092_v62 = vor.u32 %v3938_v57, %v3091_v56  ;;  %v4079_v0 = vld [vmem:[%s5240_s1 + $0x98] sm:$0xff]  ;;  %v3417_v6 = vld [vmem:[%s4409_s12 + $0x33c] sm:$0xf0] }
  0x1e   : > { %4247 = vmatpush.bf16.msra.mxu3 %v4071_v9  ;;  %1872 = vmatpush.bf16.msra.mxu1 %v4071_v9  ;;  %v3096_v63 = vor.u32 %v3934_v58, %v3093_v59  ;;  %v4087_v1 = vld [vmem:[%s5240_s1 + $0xd8] sm:$0xff]  ;;  %v4086_v16 = vld [vmem:[%s5240_s1 + $0xd0] sm:$0xff]  ;;  %v3451_v18 = vld [vmem:[%s4409_s12 + $0x360] sm:$0xf] }
  0x1f   : > { %v4095_v2 = vld [vmem:[%s5240_s1 + $0x118] sm:$0xff]  ;;  %v4094_v17 = vld [vmem:[%s5240_s1 + $0x110] sm:$0xff]  ;;  %v4028_v19 = vld [vmem:[%s4409_s12 + $0x380] sm:$0xf0] }
  0x20   : > { %v3415_v3 = vld [vmem:[%s4409_s12 + $0x318] sm:$0xf]  ;;  %v4019_v4 = vld [vmem:[%s4409_s12 + $0x338] sm:$0xf0]  ;;  %v3453_v21 = vld [vmem:[%s4409_s12 + $0x384] sm:$0xf0] }
  0x21   : > { %4240 = vmatpush.bf16.msra.mxu2 %v4062_v10  ;;  %1784 = vmatpush.bf16.msra.mxu0 %v4062_v10  ;;  %v4015_v5 = vld [vmem:[%s4409_s12 + $0x31c] sm:$0xf]  ;;  %v3127_v7 = vld [vmem:[%s4409_s12 + $0xd8] sm:$0xf]  ;;  %v3129_v10 = vld [vmem:[%s4409_s12 + $0xfc] sm:$0xf0] }
  0x22   : > { %4248 = vmatpush.bf16.msra.mxu3 %v4070_v11  ;;  %1873 = vmatpush.bf16.msra.mxu1 %v4070_v11  ;;  %v3947_v8 = vld [vmem:[%s4409_s12 + $0xf8] sm:$0xf0]  ;;  %v3416_v11 = vor.u32 %v4019_v4, %v3415_v3  ;;  %v3163_v22 = vld [vmem:[%s4409_s12 + $0x120] sm:$0xf]  ;;  %v3952_v24 = vld [vmem:[%s4409_s12 + $0x124] sm:$0xf] }
  0x23   : > { %v3943_v9 = vld [vmem:[%s4409_s12 + $0xdc] sm:$0xf]  ;;  %v3165_v25 = vld [vmem:[%s4409_s12 + $0x144] sm:$0xf0]  ;;  %v3489_v37 = vld [vmem:[%s4409_s12 + $0x3cc] sm:$0xf0] }
  0x24   : > { %v3199_v38 = vld [vmem:[%s4409_s12 + $0x168] sm:$0xf]  ;;  %v3965_v39 = vld [vmem:[%s4409_s12 + $0x188] sm:$0xf0]  ;;  %v3201_v41 = vld [vmem:[%s4409_s12 + $0x18c] sm:$0xf0] }
  0x25   : > { %4241 = vmatpush.bf16.msra.mxu2 %v4061_v12  ;;  %1785 = vmatpush.bf16.msra.mxu0 %v4061_v12  ;;  %v3420_v12 = vor.u32 %v4015_v5, %v3417_v6  ;;  %v3961_v40 = vld [vmem:[%s4409_s12 + $0x16c] sm:$0xf]  ;;  %v3200_v44 = vor.u32 %v3965_v39, %v3199_v38  ;;  %v3523_v52 = vld [vmem:[%s4409_s12 + $0x3f0] sm:$0xf]  ;;  %v4046_v53 = vld [vmem:[%s4409_s12 + $0x410] sm:$0xf0] }
  0x26   : > { %4249 = vmatpush.bf16.msra.mxu3 %v4069_v13  ;;  %1874 = vmatpush.bf16.msra.mxu1 %v4069_v13  ;;  %v3128_v13 = vor.u32 %v3947_v8, %v3127_v7  ;;  %v4042_v54 = vld [vmem:[%s4409_s12 + $0x3f4] sm:$0xf]  ;;  %v3525_v55 = vld [vmem:[%s4409_s12 + $0x414] sm:$0xf0]  ;;  %v3235_v57 = vld [vmem:[%s4409_s12 + $0x1b0] sm:$0xf] }
  0x27   : > { %v4103_v56 = vld [vmem:[%s5240_s1 + $0x158] sm:$0xff]  ;;  %v3974_v58 = vld [vmem:[%s4409_s12 + $0x1d0] sm:$0xf0]  ;;  %v4101_v4 = vld [vmem:[%s5240_s1 + $0x148] sm:$0xff] }
  0x28   : > { %v3970_v59 = vld [vmem:[%s4409_s12 + $0x1b4] sm:$0xf]  ;;  %v4123_v3 = vld [vmem:[%s5240_s1 + $0x1f8] sm:$0xff]  ;;  %v4100_v5 = vld [vmem:[%s5240_s1 + $0x140] sm:$0xff] }
  0x29   : > { %4242 = vmatpush.bf16.msra.mxu2 %v4060_v14  ;;  %1786 = vmatpush.bf16.msra.mxu0 %v4060_v14  ;;  %v3132_v14 = vor.u32 %v3943_v9, %v3129_v10  ;;  %v3559_v6 = vld [vmem:[%s4409_s12 + $0x438] sm:$0xf]  ;;  %v4055_v7 = vld [vmem:[%s4409_s12 + $0x458] sm:$0xf0]  ;;  %v3561_v9 = vld [vmem:[%s4409_s12 + $0x45c] sm:$0xf0] }
  0x2a   : > { %4250 = vmatpush.bf16.msra.mxu3 %v4068_v15  ;;  %1875 = vmatpush.bf16.msra.mxu1 %v4068_v15  ;;  %v4078_v15 = vld [vmem:[%s5240_s1 + $0x90] sm:$0xff]  ;;  %v4051_v8 = vld [vmem:[%s4409_s12 + $0x43c] sm:$0xf] }
  0x2b   : > { %v4131_v10 = vld [vmem:[%s5240_s1 + $0x238] sm:$0xff] }
  0x2c   : > { %1827 = vmatmul.bf16.vlgmr.msra.gmra.mxu2 %v3308_v26  ;;  %1787 = vmatmul.bf16.vlgmr.msra.gmra.mxu0 %v3020_v28  ;;  %v3452_v26 = vor.u32 %v4028_v19, %v3451_v18  ;;  %v3027_v19 = vld [vmem:[%s4409_s12 + $0x8] sm:$0xf] }
  0x2d   : > { %1957 = vmatpush.bf16.msrb.mxu2 %v4083_v20  ;;  %1916 = vmatmul.bf16.vlgmr.msra.gmra.mxu3 %v3312_v27  ;;  %v4024_v20 = vld [vmem:[%s4409_s12 + $0x364] sm:$0xf] }
  0x2e   : > { %2046 = vmatpush.bf16.msrb.mxu3 %v4091_v23  ;;  %1876 = vmatmul.bf16.vlgmr.msra.gmra.mxu1 %v3024_v29  ;;  %v3956_v23 = vld [vmem:[%s4409_s12 + $0x140] sm:$0xf0]  ;;  %v3456_v27 = vor.u32 %v4024_v20, %v3453_v21  ;;  %v3168_v29 = vor.u32 %v3952_v24, %v3165_v25  ;;  %v3921_v20 = vld [vmem:[%s4409_s12 + $0x28] sm:$0xf0]  ;;  %v3922_v24 = vld [vmem:[%s4409_s12 + $0x30] sm:$0xf0] }
  0x2f   : > { %2135 = vmatpush.bf16.msrb.mxu0 %v4099_v30  ;;  %v3164_v28 = vor.u32 %v3956_v23, %v3163_v22  ;;  %v4077_v30 = vld [vmem:[%s5240_s1 + $0x88] sm:$0xff]  ;;  %v3029_v22 = vld [vmem:[%s4409_s12 + $0x2c] sm:$0xf0]  ;;  %v3918_v25 = vld [vmem:[%s4409_s12 + $0x14] sm:$0xf] }
  0x30   : > { %v3917_v21 = vld [vmem:[%s4409_s12 + $0xc] sm:$0xf]  ;;  %v3035_v23 = vld [vmem:[%s4409_s12 + $0x10] sm:$0xf] }
  0x31   : > { %1958 = vmatpush.bf16.msrb.mxu2 %v4082_v31  ;;  %v4085_v31 = vld [vmem:[%s5240_s1 + $0xc8] sm:$0xff] }
  0x32   : > { %2047 = vmatpush.bf16.msrb.mxu3 %v4090_v32  ;;  %v4093_v32 = vld [vmem:[%s5240_s1 + $0x108] sm:$0xff] }
  0x33   : > { %2136 = vmatpush.bf16.msrb.mxu0 %v4098_v33  ;;  %v4107_v33 = vld [vmem:[%s5240_s1 + $0x178] sm:$0xff] }
  0x34   : > { %2224 = vmatpush.bf16.msrb.mxu1 %v4107_v33 }
  0x35   : > { %1959 = vmatpush.bf16.msrb.mxu2 %v4081_v34  ;;  %v3487_v34 = vld [vmem:[%s4409_s12 + $0x3a8] sm:$0xf] }
  0x36   : > { %2048 = vmatpush.bf16.msrb.mxu3 %v4089_v35  ;;  %v4037_v35 = vld [vmem:[%s4409_s12 + $0x3c8] sm:$0xf0] }
  0x37   : > { %2137 = vmatpush.bf16.msrb.mxu0 %v4097_v36  ;;  %v4033_v36 = vld [vmem:[%s4409_s12 + $0x3ac] sm:$0xf]  ;;  %v3488_v42 = vor.u32 %v4037_v35, %v3487_v34  ;;  %v4114_v35 = vld [vmem:[%s5240_s1 + $0x1b0] sm:$0xff] }
  0x38   : > { %v3492_v43 = vor.u32 %v4033_v36, %v3489_v37  ;;  %v4122_v37 = vld [vmem:[%s5240_s1 + $0x1f0] sm:$0xff] }
  0x39   : > { %1960 = vmatpush.bf16.msrb.mxu2 %v4080_v49  ;;  %v4105_v49 = vld [vmem:[%s5240_s1 + $0x168] sm:$0xff] }
  0x3a   : > { %2049 = vmatpush.bf16.msrb.mxu3 %v4088_v50  ;;  %v4092_v50 = vld [vmem:[%s5240_s1 + $0x100] sm:$0xff] }
  0x3b   : > { %2138 = vmatpush.bf16.msrb.mxu0 %v4096_v51  ;;  %v4104_v51 = vld [vmem:[%s5240_s1 + $0x160] sm:$0xff] }
  0x3c   : > { %1832 = vmatmul.bf16.gmra.mxu2 %v3344_v45  ;;  %1792 = vmatmul.bf16.gmra.mxu0 %v3056_v47  ;;  %v3204_v45 = vor.u32 %v3961_v40, %v3201_v41  ;;  %v4076_v47 = vld [vmem:[%s5240_s1 + $0x80] sm:$0xff] }
  0x3d   : > { %1921 = vmatmul.bf16.gmra.mxu3 %v3348_v46  ;;  %1961 = vmatpush.bf16.msrb.mxu2 %v4079_v0  ;;  %v4106_v46 = vld [vmem:[%s5240_s1 + $0x170] sm:$0xff] }
  0x3e   : > { %1881 = vmatmul.bf16.gmra.mxu1 %v3060_v48  ;;  %2050 = vmatpush.bf16.msrb.mxu3 %v4087_v1  ;;  %v4084_v48 = vld [vmem:[%s5240_s1 + $0xc0] sm:$0xff]  ;;  %v4102_v1 = vld [vmem:[%s5240_s1 + $0x150] sm:$0xff] }
  0x3f   : > { %2139 = vmatpush.bf16.msrb.mxu0 %v4095_v2  ;;  %2225 = vmatpush.bf16.msrb.mxu1 %v4106_v46  ;;  %v4115_v2 = vld [vmem:[%s5240_s1 + $0x1b8] sm:$0xff]  ;;  %v3930_v46 = vld [vmem:[%s4409_s12 + $0x70] sm:$0xf0] }
  0x41   : > { %1962 = vmatpush.bf16.msrb.mxu2 %v4078_v15  ;;  %v3560_v15 = vor.u32 %v4055_v7, %v3559_v6 }
  0x42   : > { %2051 = vmatpush.bf16.msrb.mxu3 %v4086_v16  ;;  %v3564_v16 = vor.u32 %v4051_v8, %v3561_v9 }
  0x43   : > { %2140 = vmatpush.bf16.msrb.mxu0 %v4094_v17  ;;  %2226 = vmatpush.bf16.msrb.mxu1 %v4105_v49  ;;  %v3065_v49 = vld [vmem:[%s4409_s12 + $0x74] sm:$0xf0] }
  0x45   : > { %1963 = vmatpush.bf16.msrb.mxu2 %v4077_v30  ;;  %v3036_v30 = vor.u32 %v3922_v24, %v3035_v23 }
  0x46   : > { %2052 = vmatpush.bf16.msrb.mxu3 %v4085_v31 }
  0x47   : > { %2141 = vmatpush.bf16.msrb.mxu0 %v4093_v32  ;;  %2227 = vmatpush.bf16.msrb.mxu1 %v4104_v51  ;;  %v3071_v51 = vld [vmem:[%s4409_s12 + $0x58] sm:$0xf] }
  0x49   : > { %1964 = vmatpush.bf16.msrb.mxu2 %v4076_v47 }
  0x4a   : > { %2053 = vmatpush.bf16.msrb.mxu3 %v4084_v48  ;;  %v3926_v48 = vld [vmem:[%s4409_s12 + $0x54] sm:$0xf] }
  0x4b   : > { %2142 = vmatpush.bf16.msrb.mxu0 %v4092_v50  ;;  %2228 = vmatpush.bf16.msrb.mxu1 %v4103_v56  ;;  %v4130_v50 = vld [vmem:[%s5240_s1 + $0x230] sm:$0xff]  ;;  %v3073_v56 = vld [vmem:[%s4409_s12 + $0x7c] sm:$0xf0] }
  0x4c   : > { %1837 = vmatmul.bf16.gmra.mxu2 %v3380_v60  ;;  %1797 = vmatmul.bf16.gmra.mxu0 %v3092_v62  ;;  %v3237_v60 = vld [vmem:[%s4409_s12 + $0x1d4] sm:$0xf0]  ;;  %v3528_v62 = vor.u32 %v4042_v54, %v3525_v55  ;;  %v3927_v55 = vld [vmem:[%s4409_s12 + $0x5c] sm:$0xf] }
  0x4d   : > { %1926 = vmatmul.bf16.gmra.mxu3 %v3384_v61  ;;  %v3524_v61 = vor.u32 %v4046_v53, %v3523_v52  ;;  %v3240_v0 = vor.u32 %v3970_v59, %v3237_v60  ;;  %2313 = vmatpush.bf16.msra.mxu2 %v4115_v2  ;;  %v3931_v52 = vld [vmem:[%s4409_s12 + $0x78] sm:$0xf0]  ;;  %v3068_v59 = vor.u32 %v3926_v48, %v3065_v49  ;;  %v3137_v48 = vld [vmem:[%s4409_s12 + $0x104] sm:$0xf0] }
  0x4e   : > { %1886 = vmatmul.bf16.gmra.mxu1 %v3096_v63  ;;  %v3236_v63 = vor.u32 %v3974_v58, %v3235_v57  ;;  %2402 = vmatpush.bf16.msra.mxu3 %v4123_v3  ;;  %v3072_v60 = vor.u32 %v3931_v52, %v3071_v51  ;;  %v4129_v49 = vld [vmem:[%s5240_s1 + $0x228] sm:$0xff] }
  0x4f   : > { %2229 = vmatpush.bf16.msrb.mxu1 %v4102_v1  ;;  %2491 = vmatpush.bf16.msra.mxu0 %v4131_v10  ;;  %v3099_v10 = vld [vmem:[%s4409_s12 + $0x98] sm:$0xf]  ;;  %v3949_v51 = vld [vmem:[%s4409_s12 + $0x108] sm:$0xf0] }
  0x51   : > { %2314 = vmatpush.bf16.msra.mxu2 %v4114_v35 }
  0x52   : > { %2403 = vmatpush.bf16.msra.mxu3 %v4122_v37 }
  0x53   : > { %2230 = vmatpush.bf16.msrb.mxu1 %v4101_v4  ;;  %2492 = vmatpush.bf16.msra.mxu0 %v4130_v50  ;;  %v3143_v50 = vld [vmem:[%s4409_s12 + $0xe8] sm:$0xf] }
  0x57   : > { %2231 = vmatpush.bf16.msrb.mxu1 %v4100_v5  ;;  %2493 = vmatpush.bf16.msra.mxu0 %v4129_v49 }
  0x5c   : > { %1842 = vmatmul.bf16.gmra.mxu2 %v3416_v11  ;;  %1802 = vmatmul.bf16.gmra.mxu0 %v3128_v13  ;;  %v3271_v11 = vld [vmem:[%s4409_s12 + $0x1f8] sm:$0xf]  ;;  %v3979_v13 = vld [vmem:[%s4409_s12 + $0x1fc] sm:$0xf] }
  0x5d   : > { %1931 = vmatmul.bf16.gmra.mxu3 %v3420_v12  ;;  %v3983_v12 = vld [vmem:[%s4409_s12 + $0x218] sm:$0xf0] }
  0x5e   : > { %1891 = vmatmul.bf16.gmra.mxu1 %v3132_v14  ;;  %v3273_v14 = vld [vmem:[%s4409_s12 + $0x21c] sm:$0xf0]  ;;  %v3272_v17 = vor.u32 %v3983_v12, %v3271_v11  ;;  %v3939_v12 = vld [vmem:[%s4409_s12 + $0xb8] sm:$0xf0] }
  0x5f   : > { %v3276_v18 = vor.u32 %v3979_v13, %v3273_v14  ;;  %v3935_v13 = vld [vmem:[%s4409_s12 + $0x9c] sm:$0xf]  ;;  %v3101_v14 = vld [vmem:[%s4409_s12 + $0xbc] sm:$0xf0] }
  0x60   : > { %v3104_v23 = vor.u32 %v3935_v13, %v3101_v14  ;;  %v3171_v13 = vld [vmem:[%s4409_s12 + $0x128] sm:$0xf] }
  0x6c   : > { %1847 = vmatmul.bf16.gmra.mxu2 %v3452_v26  ;;  %1807 = vmatmul.bf16.gmra.mxu0 %v3164_v28  ;;  %v3037_v26 = vld [vmem:[%s4409_s12 + $0x34] sm:$0xf0]  ;;  %v3032_v28 = vor.u32 %v3917_v21, %v3029_v22  ;;  %v3100_v22 = vor.u32 %v3939_v12, %v3099_v10 }
  0x6d   : > { %1936 = vmatmul.bf16.gmra.mxu3 %v3456_v27  ;;  %v3028_v27 = vor.u32 %v3921_v20, %v3027_v19  ;;  %v3040_v32 = vor.u32 %v3918_v25, %v3037_v26  ;;  %v3936_v19 = vld [vmem:[%s4409_s12 + $0xa4] sm:$0xf]  ;;  %v3109_v20 = vld [vmem:[%s4409_s12 + $0xc4] sm:$0xf0] }
  0x6e   : > { %1896 = vmatmul.bf16.gmra.mxu1 %v3168_v29  ;;  %v4597_v29 = vld [vmem:[%s5241_s2] ss:$0 sm:$0xff] }
  0x7c   : > { %1852 = vmatmul.bf16.gmra.mxu2 %v3488_v42  ;;  %1812 = vmatmul.bf16.gmra.mxu0 %v3200_v44 }
  0x7d   : > { %1941 = vmatmul.bf16.gmra.mxu3 %v3492_v43 }
  0x7e   : > { %1901 = vmatmul.bf16.gmra.mxu1 %v3204_v45  ;;  %v3063_v45 = vld [vmem:[%s4409_s12 + $0x50] sm:$0xf] }
  0x7f   : > { %v3064_v58 = vor.u32 %v3930_v46, %v3063_v45  ;;  %v3944_v46 = vld [vmem:[%s4409_s12 + $0xe4] sm:$0xf] }
  0x8c   : > { %1857 = vmatmul.bf16.gmra.mxu2 %v3524_v61  ;;  %1817 = vmatmul.bf16.gmra.mxu0 %v3236_v63  ;;  %v3076_v63 = vor.u32 %v3927_v55, %v3073_v56  ;;  %v3145_v55 = vld [vmem:[%s4409_s12 + $0x10c] sm:$0xf0] }
  0x8d   : > { %1946 = vmatmul.bf16.gmra.mxu3 %v3528_v62 }
  0x8e   : > { %1906 = vmatmul.bf16.gmra.mxu1 %v3240_v0 }
  0x9c   : > { %1862 = vmatmul.bf16.gmra.mxu2 %v3560_v15  ;;  %1822 = vmatmul.bf16.gmra.mxu0 %v3272_v17  ;;  %v3107_v15 = vld [vmem:[%s4409_s12 + $0xa0] sm:$0xf] }
  0x9d   : > { %1951 = vmatmul.bf16.gmra.mxu3 %v3564_v16  ;;  %v3940_v16 = vld [vmem:[%s4409_s12 + $0xc0] sm:$0xf0] }
  0x9e   : > { %1911 = vmatmul.bf16.gmra.mxu1 %v3276_v18  ;;  %v3108_v24 = vor.u32 %v3940_v16, %v3107_v15  ;;  %v3957_v15 = vld [vmem:[%s4409_s12 + $0x148] sm:$0xf0] }
  0x9f   : > { %v3953_v16 = vld [vmem:[%s4409_s12 + $0x12c] sm:$0xf] }
  0xa9   : > { %v1788_v31 = vpop.f32.mrf.mxu0 }
  0xaa   : > { %v1789_v33 = vadd.f32 %v4597_v29, %v1788_v31  ;;  %v4113_v31 = vld [vmem:[%s5240_s1 + $0x1a8] sm:$0xff] }
  0xab   : > { %v1877_v34 = vpop.f32.mrf.mxu1  ;;  %2315 = vmatpush.bf16.msra.mxu2 %v4113_v31 }
  0xac   : > { %1965 = vmatmul.bf16.vlgmr.msrb.gmra.mxu2 %v3028_v27  ;;  %v4603_v36 = vadd.f32 %v1877_v34, %v1789_v33  ;;  %2143 = vmatmul.bf16.vlgmr.msrb.gmra.mxu0 %v3036_v30  ;;  %v3112_v27 = vor.u32 %v3936_v19, %v3109_v20  ;;  %v4121_v33 = vld [vmem:[%s5240_s1 + $0x1e8] sm:$0xff]  ;;  %v3958_v19 = vld [vmem:[%s4409_s12 + $0x150] sm:$0xf0] }
  0xad   : > { %2054 = vmatmul.bf16.vlgmr.msrb.gmra.mxu3 %v3032_v28 }
  0xae   : > { %2232 = vmatmul.bf16.vlgmr.msrb.gmra.mxu1 %v3040_v32  ;;  %2404 = vmatpush.bf16.msra.mxu3 %v4121_v33 }
  0xaf   : > { %v1828_v38 = vpop.f32.mrf.mxu2 }
  0xb0   : > { %v1917_v39 = vpop.f32.mrf.mxu3  ;;  %v1829_v40 = vadd.f32 %v4597_v29, %v1828_v38 }
  0xb1   : > { %v1790_v42 = vpop.f32.mrf.mxu0 }
  0xb2   : > { %v4609_v41 = vadd.f32 %v1917_v39, %v1829_v40  ;;  %v1791_v43 = vadd.f32 %v4597_v29, %v1790_v42 }
  0xb3   : > { %v1879_v44 = vpop.f32.mrf.mxu1 }
  0xb4   : > { %v4614_v47 = vadd.f32 %v1879_v44, %v1791_v43  ;;  %v3135_v43 = vld [vmem:[%s4409_s12 + $0xe0] sm:$0xf]  ;;  %v3948_v44 = vld [vmem:[%s4409_s12 + $0x100] sm:$0xf0] }
  0xb7   : > { %v1830_v53 = vpop.f32.mrf.mxu2 }
  0xb8   : > { %v1919_v54 = vpop.f32.mrf.mxu3  ;;  %v1831_v57 = vadd.f32 %v4597_v29, %v1830_v53 }
  0xb9   : > { %v1793_v62 = vpop.f32.mrf.mxu0 }
  0xba   : > { %v4626_v61 = vadd.f32 %v1919_v54, %v1831_v57  ;;  %v1794_v0 = vadd.f32 %v4597_v29, %v1793_v62  ;;  %v3945_v54 = vld [vmem:[%s4409_s12 + $0xec] sm:$0xf]  ;;  %v3136_v57 = vor.u32 %v3948_v44, %v3135_v43 }
  0xbb   : > { %v1882_v1 = vpop.f32.mrf.mxu1 }
  0xbc   : > { %1970 = vmatmul.bf16.gmra.mxu2 %v3064_v58  ;;  %v4629_v2 = vadd.f32 %v1882_v1, %v1794_v0  ;;  %2148 = vmatmul.bf16.gmra.mxu0 %v3072_v60  ;;  %v3140_v58 = vor.u32 %v3944_v46, %v3137_v48 }
  0xbd   : > { %2059 = vmatmul.bf16.gmra.mxu3 %v3068_v59  ;;  %v3144_v59 = vor.u32 %v3949_v51, %v3143_v50  ;;  %v3207_v51 = vld [vmem:[%s4409_s12 + $0x170] sm:$0xf] }
  0xbe   : > { %2237 = vmatmul.bf16.gmra.mxu1 %v3076_v63  ;;  %v3148_v63 = vor.u32 %v3945_v54, %v3145_v55  ;;  %v3962_v54 = vld [vmem:[%s4409_s12 + $0x174] sm:$0xf]  ;;  %v3209_v55 = vld [vmem:[%s4409_s12 + $0x194] sm:$0xf0] }
  0xbf   : > { %v1833_v3 = vpop.f32.mrf.mxu2 }
  0xc0   : > { %v1922_v4 = vpop.f32.mrf.mxu3  ;;  %v1834_v5 = vadd.f32 %v4597_v29, %v1833_v3 }
  0xc1   : > { %v1795_v7 = vpop.f32.mrf.mxu0 }
  0xc2   : > { %v4632_v6 = vadd.f32 %v1922_v4, %v1834_v5  ;;  %v1796_v8 = vadd.f32 %v4597_v29, %v1795_v7 }
  0xc3   : > { %v1884_v9 = vpop.f32.mrf.mxu1 }
  0xc4   : > { %v4636_v11 = vadd.f32 %v1884_v9, %v1796_v8 }
  0xc7   : > { %v1835_v17 = vpop.f32.mrf.mxu2 }
  0xc8   : > { %v1924_v18 = vpop.f32.mrf.mxu3  ;;  %v1836_v21 = vadd.f32 %v4597_v29, %v1835_v17  ;;  %v3173_v17 = vld [vmem:[%s4409_s12 + $0x14c] sm:$0xf0] }
  0xc9   : > { %v1798_v26 = vpop.f32.mrf.mxu0 }
  0xca   : > { %v4646_v25 = vadd.f32 %v1924_v18, %v1836_v21  ;;  %v1799_v28 = vadd.f32 %v4597_v29, %v1798_v26  ;;  %v3179_v18 = vld [vmem:[%s4409_s12 + $0x130] sm:$0xf]  ;;  %v3172_v26 = vor.u32 %v3957_v15, %v3171_v13 }
  0xcb   : > { %v1887_v30 = vpop.f32.mrf.mxu1 }
  0xcc   : > { %1975 = vmatmul.bf16.gmra.mxu2 %v3100_v22  ;;  %v4652_v32 = vadd.f32 %v1887_v30, %v1799_v28  ;;  %2153 = vmatmul.bf16.gmra.mxu0 %v3108_v24  ;;  %v3954_v22 = vld [vmem:[%s4409_s12 + $0x134] sm:$0xf]  ;;  %v3180_v28 = vor.u32 %v3958_v19, %v3179_v18 }
  0xcd   : > { %2064 = vmatmul.bf16.gmra.mxu3 %v3104_v23  ;;  %v3181_v23 = vld [vmem:[%s4409_s12 + $0x154] sm:$0xf0] }
  0xce   : > { %2242 = vmatmul.bf16.gmra.mxu1 %v3112_v27  ;;  %v3176_v27 = vor.u32 %v3953_v16, %v3173_v17  ;;  %v3184_v33 = vor.u32 %v3954_v22, %v3181_v23 }
  0xcf   : > { %v1838_v34 = vpop.f32.mrf.mxu2 }
  0xd0   : > { %v1927_v35 = vpop.f32.mrf.mxu3  ;;  %v1839_v37 = vadd.f32 %v4597_v29, %v1838_v34 }
  0xd1   : > { %v1800_v39 = vpop.f32.mrf.mxu0 }
  0xd2   : > { %v4658_v38 = vadd.f32 %v1927_v35, %v1839_v37  ;;  %v1801_v40 = vadd.f32 %v4597_v29, %v1800_v39  ;;  %v4112_v37 = vld [vmem:[%s5240_s1 + $0x1a0] sm:$0xff] }
  0xd3   : > { %v1889_v42 = vpop.f32.mrf.mxu1  ;;  %2316 = vmatpush.bf16.msra.mxu2 %v4112_v37 }
  0xd4   : > { %v4663_v45 = vadd.f32 %v1889_v42, %v1801_v40  ;;  %v4120_v40 = vld [vmem:[%s5240_s1 + $0x1e0] sm:$0xff] }
  0xd5   : > { %2405 = vmatpush.bf16.msra.mxu3 %v4120_v40  ;;  %v3972_v40 = vld [vmem:[%s4409_s12 + $0x1c4] sm:$0xf] }
  0xd7   : > { %v1840_v52 = vpop.f32.mrf.mxu2 }
  0xd8   : > { %v1929_v53 = vpop.f32.mrf.mxu3  ;;  %v1841_v56 = vadd.f32 %v4597_v29, %v1840_v52  ;;  %v3966_v52 = vld [vmem:[%s4409_s12 + $0x190] sm:$0xf0] }
  0xd9   : > { %v1803_v62 = vpop.f32.mrf.mxu0 }
  0xda   : > { %v4675_v60 = vadd.f32 %v1929_v53, %v1841_v56  ;;  %v1804_v0 = vadd.f32 %v4597_v29, %v1803_v62  ;;  %v4128_v56 = vld [vmem:[%s5240_s1 + $0x220] sm:$0xff] }
  0xdb   : > { %v1892_v1 = vpop.f32.mrf.mxu1  ;;  %2494 = vmatpush.bf16.msra.mxu0 %v4128_v56  ;;  %v4111_v56 = vld [vmem:[%s5240_s1 + $0x198] sm:$0xff] }
  0xdc   : > { %1980 = vmatmul.bf16.gmra.mxu2 %v3136_v57  ;;  %v4678_v3 = vadd.f32 %v1892_v1, %v1804_v0  ;;  %2158 = vmatmul.bf16.gmra.mxu0 %v3144_v59  ;;  %v3215_v57 = vld [vmem:[%s4409_s12 + $0x178] sm:$0xf]  ;;  %v3217_v0 = vld [vmem:[%s4409_s12 + $0x19c] sm:$0xf0] }
  0xdd   : > { %2069 = vmatmul.bf16.gmra.mxu3 %v3140_v58  ;;  %v3967_v58 = vld [vmem:[%s4409_s12 + $0x198] sm:$0xf0]  ;;  %2317 = vmatpush.bf16.msra.mxu2 %v4111_v56 }
  0xde   : > { %2247 = vmatmul.bf16.gmra.mxu1 %v3148_v63  ;;  %v3963_v63 = vld [vmem:[%s4409_s12 + $0x17c] sm:$0xf] }
  0xdf   : > { %v1843_v4 = vpop.f32.mrf.mxu2 }
  0xe0   : > { %v1932_v5 = vpop.f32.mrf.mxu3  ;;  %v1844_v7 = vadd.f32 %v4597_v29, %v1843_v4  ;;  %v3208_v4 = vor.u32 %v3966_v52, %v3207_v51 }
  0xe1   : > { %v1805_v9 = vpop.f32.mrf.mxu0 }
  0xe2   : > { %v4681_v8 = vadd.f32 %v1932_v5, %v1844_v7  ;;  %v1806_v10 = vadd.f32 %v4597_v29, %v1805_v9  ;;  %v3212_v5 = vor.u32 %v3962_v54, %v3209_v55  ;;  %v3216_v7 = vor.u32 %v3967_v58, %v3215_v57  ;;  %v4119_v58 = vld [vmem:[%s5240_s1 + $0x1d8] sm:$0xff] }
  0xe3   : > { %v1894_v12 = vpop.f32.mrf.mxu1  ;;  %2406 = vmatpush.bf16.msra.mxu3 %v4119_v58  ;;  %v3315_v58 = vld [vmem:[%s4409_s12 + $0x248] sm:$0xf] }
  0xe4   : > { %v4685_v14 = vadd.f32 %v1894_v12, %v1806_v10  ;;  %v3220_v12 = vor.u32 %v3963_v63, %v3217_v0 }
  0xe7   : > { %v1845_v20 = vpop.f32.mrf.mxu2 }
  0xe8   : > { %v1934_v21 = vpop.f32.mrf.mxu3  ;;  %v1846_v24 = vadd.f32 %v4597_v29, %v1845_v20 }
  0xe9   : > { %v1808_v31 = vpop.f32.mrf.mxu0 }
  0xea   : > { %v4695_v30 = vadd.f32 %v1934_v21, %v1846_v24  ;;  %v1809_v34 = vadd.f32 %v4597_v29, %v1808_v31  ;;  %v3243_v24 = vld [vmem:[%s4409_s12 + $0x1b8] sm:$0xf]  ;;  %v3245_v31 = vld [vmem:[%s4409_s12 + $0x1dc] sm:$0xf0] }
  0xeb   : > { %v1897_v35 = vpop.f32.mrf.mxu1 }
  0xec   : > { %1985 = vmatmul.bf16.gmra.mxu2 %v3172_v26  ;;  %v4701_v39 = vadd.f32 %v1897_v35, %v1809_v34  ;;  %2163 = vmatmul.bf16.gmra.mxu0 %v3180_v28  ;;  %v3971_v28 = vld [vmem:[%s4409_s12 + $0x1bc] sm:$0xf]  ;;  %v3976_v34 = vld [vmem:[%s4409_s12 + $0x1e0] sm:$0xf0] }
  0xed   : > { %2074 = vmatmul.bf16.gmra.mxu3 %v3176_v27  ;;  %v3975_v27 = vld [vmem:[%s4409_s12 + $0x1d8] sm:$0xf0] }
  0xee   : > { %2252 = vmatmul.bf16.gmra.mxu1 %v3184_v33  ;;  %v3251_v33 = vld [vmem:[%s4409_s12 + $0x1c0] sm:$0xf] }
  0xef   : > { %v1848_v42 = vpop.f32.mrf.mxu2 }
  0xf0   : > { %v1937_v43 = vpop.f32.mrf.mxu3  ;;  %v1849_v44 = vadd.f32 %v4597_v29, %v1848_v42  ;;  %v3253_v42 = vld [vmem:[%s4409_s12 + $0x1e4] sm:$0xf0] }
  0xf1   : > { %v1810_v48 = vpop.f32.mrf.mxu0  ;;  %v3256_v52 = vor.u32 %v3972_v40, %v3253_v42 }
  0xf2   : > { %v4707_v46 = vadd.f32 %v1937_v43, %v1849_v44  ;;  %v1811_v49 = vadd.f32 %v4597_v29, %v1810_v48  ;;  %v3244_v44 = vor.u32 %v3975_v27, %v3243_v24  ;;  %v3248_v48 = vor.u32 %v3971_v28, %v3245_v31  ;;  %v3289_v24 = vld [vmem:[%s4409_s12 + $0x22c] sm:$0xf0] }
  0xf3   : > { %v1899_v50 = vpop.f32.mrf.mxu1 }
  0xf4   : > { %v4712_v53 = vadd.f32 %v1899_v50, %v1811_v49  ;;  %v3252_v49 = vor.u32 %v3976_v34, %v3251_v33 }
  0xf7   : > { %v1850_v59 = vpop.f32.mrf.mxu2 }
  0xf8   : > { %v1939_v62 = vpop.f32.mrf.mxu3  ;;  %v1851_v1 = vadd.f32 %v4597_v29, %v1850_v59 }
  0xf9   : > { %v1813_v10 = vpop.f32.mrf.mxu0 }
  0xfa   : > { %v4724_v9 = vadd.f32 %v1939_v62, %v1851_v1  ;;  %v1814_v13 = vadd.f32 %v4597_v29, %v1813_v10 }
  0xfb   : > { %v1902_v15 = vpop.f32.mrf.mxu1 }
  0xfc   : > { %1990 = vmatmul.bf16.gmra.mxu2 %v3208_v4  ;;  %v4727_v16 = vadd.f32 %v1902_v15, %v1814_v13  ;;  %2168 = vmatmul.bf16.gmra.mxu0 %v3216_v7  ;;  %v3279_v7 = vld [vmem:[%s4409_s12 + $0x200] sm:$0xf]  ;;  %v3980_v13 = vld [vmem:[%s4409_s12 + $0x204] sm:$0xf]  ;;  %v3281_v15 = vld [vmem:[%s4409_s12 + $0x224] sm:$0xf0] }
  0xfd   : > { %2079 = vmatmul.bf16.gmra.mxu3 %v3212_v5  ;;  %v3284_v31 = vor.u32 %v3980_v13, %v3281_v15  ;;  %v3990_v13 = vld [vmem:[%s4409_s12 + $0x254] sm:$0xf]  ;;  %v3325_v15 = vld [vmem:[%s4409_s12 + $0x274] sm:$0xf0] }
  0xfe   : > { %2257 = vmatmul.bf16.gmra.mxu1 %v3220_v12  ;;  %v3984_v12 = vld [vmem:[%s4409_s12 + $0x220] sm:$0xf0] }
  0xff   : > { %v1853_v17 = vpop.f32.mrf.mxu2  ;;  %v3280_v28 = vor.u32 %v3984_v12, %v3279_v7 }
 0x100   : > { %v1942_v18 = vpop.f32.mrf.mxu3  ;;  %v1854_v19 = vadd.f32 %v4597_v29, %v1853_v17  ;;  %v3287_v17 = vld [vmem:[%s4409_s12 + $0x208] sm:$0xf] }
 0x101   : > { %v1815_v21 = vpop.f32.mrf.mxu0 }
 0x102   : > { %v4730_v20 = vadd.f32 %v1942_v18, %v1854_v19  ;;  %v1816_v22 = vadd.f32 %v4597_v29, %v1815_v21  ;;  %v3985_v18 = vld [vmem:[%s4409_s12 + $0x228] sm:$0xf0]  ;;  %v4127_v19 = vld [vmem:[%s5240_s1 + $0x218] sm:$0xff] }
 0x103   : > { %v1904_v23 = vpop.f32.mrf.mxu1  ;;  %2495 = vmatpush.bf16.msra.mxu0 %v4127_v19  ;;  %v3288_v33 = vor.u32 %v3985_v18, %v3287_v17 }
 0x104   : > { %v4734_v26 = vadd.f32 %v1904_v23, %v1816_v22  ;;  %v3981_v23 = vld [vmem:[%s4409_s12 + $0x20c] sm:$0xf] }
 0x107   : > { %v1855_v35 = vpop.f32.mrf.mxu2 }
 0x108   : > { %v1944_v37 = vpop.f32.mrf.mxu3  ;;  %v1856_v43 = vadd.f32 %v4597_v29, %v1855_v35 }
 0x109   : > { %v1818_v51 = vpop.f32.mrf.mxu0 }
 0x10a   : > { %v4744_v50 = vadd.f32 %v1944_v37, %v1856_v43  ;;  %v1819_v54 = vadd.f32 %v4597_v29, %v1818_v51  ;;  %v3292_v37 = vor.u32 %v3981_v23, %v3289_v24  ;;  %v3328_v24 = vor.u32 %v3990_v13, %v3325_v15 }
 0x10b   : > { %v1907_v55 = vpop.f32.mrf.mxu1 }
 0x10c   : > { %1995 = vmatmul.bf16.gmra.mxu2 %v3244_v44  ;;  %v4750_v57 = vadd.f32 %v1907_v55, %v1819_v54  ;;  %2173 = vmatmul.bf16.gmra.mxu0 %v3252_v49  ;;  %v4139_v54 = vld [vmem:[%s5242_s3 + $0x38] sm:$0xff] }
 0x10d   : > { %2084 = vmatmul.bf16.gmra.mxu3 %v3248_v48  ;;  %2696 = vmatpush.bf16.msra.mxu1 %v4139_v54  ;;  %v3353_v54 = vld [vmem:[%s4409_s12 + $0x2b4] sm:$0xf0] }
 0x10e   : > { %2262 = vmatmul.bf16.gmra.mxu1 %v3256_v52 }
 0x10f   : > { %v1858_v59 = vpop.f32.mrf.mxu2 }
 0x110   : > { %v1947_v62 = vpop.f32.mrf.mxu3  ;;  %v1859_v63 = vadd.f32 %v4597_v29, %v1858_v59 }
 0x111   : > { %v1820_v1 = vpop.f32.mrf.mxu0 }
 0x112   : > { %v4756_v0 = vadd.f32 %v1947_v62, %v1859_v63  ;;  %v1821_v4 = vadd.f32 %v4597_v29, %v1820_v1  ;;  %v3993_v62 = vld [vmem:[%s4409_s12 + $0x268] sm:$0xf0]  ;;  %v3317_v1 = vld [vmem:[%s4409_s12 + $0x26c] sm:$0xf0] }
 0x113   : > { %v1909_v5 = vpop.f32.mrf.mxu1  ;;  %v3989_v63 = vld [vmem:[%s4409_s12 + $0x24c] sm:$0xf]  ;;  %v3316_v18 = vor.u32 %v3993_v62, %v3315_v58  ;;  %v4003_v58 = vld [vmem:[%s4409_s12 + $0x2b8] sm:$0xf0]  ;;  %v4126_v62 = vld [vmem:[%s5240_s1 + $0x210] sm:$0xff] }
 0x114   : > { %v4760_v10 = vadd.f32 %v1909_v5, %v1821_v4  ;;  %v3323_v4 = vld [vmem:[%s4409_s12 + $0x250] sm:$0xf]  ;;  %v3994_v5 = vld [vmem:[%s4409_s12 + $0x270] sm:$0xf0]  ;;  %v3320_v19 = vor.u32 %v3989_v63, %v3317_v1  ;;  %v3999_v1 = vld [vmem:[%s4409_s12 + $0x29c] sm:$0xf]  ;;  %2496 = vmatpush.bf16.msra.mxu0 %v4126_v62 }
 0x117   : > { %v1860_v21 = vpop.f32.mrf.mxu2 }
 0x118   : > { %v1949_v22 = vpop.f32.mrf.mxu3  ;;  %v1861_v27 = vadd.f32 %v4597_v29, %v1860_v21  ;;  %v3324_v21 = vor.u32 %v3994_v5, %v3323_v4  ;;  %v3361_v4 = vld [vmem:[%s4409_s12 + $0x2bc] sm:$0xf0] }
 0x119   : > { %v1823_v35 = vpop.f32.mrf.mxu0 }
 0x11a   : > { %v4773_v34 = vadd.f32 %v1949_v22, %v1861_v27  ;;  %v1824_v40 = vadd.f32 %v4597_v29, %v1823_v35 }
 0x11b   : > { %v1912_v42 = vpop.f32.mrf.mxu1 }
 0x11c   : > { %2000 = vmatmul.bf16.gmra.mxu2 %v3280_v28  ;;  %v4776_v43 = vadd.f32 %v1912_v42, %v1824_v40  ;;  %2178 = vmatmul.bf16.gmra.mxu0 %v3288_v33  ;;  %v4110_v28 = vld [vmem:[%s5240_s1 + $0x190] sm:$0xff] }
 0x11d   : > { %2089 = vmatmul.bf16.gmra.mxu3 %v3284_v31  ;;  %2318 = vmatpush.bf16.msra.mxu2 %v4110_v28 }
 0x11e   : > { %2267 = vmatmul.bf16.gmra.mxu1 %v3292_v37 }
 0x11f   : > { %v1863_v44 = vpop.f32.mrf.mxu2 }
 0x120   : > { %v1952_v48 = vpop.f32.mrf.mxu3  ;;  %v1864_v49 = vadd.f32 %v4597_v29, %v1863_v44 }
 0x121   : > { %v1825_v52 = vpop.f32.mrf.mxu0 }
 0x122   : > { %v4779_v51 = vadd.f32 %v1952_v48, %v1864_v49  ;;  %v1826_v55 = vadd.f32 %v4597_v29, %v1825_v52  ;;  %v3351_v48 = vld [vmem:[%s4409_s12 + $0x290] sm:$0xf]  ;;  %v4002_v49 = vld [vmem:[%s4409_s12 + $0x2b0] sm:$0xf0] }
 0x123   : > { %v1914_v56 = vpop.f32.mrf.mxu1  ;;  %v3998_v52 = vld [vmem:[%s4409_s12 + $0x294] sm:$0xf] }
 0x124   : > { %v4786_v59 = vadd.f32 %v1914_v56, %v1826_v55  ;;  %v3359_v56 = vld [vmem:[%s4409_s12 + $0x298] sm:$0xf] }
 0x125   : > { %v3360_v13 = vor.u32 %v4003_v58, %v3359_v56  ;;  %v4008_v56 = vld [vmem:[%s4409_s12 + $0x2e4] sm:$0xf]  ;;  %v3397_v58 = vld [vmem:[%s4409_s12 + $0x304] sm:$0xf0] }
 0x127   : > { %v1865_v7 = vpop.f32.mrf.mxu2 }
 0x128   : > { %v1954_v12 = vpop.f32.mrf.mxu3  ;;  %v1866_v17 = vadd.f32 %v4597_v29, %v1865_v7  ;;  %v4118_v29 = vld [vmem:[%s5240_s1 + $0x1d0] sm:$0xff]  ;;  %v3352_v7 = vor.u32 %v4002_v49, %v3351_v48  ;;  %v3395_v49 = vld [vmem:[%s4409_s12 + $0x2e0] sm:$0xf] }
 0x129   : > { %v2144_v23 = vpop.f32.mrf.mxu0  ;;  %2407 = vmatpush.bf16.msra.mxu3 %v4118_v29 }
 0x12a   : > { %v4796_v22 = vadd.f32 %v1954_v12, %v1866_v17  ;;  %v3356_v12 = vor.u32 %v3998_v52, %v3353_v54  ;;  %v4012_v52 = vld [vmem:[%s4409_s12 + $0x300] sm:$0xf0] }
 0x12b   : > { %v2233_v27 = vpop.f32.mrf.mxu1 }
 0x12c   : > { %2005 = vmatmul.bf16.gmra.mxu2 %v3316_v18  ;;  %2183 = vmatmul.bf16.gmra.mxu0 %v3324_v21  ;;  %v3364_v18 = vor.u32 %v3999_v1, %v3361_v4  ;;  %v3396_v1 = vor.u32 %v4012_v52, %v3395_v49  ;;  %v4017_v52 = vld [vmem:[%s4409_s12 + $0x32c] sm:$0xf] }
 0x12d   : > { %2094 = vmatmul.bf16.gmra.mxu3 %v3320_v19 }
 0x12e   : > { %2272 = vmatmul.bf16.gmra.mxu1 %v3328_v24 }
 0x12f   : > { %v1966_v31 = vpop.f32.mrf.mxu2 }
 0x130   : > { %v2055_v33 = vpop.f32.mrf.mxu3  ;;  %v1967_v35 = vadd.f32 %v1966_v31, %v4603_v36  ;;  %v4138_v31 = vld [vmem:[%s5242_s3 + $0x30] sm:$0xff] }
 0x131   : > { %v2146_v40 = vpop.f32.mrf.mxu0  ;;  %2697 = vmatpush.bf16.msra.mxu1 %v4138_v31  ;;  %v4020_v31 = vld [vmem:[%s4409_s12 + $0x340] sm:$0xf0] }
 0x132   : > { %v2056_v37 = vadd.f32 %v2055_v33, %v1967_v35 }
 0x133   : > { %v2235_v42 = vpop.f32.mrf.mxu1 }
 0x134   : > { %v2145_v44 = vadd.f32 %v2144_v23, %v2056_v37  ;;  %v3387_v37 = vld [vmem:[%s4409_s12 + $0x2d8] sm:$0xf] }
 0x136   : > { %v4809_v55 = vadd.f32 %v2233_v27, %v2145_v44  ;;  %v3389_v44 = vld [vmem:[%s4409_s12 + $0x2fc] sm:$0xf0] }
 0x137   : > { %v1968_v36 = vpop.f32.mrf.mxu2 }
 0x138   : > { %v2057_v63 = vpop.f32.mrf.mxu3  ;;  %v1969_v5 = vadd.f32 %v1968_v36, %v4614_v47 }
 0x139   : > { %v2149_v17 = vpop.f32.mrf.mxu0 }
 0x13a   : > { %v2058_v15 = vadd.f32 %v2057_v63, %v1969_v5 }
 0x13b   : > { %v2238_v19 = vpop.f32.mrf.mxu1 }
 0x13c   : > { %2010 = vmatmul.bf16.gmra.mxu2 %v3352_v7  ;;  %v2147_v21 = vadd.f32 %v2146_v40, %v2058_v15  ;;  %2188 = vmatmul.bf16.gmra.mxu0 %v3360_v13  ;;  %v4011_v40 = vld [vmem:[%s4409_s12 + $0x2f8] sm:$0xf0]  ;;  %v3400_v7 = vor.u32 %v4008_v56, %v3397_v58  ;;  %v4109_v15 = vld [vmem:[%s5240_s1 + $0x188] sm:$0xff] }
 0x13d   : > { %2099 = vmatmul.bf16.gmra.mxu3 %v3356_v12  ;;  %v3388_v36 = vor.u32 %v4011_v40, %v3387_v37  ;;  %2319 = vmatpush.bf16.msra.mxu2 %v4109_v15  ;;  %v3431_v40 = vld [vmem:[%s4409_s12 + $0x328] sm:$0xf] }
 0x13e   : > { %v4819_v23 = vadd.f32 %v2235_v42, %v2147_v21  ;;  %2277 = vmatmul.bf16.gmra.mxu1 %v3364_v18  ;;  %v4007_v42 = vld [vmem:[%s4409_s12 + $0x2dc] sm:$0xf] }
 0x13f   : > { %v1971_v47 = vpop.f32.mrf.mxu2  ;;  %v3392_v63 = vor.u32 %v4007_v42, %v3389_v44  ;;  %v4021_v42 = vld [vmem:[%s4409_s12 + $0x348] sm:$0xf0] }
 0x140   : > { %v2060_v24 = vpop.f32.mrf.mxu3  ;;  %v1972_v27 = vadd.f32 %v1971_v47, %v4629_v2  ;;  %v4125_v44 = vld [vmem:[%s5240_s1 + $0x208] sm:$0xff] }
 0x141   : > { %v2151_v29 = vpop.f32.mrf.mxu0  ;;  %2497 = vmatpush.bf16.msra.mxu0 %v4125_v44 }
 0x142   : > { %v2061_v28 = vadd.f32 %v2060_v24, %v1972_v27 }
 0x143   : > { %v2240_v33 = vpop.f32.mrf.mxu1 }
 0x144   : > { %v2150_v35 = vadd.f32 %v2149_v17, %v2061_v28  ;;  %v4117_v17 = vld [vmem:[%s5240_s1 + $0x1c8] sm:$0xff] }
 0x145   : > { %2408 = vmatpush.bf16.msra.mxu3 %v4117_v17 }
 0x146   : > { %v4829_v48 = vadd.f32 %v2238_v19, %v2150_v35  ;;  %v3425_v35 = vld [vmem:[%s4409_s12 + $0x344] sm:$0xf0] }
 0x147   : > { %v1973_v2 = vpop.f32.mrf.mxu2 }
 0x148   : > { %v2062_v54 = vpop.f32.mrf.mxu3  ;;  %v1974_v62 = vadd.f32 %v1973_v2, %v4636_v11  ;;  %v3433_v2 = vld [vmem:[%s4409_s12 + $0x34c] sm:$0xf0] }
 0x149   : > { %v2154_v5 = vpop.f32.mrf.mxu0 }
 0x14a   : > { %v2063_v4 = vadd.f32 %v2062_v54, %v1974_v62  ;;  %v3432_v62 = vor.u32 %v4021_v42, %v3431_v40  ;;  %v4026_v40 = vld [vmem:[%s4409_s12 + $0x374] sm:$0xf]  ;;  %v3469_v42 = vld [vmem:[%s4409_s12 + $0x394] sm:$0xf0] }
 0x14b   : > { %v2243_v12 = vpop.f32.mrf.mxu1 }
 0x14c   : > { %2015 = vmatmul.bf16.gmra.mxu2 %v3388_v36  ;;  %v2152_v13 = vadd.f32 %v2151_v29, %v2063_v4  ;;  %2193 = vmatmul.bf16.gmra.mxu0 %v3396_v1  ;;  %v3423_v29 = vld [vmem:[%s4409_s12 + $0x320] sm:$0xf]  ;;  %v3436_v1 = vor.u32 %v4017_v52, %v3433_v2 }
 0x14d   : > { %2104 = vmatmul.bf16.gmra.mxu3 %v3392_v63  ;;  %v3424_v56 = vor.u32 %v4020_v31, %v3423_v29  ;;  %v3467_v31 = vld [vmem:[%s4409_s12 + $0x370] sm:$0xf] }
 0x14e   : > { %v4839_v11 = vadd.f32 %v2240_v33, %v2152_v13  ;;  %2282 = vmatmul.bf16.gmra.mxu1 %v3400_v7  ;;  %v4016_v33 = vld [vmem:[%s4409_s12 + $0x324] sm:$0xf] }
 0x14f   : > { %v1976_v18 = vpop.f32.mrf.mxu2  ;;  %v3428_v58 = vor.u32 %v4016_v33, %v3425_v35  ;;  %v4030_v33 = vld [vmem:[%s4409_s12 + $0x390] sm:$0xf0] }
 0x150   : > { %v2065_v19 = vpop.f32.mrf.mxu3  ;;  %v1977_v21 = vadd.f32 %v1976_v18, %v4652_v32  ;;  %v4137_v18 = vld [vmem:[%s5242_s3 + $0x28] sm:$0xff]  ;;  %v3468_v52 = vor.u32 %v4030_v33, %v3467_v31  ;;  %v4035_v33 = vld [vmem:[%s4409_s12 + $0x3bc] sm:$0xf] }
 0x151   : > { %v2156_v24 = vpop.f32.mrf.mxu0  ;;  %2698 = vmatpush.bf16.msra.mxu1 %v4137_v18  ;;  %v4038_v18 = vld [vmem:[%s4409_s12 + $0x3d0] sm:$0xf0] }
 0x152   : > { %v2066_v47 = vadd.f32 %v2065_v19, %v1977_v21 }
 0x153   : > { %v2245_v27 = vpop.f32.mrf.mxu1 }
 0x154   : > { %v2155_v28 = vadd.f32 %v2154_v5, %v2066_v47  ;;  %v3459_v47 = vld [vmem:[%s4409_s12 + $0x368] sm:$0xf] }
 0x156   : > { %v4849_v37 = vadd.f32 %v2243_v12, %v2155_v28  ;;  %v3461_v28 = vld [vmem:[%s4409_s12 + $0x38c] sm:$0xf0] }
 0x157   : > { %v1978_v32 = vpop.f32.mrf.mxu2 }
 0x158   : > { %v2067_v49 = vpop.f32.mrf.mxu3  ;;  %v1979_v54 = vadd.f32 %v1978_v32, %v4663_v45 }
 0x159   : > { %v2159_v63 = vpop.f32.mrf.mxu0 }
 0x15a   : > { %v2068_v36 = vadd.f32 %v2067_v49, %v1979_v54 }
 0x15b   : > { %v2248_v4 = vpop.f32.mrf.mxu1 }
 0x15c   : > { %2020 = vmatmul.bf16.gmra.mxu2 %v3424_v56  ;;  %v2157_v5 = vadd.f32 %v2156_v24, %v2068_v36  ;;  %2198 = vmatmul.bf16.gmra.mxu0 %v3432_v62  ;;  %v4029_v24 = vld [vmem:[%s4409_s12 + $0x388] sm:$0xf0]  ;;  %v3472_v56 = vor.u32 %v4026_v40, %v3469_v42  ;;  %v4108_v36 = vld [vmem:[%s5240_s1 + $0x180] sm:$0xff] }
 0x15d   : > { %2109 = vmatmul.bf16.gmra.mxu3 %v3428_v58  ;;  %v3460_v32 = vor.u32 %v4029_v24, %v3459_v47  ;;  %2320 = vmatpush.bf16.msra.mxu2 %v4108_v36  ;;  %v3503_v24 = vld [vmem:[%s4409_s12 + $0x3b8] sm:$0xf] }
 0x15e   : > { %v4859_v7 = vadd.f32 %v2245_v27, %v2157_v5  ;;  %2287 = vmatmul.bf16.gmra.mxu1 %v3436_v1  ;;  %v4025_v27 = vld [vmem:[%s4409_s12 + $0x36c] sm:$0xf] }
 0x15f   : > { %v1981_v45 = vpop.f32.mrf.mxu2  ;;  %v3464_v49 = vor.u32 %v4025_v27, %v3461_v28  ;;  %v4039_v27 = vld [vmem:[%s4409_s12 + $0x3d8] sm:$0xf0] }
 0x160   : > { %v2070_v12 = vpop.f32.mrf.mxu3  ;;  %v1982_v13 = vadd.f32 %v1981_v45, %v4678_v3 }
 0x161   : > { %v2161_v17 = vpop.f32.mrf.mxu0 }
 0x162   : > { %v2071_v15 = vadd.f32 %v2070_v12, %v1982_v13 }
 0x163   : > { %v2250_v19 = vpop.f32.mrf.mxu1 }
 0x164   : > { %v2160_v21 = vadd.f32 %v2159_v63, %v2071_v15  ;;  %v4116_v63 = vld [vmem:[%s5240_s1 + $0x1c0] sm:$0xff] }
 0x165   : > { %2409 = vmatpush.bf16.msra.mxu3 %v4116_v63  ;;  %v4136_v63 = vld [vmem:[%s5242_s3 + $0x20] sm:$0xff] }
 0x166   : > { %v4869_v29 = vadd.f32 %v2248_v4, %v2160_v21  ;;  %v3497_v21 = vld [vmem:[%s4409_s12 + $0x3d4] sm:$0xf0]  ;;  %2699 = vmatpush.bf16.msra.mxu1 %v4136_v63  ;;  %v4052_v63 = vld [vmem:[%s4409_s12 + $0x444] sm:$0xf] }
 0x167   : > { %v1983_v3 = vpop.f32.mrf.mxu2 }
 0x168   : > { %v2072_v35 = vpop.f32.mrf.mxu3  ;;  %v1984_v44 = vadd.f32 %v1983_v3, %v4685_v14  ;;  %v3505_v3 = vld [vmem:[%s4409_s12 + $0x3dc] sm:$0xf0] }
 0x169   : > { %v2164_v54 = vpop.f32.mrf.mxu0 }
 0x16a   : > { %v2073_v2 = vadd.f32 %v2072_v35, %v1984_v44  ;;  %v3504_v44 = vor.u32 %v4039_v27, %v3503_v24  ;;  %v4044_v24 = vld [vmem:[%s4409_s12 + $0x404] sm:$0xf]  ;;  %v3541_v27 = vld [vmem:[%s4409_s12 + $0x424] sm:$0xf0] }
 0x16b   : > { %v2253_v58 = vpop.f32.mrf.mxu1 }
 0x16c   : > { %2025 = vmatmul.bf16.gmra.mxu2 %v3460_v32  ;;  %v2162_v62 = vadd.f32 %v2161_v17, %v2073_v2  ;;  %2203 = vmatmul.bf16.gmra.mxu0 %v3468_v52  ;;  %v3495_v17 = vld [vmem:[%s4409_s12 + $0x3b0] sm:$0xf]  ;;  %v3508_v52 = vor.u32 %v4035_v33, %v3505_v3 }
 0x16d   : > { %2114 = vmatmul.bf16.gmra.mxu3 %v3464_v49  ;;  %v3496_v40 = vor.u32 %v4038_v18, %v3495_v17  ;;  %v3539_v18 = vld [vmem:[%s4409_s12 + $0x400] sm:$0xf] }
 0x16e   : > { %v4879_v14 = vadd.f32 %v2250_v19, %v2162_v62  ;;  %2292 = vmatmul.bf16.gmra.mxu1 %v3472_v56  ;;  %v4034_v19 = vld [vmem:[%s4409_s12 + $0x3b4] sm:$0xf] }
 0x16f   : > { %v1986_v1 = vpop.f32.mrf.mxu2  ;;  %v3500_v42 = vor.u32 %v4034_v19, %v3497_v21 }
 0x170   : > { %v2075_v4 = vpop.f32.mrf.mxu3  ;;  %v1987_v5 = vadd.f32 %v1986_v1, %v4701_v39  ;;  %v4124_v39 = vld [vmem:[%s5240_s1 + $0x200] sm:$0xff] }
 0x171   : > { %v2166_v12 = vpop.f32.mrf.mxu0  ;;  %2498 = vmatpush.bf16.msra.mxu0 %v4124_v39 }
 0x172   : > { %v2076_v45 = vadd.f32 %v2075_v4, %v1987_v5  ;;  %v3531_v5 = vld [vmem:[%s4409_s12 + $0x3f8] sm:$0xf] }
 0x173   : > { %v4885_v13 = vpop.f32.mrf.mxu1 }
 0x174   : > { %v2165_v15 = vadd.f32 %v2164_v54, %v2076_v45  ;;  %v4047_v45 = vld [vmem:[%s4409_s12 + $0x418] sm:$0xf0] }
 0x176   : > { %v4891_v47 = vadd.f32 %v2253_v58, %v2165_v15  ;;  %v3533_v15 = vld [vmem:[%s4409_s12 + $0x41c] sm:$0xf0] }
 0x177   : > { %v1988_v28 = vpop.f32.mrf.mxu2 }
 0x178   : > { %v2077_v31 = vpop.f32.mrf.mxu3  ;;  %v1989_v35 = vadd.f32 %v1988_v28, %v4712_v53  ;;  %v3532_v28 = vor.u32 %v4047_v45, %v3531_v5  ;;  %v3575_v5 = vld [vmem:[%s4409_s12 + $0x448] sm:$0xf]  ;;  %v4057_v45 = vld [vmem:[%s4409_s12 + $0x468] sm:$0xf0] }
 0x179   : > { %v2169_v49 = vpop.f32.mrf.mxu0 }
 0x17a   : > { %v2078_v32 = vadd.f32 %v2077_v31, %v1989_v35 }
 0x17b   : > { %v2258_v2 = vpop.f32.mrf.mxu1 }
 0x17c   : > { %2030 = vmatmul.bf16.gmra.mxu2 %v3496_v40  ;;  %v4901_v54 = vadd.f32 %v2166_v12, %v2078_v32  ;;  %2208 = vmatmul.bf16.gmra.mxu0 %v3504_v44  ;;  %v4043_v12 = vld [vmem:[%s4409_s12 + $0x3fc] sm:$0xf]  ;;  %v3544_v40 = vor.u32 %v4044_v24, %v3541_v27  ;;  %v3576_v24 = vor.u32 %v4057_v45, %v3575_v5 }
 0x17d   : > { %2119 = vmatmul.bf16.gmra.mxu3 %v3500_v42  ;;  %v3536_v31 = vor.u32 %v4043_v12, %v3533_v15 }
 0x17e   : > { %2297 = vmatmul.bf16.gmra.mxu1 %v3508_v52 }
 0x17f   : > { %v1991_v53 = vpop.f32.mrf.mxu2 }
 0x180   : > { %v2080_v56 = vpop.f32.mrf.mxu3  ;;  %v1992_v58 = vadd.f32 %v1991_v53, %v4727_v16  ;;  %v4048_v16 = vld [vmem:[%s4409_s12 + $0x420] sm:$0xf0] }
 0x181   : > { %v2171_v36 = vpop.f32.mrf.mxu0  ;;  %v3540_v33 = vor.u32 %v4048_v16, %v3539_v18  ;;  %v4053_v18 = vld [vmem:[%s4409_s12 + $0x44c] sm:$0xf]  ;;  %v3577_v16 = vld [vmem:[%s4409_s12 + $0x46c] sm:$0xf0] }
 0x182   : > { %v2081_v62 = vadd.f32 %v2080_v56, %v1992_v58  ;;  %v3567_v58 = vld [vmem:[%s4409_s12 + $0x440] sm:$0xf] }
 0x183   : > { %v4907_v1 = vpop.f32.mrf.mxu1 }
 0x184   : > { %v2170_v4 = vadd.f32 %v2169_v49, %v2081_v62  ;;  %v4056_v62 = vld [vmem:[%s4409_s12 + $0x460] sm:$0xf0] }
 0x186   : > { %v4913_v17 = vadd.f32 %v2258_v2, %v2170_v4  ;;  %v3569_v4 = vld [vmem:[%s4409_s12 + $0x464] sm:$0xf0] }
 0x187   : > { %v1993_v19 = vpop.f32.mrf.mxu2 }
 0x188   : > { %v2082_v21 = vpop.f32.mrf.mxu3  ;;  %v1994_v39 = vadd.f32 %v1993_v19, %v4734_v26 }
 0x189   : > { %v2174_v35 = vpop.f32.mrf.mxu0 }
 0x18a   : > { %v2083_v3 = vadd.f32 %v2082_v21, %v1994_v39  ;;  %v3572_v21 = vor.u32 %v4052_v63, %v3569_v4  ;;  %v3051_v63 = vld [vmem:[%s4409_s12 + $0x20] sm:$0xf]  ;;  %v3924_v4 = vld [vmem:[%s4409_s12 + $0x40] sm:$0xf0] }
 0x18b   : > { %v2263_v42 = vpop.f32.mrf.mxu1 }
 0x18c   : > { %2035 = vmatmul.bf16.gmra.mxu2 %v3532_v28  ;;  %v4920_v44 = vadd.f32 %v2171_v36, %v2083_v3  ;;  %2213 = vmatmul.bf16.gmra.mxu0 %v3540_v33  ;;  %v3580_v28 = vor.u32 %v4053_v18, %v3577_v16  ;;  %v3052_v18 = vor.u32 %v3924_v4, %v3051_v63 }
 0x18d   : > { %2124 = vmatmul.bf16.gmra.mxu3 %v3536_v31 }
 0x18e   : > { %2302 = vmatmul.bf16.gmra.mxu1 %v3544_v40 }
 0x18f   : > { %v1996_v26 = vpop.f32.mrf.mxu2 }
 0x190   : > { %v2085_v32 = vpop.f32.mrf.mxu3  ;;  %v1997_v49 = vadd.f32 %v1996_v26, %v4750_v57  ;;  %v3568_v57 = vor.u32 %v4056_v62, %v3567_v58  ;;  %v4135_v26 = vld [vmem:[%s5242_s3 + $0x18] sm:$0xff]  ;;  %v3045_v58 = vld [vmem:[%s4409_s12 + $0x3c] sm:$0xf0] }
 0x191   : > { %v2176_v2 = vpop.f32.mrf.mxu0  ;;  %2700 = vmatpush.bf16.msra.mxu1 %v4135_v26  ;;  %v3081_v26 = vld [vmem:[%s4409_s12 + $0x84] sm:$0xf0] }
 0x192   : > { %v2086_v52 = vadd.f32 %v2085_v32, %v1997_v49 }
 0x193   : > { %v4923_v53 = vpop.f32.mrf.mxu1 }
 0x194   : > { %v2175_v56 = vadd.f32 %v2174_v35, %v2086_v52  ;;  %v3043_v52 = vld [vmem:[%s4409_s12 + $0x18] sm:$0xf] }
 0x196   : > { %v4929_v36 = vadd.f32 %v2263_v42, %v2175_v56  ;;  %v3919_v56 = vld [vmem:[%s4409_s12 + $0x1c] sm:$0xf] }
 0x197   : > { %v1998_v12 = vpop.f32.mrf.mxu2 }
 0x198   : > { %v2087_v15 = vpop.f32.mrf.mxu3  ;;  %v1999_v19 = vadd.f32 %v1998_v12, %v4760_v10 }
 0x199   : > { %v2179_v39 = vpop.f32.mrf.mxu0 }
 0x19a   : > { %v2088_v27 = vadd.f32 %v2087_v15, %v1999_v19  ;;  %v3048_v15 = vor.u32 %v3919_v56, %v3045_v58 }
 0x19b   : > { %v2268_v31 = vpop.f32.mrf.mxu1 }
 0x19c   : > { %2040 = vmatmul.bf16.gmra.mxu2 %v3568_v57  ;;  %v4936_v33 = vadd.f32 %v2176_v2, %v2088_v27  ;;  %2218 = vmatmul.bf16.gmra.mxu0 %v3576_v24  ;;  %v3923_v2 = vld [vmem:[%s4409_s12 + $0x38] sm:$0xf0] }
 0x19d   : > { %2129 = vmatmul.bf16.gmra.mxu3 %v3572_v21  ;;  %v3044_v12 = vor.u32 %v3923_v2, %v3043_v52  ;;  %v3087_v52 = vld [vmem:[%s4409_s12 + $0x68] sm:$0xf]  ;;  %v3933_v2 = vld [vmem:[%s4409_s12 + $0x88] sm:$0xf0] }
 0x19e   : > { %2307 = vmatmul.bf16.gmra.mxu1 %v3580_v28 }
 0x19f   : > { %v2001_v10 = vpop.f32.mrf.mxu2 }
 0x1a0   : > { %v2090_v3 = vpop.f32.mrf.mxu3  ;;  %v2002_v35 = vadd.f32 %v2001_v10, %v4776_v43 }
 0x1a1   : > { %v2181_v42 = vpop.f32.mrf.mxu0 }
 0x1a2   : > { %v2091_v40 = vadd.f32 %v2090_v3, %v2002_v35  ;;  %v3079_v3 = vld [vmem:[%s4409_s12 + $0x60] sm:$0xf]  ;;  %v3932_v35 = vld [vmem:[%s4409_s12 + $0x80] sm:$0xf0] }
 0x1a3   : > { %v4942_v32 = vpop.f32.mrf.mxu1  ;;  %v3080_v63 = vor.u32 %v3932_v35, %v3079_v3  ;;  %v3123_v35 = vld [vmem:[%s4409_s12 + $0xb0] sm:$0xf] }
 0x1a4   : > { %v2180_v49 = vadd.f32 %v2179_v39, %v2091_v40  ;;  %v3928_v40 = vld [vmem:[%s4409_s12 + $0x64] sm:$0xf] }
 0x1a5   : > { %v3084_v4 = vor.u32 %v3928_v40, %v3081_v26  ;;  %v3942_v40 = vld [vmem:[%s4409_s12 + $0xd0] sm:$0xf0] }
 0x1a6   : > { %v4948_v62 = vadd.f32 %v2268_v31, %v2180_v49 }
 0x1a7   : > { %v2003_v5 = vpop.f32.mrf.mxu2 }
 0x1a8   : > { %v2092_v43 = vpop.f32.mrf.mxu3  ;;  %v2004_v45 = vadd.f32 %v2003_v5, %v4786_v59 }
 0x1a9   : > { %v2184_v19 = vpop.f32.mrf.mxu0 }
 0x1aa   : > { %v2093_v16 = vadd.f32 %v2092_v43, %v2004_v45 }
 0x1ab   : > { %v2273_v57 = vpop.f32.mrf.mxu1 }
 0x1ac   : > { %2321 = vmatmul.bf16.vlgmr.msra.gmra.mxu2 %v3044_v12  ;;  %v4953_v21 = vadd.f32 %v2181_v42, %v2093_v16  ;;  %2499 = vmatmul.bf16.vlgmr.msra.gmra.mxu0 %v3052_v18 }
 0x1ad   : > { %2410 = vmatmul.bf16.vlgmr.msra.gmra.mxu3 %v3048_v15 }
 0x1af   : > { %v2006_v24 = vpop.f32.mrf.mxu2 }
 0x1b0   : > { %v2095_v27 = vpop.f32.mrf.mxu3  ;;  %v2007_v59 = vadd.f32 %v2006_v24, %v4609_v41  ;;  %v3088_v41 = vor.u32 %v3933_v2, %v3087_v52 }
 0x1b1   : > { %v2186_v28 = vpop.f32.mrf.mxu0 }
 0x1b2   : > { %v2096_v39 = vadd.f32 %v2095_v27, %v2007_v59  ;;  %v3115_v59 = vld [vmem:[%s4409_s12 + $0xa8] sm:$0xf] }
 0x1b3   : > { %v4956_v31 = vpop.f32.mrf.mxu1 }
 0x1b4   : > { %v2185_v10 = vadd.f32 %v2184_v19, %v2096_v39  ;;  %v3941_v39 = vld [vmem:[%s4409_s12 + $0xc8] sm:$0xf0] }
 0x1b5   : > { %v3116_v2 = vor.u32 %v3941_v39, %v3115_v59  ;;  %v3153_v59 = vld [vmem:[%s4409_s12 + $0x114] sm:$0xf0] }
 0x1b6   : > { %v4962_v49 = vadd.f32 %v2273_v57, %v2185_v10  ;;  %v4134_v57 = vld [vmem:[%s5242_s3 + $0x10] sm:$0xff] }
 0x1b7   : > { %v2008_v42 = vpop.f32.mrf.mxu2  ;;  %2701 = vmatpush.bf16.msra.mxu1 %v4134_v57  ;;  %v3117_v10 = vld [vmem:[%s4409_s12 + $0xcc] sm:$0xf0]  ;;  %v3950_v57 = vld [vmem:[%s4409_s12 + $0x110] sm:$0xf0] }
 0x1b8   : > { %v2097_v56 = vpop.f32.mrf.mxu3  ;;  %v2009_v58 = vadd.f32 %v2008_v42, %v4626_v61 }
 0x1b9   : > { %v2189_v43 = vpop.f32.mrf.mxu0 }
 0x1ba   : > { %v2098_v5 = vadd.f32 %v2097_v56, %v2009_v58  ;;  %v3124_v56 = vor.u32 %v3942_v40, %v3123_v35 }
 0x1bb   : > { %v2278_v45 = vpop.f32.mrf.mxu1 }
 0x1bc   : > { %2326 = vmatmul.bf16.gmra.mxu2 %v3080_v63  ;;  %v4967_v12 = vadd.f32 %v2186_v28, %v2098_v5  ;;  %2504 = vmatmul.bf16.gmra.mxu0 %v3088_v41  ;;  %v3937_v28 = vld [vmem:[%s4409_s12 + $0xac] sm:$0xf] }
 0x1bd   : > { %2415 = vmatmul.bf16.gmra.mxu3 %v3084_v4  ;;  %v3120_v42 = vor.u32 %v3937_v28, %v3117_v10  ;;  %v3159_v28 = vld [vmem:[%s4409_s12 + $0xf8] sm:$0xf]  ;;  %v3951_v10 = vld [vmem:[%s4409_s12 + $0x118] sm:$0xf0] }
 0x1bf   : > { %v2011_v15 = vpop.f32.mrf.mxu2 }
 0x1c0   : > { %v2100_v18 = vpop.f32.mrf.mxu3  ;;  %v2012_v61 = vadd.f32 %v2011_v15, %v4632_v6 }
 0x1c1   : > { %v2191_v19 = vpop.f32.mrf.mxu0 }
 0x1c2   : > { %v2101_v16 = vadd.f32 %v2100_v18, %v2012_v61 }
 0x1c3   : > { %v4973_v24 = vpop.f32.mrf.mxu1 }
 0x1c4   : > { %v2190_v27 = vadd.f32 %v2189_v43, %v2101_v16  ;;  %v3151_v16 = vld [vmem:[%s4409_s12 + $0xf0] sm:$0xf] }
 0x1c6   : > { %v4979_v3 = vadd.f32 %v2278_v45, %v2190_v27  ;;  %v3946_v27 = vld [vmem:[%s4409_s12 + $0xf4] sm:$0xf] }
 0x1c7   : > { %v2013_v26 = vpop.f32.mrf.mxu2 }
 0x1c8   : > { %v2102_v6 = vpop.f32.mrf.mxu3  ;;  %v2014_v52 = vadd.f32 %v2013_v26, %v4646_v25  ;;  %v3152_v26 = vor.u32 %v3950_v57, %v3151_v16  ;;  %v3955_v16 = vld [vmem:[%s4409_s12 + $0x13c] sm:$0xf]  ;;  %v3189_v57 = vld [vmem:[%s4409_s12 + $0x15c] sm:$0xf0] }
 0x1c9   : > { %v2194_v63 = vpop.f32.mrf.mxu0 }
 0x1ca   : > { %v2103_v58 = vadd.f32 %v2102_v6, %v2014_v52  ;;  %v3156_v6 = vor.u32 %v3946_v27, %v3153_v59  ;;  %v3195_v59 = vld [vmem:[%s4409_s12 + $0x140] sm:$0xf] }
 0x1cb   : > { %v2283_v4 = vpop.f32.mrf.mxu1 }
 0x1cc   : > { %2331 = vmatmul.bf16.gmra.mxu2 %v3116_v2  ;;  %v4984_v41 = vadd.f32 %v2191_v19, %v2103_v58  ;;  %2509 = vmatmul.bf16.gmra.mxu0 %v3124_v56 }
 0x1cd   : > { %2420 = vmatmul.bf16.gmra.mxu3 %v3120_v42 }
 0x1cf   : > { %v2016_v5 = vpop.f32.mrf.mxu2 }
 0x1d0   : > { %v2105_v43 = vpop.f32.mrf.mxu3  ;;  %v2017_v25 = vadd.f32 %v2016_v5, %v4658_v38  ;;  %v3160_v38 = vor.u32 %v3951_v10, %v3159_v28  ;;  %v3960_v28 = vld [vmem:[%s4409_s12 + $0x160] sm:$0xf0] }
 0x1d1   : > { %v2196_v15 = vpop.f32.mrf.mxu0 }
 0x1d2   : > { %v2106_v45 = vadd.f32 %v2105_v43, %v2017_v25  ;;  %v4133_v43 = vld [vmem:[%s5242_s3 + $0x8] sm:$0xff] }
 0x1d3   : > { %v4987_v18 = vpop.f32.mrf.mxu1  ;;  %2702 = vmatpush.bf16.msra.mxu1 %v4133_v43 }
 0x1d4   : > { %v2195_v61 = vadd.f32 %v2194_v63, %v2106_v45 }
 0x1d6   : > { %v4993_v39 = vadd.f32 %v2283_v4, %v2195_v61  ;;  %v3187_v61 = vld [vmem:[%s4409_s12 + $0x138] sm:$0xf] }
 0x1d7   : > { %v2018_v19 = vpop.f32.mrf.mxu2 }
 0x1d8   : > { %v2107_v35 = vpop.f32.mrf.mxu3  ;;  %v2019_v40 = vadd.f32 %v2018_v19, %v4675_v60 }
 0x1d9   : > { %v2199_v2 = vpop.f32.mrf.mxu0 }
 0x1da   : > { %v2108_v52 = vadd.f32 %v2107_v35, %v2019_v40  ;;  %v3192_v40 = vor.u32 %v3955_v16, %v3189_v57  ;;  %v3225_v16 = vld [vmem:[%s4409_s12 + $0x1a4] sm:$0xf0] }
 0x1db   : > { %v2288_v42 = vpop.f32.mrf.mxu1 }
 0x1dc   : > { %2336 = vmatmul.bf16.gmra.mxu2 %v3152_v26  ;;  %v4998_v56 = vadd.f32 %v2196_v15, %v2108_v52  ;;  %2514 = vmatmul.bf16.gmra.mxu0 %v3160_v38  ;;  %v3959_v15 = vld [vmem:[%s4409_s12 + $0x158] sm:$0xf0]  ;;  %v3196_v26 = vor.u32 %v3960_v28, %v3195_v59  ;;  %v3231_v59 = vld [vmem:[%s4409_s12 + $0x188] sm:$0xf]  ;;  %v3969_v28 = vld [vmem:[%s4409_s12 + $0x1a8] sm:$0xf0] }
 0x1dd   : > { %2425 = vmatmul.bf16.gmra.mxu3 %v3156_v6  ;;  %v3188_v35 = vor.u32 %v3959_v15, %v3187_v61  ;;  %v3968_v61 = vld [vmem:[%s4409_s12 + $0x1a0] sm:$0xf0] }
 0x1de   : > { %v3964_v15 = vld [vmem:[%s4409_s12 + $0x184] sm:$0xf] }
 0x1df   : > { %v2021_v58 = vpop.f32.mrf.mxu2 }
 0x1e0   : > { %v2110_v63 = vpop.f32.mrf.mxu3  ;;  %v2022_v60 = vadd.f32 %v2021_v58, %v4681_v8 }
 0x1e1   : > { %v2201_v5 = vpop.f32.mrf.mxu0 }
 0x1e2   : > { %v2111_v4 = vadd.f32 %v2110_v63, %v2022_v60 }
 0x1e3   : > { %v5004_v25 = vpop.f32.mrf.mxu1 }
 0x1e4   : > { %v2200_v45 = vadd.f32 %v2199_v2, %v2111_v4 }
 0x1e6   : > { %v5010_v27 = vadd.f32 %v2288_v42, %v2200_v45  ;;  %v3223_v45 = vld [vmem:[%s4409_s12 + $0x180] sm:$0xf] }
 0x1e7   : > { %v2023_v10 = vpop.f32.mrf.mxu2 }
 0x1e8   : > { %v2112_v8 = vpop.f32.mrf.mxu3  ;;  %v2024_v19 = vadd.f32 %v2023_v10, %v4695_v30 }
 0x1e9   : > { %v2204_v38 = vpop.f32.mrf.mxu0 }
 0x1ea   : > { %v2113_v6 = vadd.f32 %v2112_v8, %v2024_v19  ;;  %v3224_v19 = vor.u32 %v3968_v61, %v3223_v45  ;;  %v3259_v45 = vld [vmem:[%s4409_s12 + $0x1c8] sm:$0xf] }
 0x1eb   : > { %v2293_v52 = vpop.f32.mrf.mxu1 }
 0x1ec   : > { %2341 = vmatmul.bf16.gmra.mxu2 %v3188_v35  ;;  %v5015_v2 = vadd.f32 %v2201_v5, %v2113_v6  ;;  %2519 = vmatmul.bf16.gmra.mxu0 %v3196_v26  ;;  %v3228_v35 = vor.u32 %v3964_v15, %v3225_v16  ;;  %v3973_v15 = vld [vmem:[%s4409_s12 + $0x1cc] sm:$0xf]  ;;  %v3261_v16 = vld [vmem:[%s4409_s12 + $0x1ec] sm:$0xf0] }
 0x1ed   : > { %2430 = vmatmul.bf16.gmra.mxu3 %v3192_v40 }
 0x1ef   : > { %v2026_v42 = vpop.f32.mrf.mxu2 }
 0x1f0   : > { %v2115_v58 = vpop.f32.mrf.mxu3  ;;  %v2027_v30 = vadd.f32 %v2026_v42, %v4707_v46  ;;  %v3232_v46 = vor.u32 %v3969_v28, %v3231_v59  ;;  %v3267_v28 = vld [vmem:[%s4409_s12 + $0x1d0] sm:$0xf] }
 0x1f1   : > { %v2206_v60 = vpop.f32.mrf.mxu0 }
 0x1f2   : > { %v2116_v63 = vadd.f32 %v2115_v58, %v2027_v30 }
 0x1f3   : > { %v5018_v4 = vpop.f32.mrf.mxu1 }
 0x1f4   : > { %v2205_v43 = vadd.f32 %v2204_v38, %v2116_v63  ;;  %v4132_v63 = vld [vmem:[%s5242_s3] sm:$0xff] }
 0x1f5   : > { %2703 = vmatpush.bf16.msra.mxu1 %v4132_v63 }
 0x1f6   : > { %v5024_v57 = vadd.f32 %v2293_v52, %v2205_v43 }
 0x1f7   : > { %v2028_v5 = vpop.f32.mrf.mxu2 }
 0x1f8   : > { %v2117_v10 = vpop.f32.mrf.mxu3  ;;  %v2029_v8 = vadd.f32 %v2028_v5, %v4724_v9  ;;  %v3978_v5 = vld [vmem:[%s4409_s12 + $0x1f0] sm:$0xf0] }
 0x1f9   : > { %v2209_v26 = vpop.f32.mrf.mxu0 }
 0x1fa   : > { %v2118_v40 = vadd.f32 %v2117_v10, %v2029_v8 }
 0x1fb   : > { %v2298_v6 = vpop.f32.mrf.mxu1 }
 0x1fc   : > { %2346 = vmatmul.bf16.gmra.mxu2 %v3224_v19  ;;  %v5029_v38 = vadd.f32 %v2206_v60, %v2118_v40  ;;  %2524 = vmatmul.bf16.gmra.mxu0 %v3232_v46  ;;  %v3977_v60 = vld [vmem:[%s4409_s12 + $0x1e8] sm:$0xf0]  ;;  %v3268_v46 = vor.u32 %v3978_v5, %v3267_v28  ;;  %v3303_v5 = vld [vmem:[%s4409_s12 + $0x218] sm:$0xf] }
 0x1fd   : > { %2435 = vmatmul.bf16.gmra.mxu3 %v3228_v35  ;;  %v3260_v19 = vor.u32 %v3977_v60, %v3259_v45  ;;  %v3264_v35 = vor.u32 %v3973_v15, %v3261_v16  ;;  %v3295_v45 = vld [vmem:[%s4409_s12 + $0x210] sm:$0xf]  ;;  %v3986_v60 = vld [vmem:[%s4409_s12 + $0x230] sm:$0xf0]  ;;  %v3297_v16 = vld [vmem:[%s4409_s12 + $0x234] sm:$0xf0] }
 0x1fe   : > { %v3982_v15 = vld [vmem:[%s4409_s12 + $0x214] sm:$0xf] }
 0x1ff   : > { %v2031_v52 = vpop.f32.mrf.mxu2 }
 0x200   : > { %v2120_v42 = vpop.f32.mrf.mxu3  ;;  %v2032_v9 = vadd.f32 %v2031_v52, %v4730_v20 }
 0x201   : > { %v2211_v30 = vpop.f32.mrf.mxu0 }
 0x202   : > { %v2121_v58 = vadd.f32 %v2120_v42, %v2032_v9 }
 0x203   : > { %v5036_v61 = vpop.f32.mrf.mxu1 }
 0x204   : > { %v2210_v43 = vadd.f32 %v2209_v26, %v2121_v58 }
 0x206   : > { %v5041_v59 = vadd.f32 %v2298_v6, %v2210_v43 }
 0x207   : > { %v2033_v10 = vpop.f32.mrf.mxu2 }
 0x208   : > { %v2122_v20 = vpop.f32.mrf.mxu3  ;;  %v2034_v8 = vadd.f32 %v2033_v10, %v4744_v50  ;;  %v3987_v10 = vld [vmem:[%s4409_s12 + $0x238] sm:$0xf0] }
 0x209   : > { %v2214_v26 = vpop.f32.mrf.mxu0 }
 0x20a   : > { %v2123_v40 = vadd.f32 %v2122_v20, %v2034_v8 }
 0x20b   : > { %v2303_v52 = vpop.f32.mrf.mxu1 }
 0x20c   : > { %2351 = vmatmul.bf16.gmra.mxu2 %v3260_v19  ;;  %v5046_v6 = vadd.f32 %v2211_v30, %v2123_v40  ;;  %2529 = vmatmul.bf16.gmra.mxu0 %v3268_v46  ;;  %v3296_v19 = vor.u32 %v3986_v60, %v3295_v45  ;;  %v3331_v60 = vld [vmem:[%s4409_s12 + $0x258] sm:$0xf] }
 0x20d   : > { %2440 = vmatmul.bf16.gmra.mxu3 %v3264_v35  ;;  %v3300_v35 = vor.u32 %v3982_v15, %v3297_v16  ;;  %v3995_v15 = vld [vmem:[%s4409_s12 + $0x278] sm:$0xf0] }
 0x20e   : > { %v3991_v16 = vld [vmem:[%s4409_s12 + $0x25c] sm:$0xf] }
 0x20f   : > { %v2036_v42 = vpop.f32.mrf.mxu2 }
 0x210   : > { %v2125_v9 = vpop.f32.mrf.mxu3  ;;  %v2037_v50 = vadd.f32 %v2036_v42, %v4756_v0  ;;  %v3304_v0 = vor.u32 %v3987_v10, %v3303_v5  ;;  %v3333_v5 = vld [vmem:[%s4409_s12 + $0x27c] sm:$0xf0] }
 0x211   : > { %v2216_v63 = vpop.f32.mrf.mxu0 }
 0x212   : > { %v2126_v58 = vadd.f32 %v2125_v9, %v2037_v50 }
 0x213   : > { %v5058_v46 = vpop.f32.mrf.mxu1 }
 0x214   : > { %v2215_v43 = vadd.f32 %v2214_v26, %v2126_v58 }
 0x216   : > { %v5053_v28 = vadd.f32 %v2303_v52, %v2215_v43 }
 0x217   : > { %v2038_v20 = vpop.f32.mrf.mxu2 }
 0x218   : > { %v2127_v30 = vpop.f32.mrf.mxu3  ;;  %v2039_v8 = vadd.f32 %v2038_v20, %v4773_v34  ;;  %v3339_v20 = vld [vmem:[%s4409_s12 + $0x260] sm:$0xf] }
 0x219   : > { %v2219_v26 = vpop.f32.mrf.mxu0 }
 0x21a   : > { %v2128_v40 = vadd.f32 %v2127_v30, %v2039_v8  ;;  %v3996_v30 = vld [vmem:[%s4409_s12 + $0x280] sm:$0xf0] }
 0x21b   : > { %v2308_v43 = vpop.f32.mrf.mxu1 }
 0x21c   : > { %2356 = vmatmul.bf16.gmra.mxu2 %v3296_v19  ;;  %v5060_v52 = vadd.f32 %v2216_v63, %v2128_v40  ;;  %2534 = vmatmul.bf16.gmra.mxu0 %v3304_v0  ;;  %v3340_v0 = vor.u32 %v3996_v30, %v3339_v20  ;;  %v4005_v20 = vld [vmem:[%s4409_s12 + $0x2c8] sm:$0xf0] }
 0x21d   : > { %2445 = vmatmul.bf16.gmra.mxu3 %v3300_v35  ;;  %v3336_v35 = vor.u32 %v3991_v16, %v3333_v5  ;;  %v3375_v5 = vld [vmem:[%s4409_s12 + $0x2a8] sm:$0xf] }
 0x21f   : > { %v2041_v42 = vpop.f32.mrf.mxu2 }
 0x220   : > { %v2130_v34 = vpop.f32.mrf.mxu3  ;;  %v2042_v9 = vadd.f32 %v2041_v42, %v4779_v51  ;;  %v3332_v51 = vor.u32 %v3995_v15, %v3331_v60  ;;  %v4000_v60 = vld [vmem:[%s4409_s12 + $0x2a4] sm:$0xf]  ;;  %v3369_v15 = vld [vmem:[%s4409_s12 + $0x2c4] sm:$0xf0] }
 0x221   : > { %v2221_v58 = vpop.f32.mrf.mxu0 }
 0x222   : > { %v2131_v50 = vadd.f32 %v2130_v34, %v2042_v9 }
 0x224   : > { %v2220_v45 = vadd.f32 %v2219_v26, %v2131_v50 }
 0x226   : > { %v5067_v10 = vadd.f32 %v2308_v43, %v2220_v45  ;;  %v4004_v45 = vld [vmem:[%s4409_s12 + $0x2c0] sm:$0xf0] }
 0x227   : > { %v2043_v8 = vpop.f32.mrf.mxu2 }
 0x228   : > { %v2132_v63 = vpop.f32.mrf.mxu3  ;;  %v2044_v19 = vadd.f32 %v2043_v8, %v4796_v22  ;;  %v3367_v22 = vld [vmem:[%s4409_s12 + $0x2a0] sm:$0xf] }
 0x229   : > { %v2500_v26 = vpop.f32.mrf.mxu0 }
 0x22a   : > { %v2133_v40 = vadd.f32 %v2132_v63, %v2044_v19  ;;  %v3368_v19 = vor.u32 %v4004_v45, %v3367_v22 }
 0x22c   : > { %2361 = vmatmul.bf16.gmra.mxu2 %v3332_v51  ;;  %v5072_v42 = vadd.f32 %v2221_v58, %v2133_v40  ;;  %2539 = vmatmul.bf16.gmra.mxu0 %v3340_v0  ;;  %v3372_v58 = vor.u32 %v4000_v60, %v3369_v15  ;;  %v3376_v51 = vor.u32 %v4005_v20, %v3375_v5  ;;  %v3403_v60 = vld [vmem:[%s4409_s12 + $0x2e8] sm:$0xf]  ;;  %v4013_v15 = vld [vmem:[%s4409_s12 + $0x308] sm:$0xf0]  ;;  %v3405_v5 = vld [vmem:[%s4409_s12 + $0x30c] sm:$0xf0] }
 0x22d   : > { %2450 = vmatmul.bf16.gmra.mxu3 %v3336_v35 }
 0x22f   : > { %v2322_v34 = vpop.f32.mrf.mxu2 }
 0x230   : > { %v2411_v9 = vpop.f32.mrf.mxu3  ;;  %v2323_v50 = vadd.f32 %v2322_v34, %v4809_v55 }
 0x231   : > { %v2502_v43 = vpop.f32.mrf.mxu0 }
 0x232   : > { %v2412_v16 = vadd.f32 %v2411_v9, %v2323_v50 }
 0x234   : > { %v2501_v35 = vadd.f32 %v2500_v26, %v2412_v16  ;;  %v4009_v16 = vld [vmem:[%s4409_s12 + $0x2ec] sm:$0xf] }
 0x236   : > { %v2580_v34 = vmax.f32 %v2501_v35, 0.0 }
 0x237   : > { %v2324_v30 = vpop.f32.mrf.mxu2 }
 0x238   : > { %v2413_v8 = vpop.f32.mrf.mxu3  ;;  %v2325_v63 = vadd.f32 %v2324_v30, %v4819_v23  ;;  %v4014_v30 = vld [vmem:[%s4409_s12 + $0x310] sm:$0xf0] }
 0x239   : > { %v2505_v55 = vpop.f32.mrf.mxu0 }
 0x23a   : > { %v2414_v0 = vadd.f32 %v2413_v8, %v2325_v63 }
 0x23c   : > { %v2503_v40 = vadd.f32 %v2502_v43, %v2414_v0  ;;  %2366 = vmatmul.bf16.gmra.mxu2 %v3368_v19  ;;  %2544 = vmatmul.bf16.gmra.mxu0 %v3376_v51  ;;  %v3411_v43 = vld [vmem:[%s4409_s12 + $0x2f0] sm:$0xf]  ;;  %v3408_v51 = vor.u32 %v4009_v16, %v3405_v5  ;;  %v4018_v16 = vld [vmem:[%s4409_s12 + $0x334] sm:$0xf]  ;;  %v3441_v5 = vld [vmem:[%s4409_s12 + $0x354] sm:$0xf0] }
 0x23d   : > { %2455 = vmatmul.bf16.gmra.mxu3 %v3372_v58  ;;  %v3404_v58 = vor.u32 %v4013_v15, %v3403_v60  ;;  %v3412_v35 = vor.u32 %v4014_v30, %v3411_v43  ;;  %v3439_v60 = vld [vmem:[%s4409_s12 + $0x330] sm:$0xf]  ;;  %v4022_v15 = vld [vmem:[%s4409_s12 + $0x350] sm:$0xf0]  ;;  %v4023_v43 = vld [vmem:[%s4409_s12 + $0x358] sm:$0xf0] }
 0x23e   : > { %v2581_v9 = vmax.f32 %v2503_v40, 0.0 }
 0x23f   : > { %v2327_v50 = vpop.f32.mrf.mxu2 }
 0x240   : > { %v2416_v23 = vpop.f32.mrf.mxu3  ;;  %v2612_v22 = vpack.c.bf16 %v2581_v9, %v2580_v34  ;;  %v2328_v45 = vadd.f32 %v2327_v50, %v4829_v48 }
 0x241   : > { %v2507_v26 = vpop.f32.mrf.mxu0 }
 0x242   : > { %2704 = vmatmul.bf16.vlgmr.msra.gmra.mxu1 %v2612_v22  ;;  %v2417_v20 = vadd.f32 %v2416_v23, %v2328_v45 }
 0x244   : > { %v2506_v0 = vadd.f32 %v2505_v55, %v2417_v20 }
 0x246   : > { %v2582_v9 = vmax.f32 %v2506_v0, 0.0 }
 0x247   : > { %v2329_v8 = vpop.f32.mrf.mxu2 }
 0x248   : > { %v2418_v63 = vpop.f32.mrf.mxu3  ;;  %v2330_v19 = vadd.f32 %v2329_v8, %v4839_v11 }
 0x249   : > { %v2510_v40 = vpop.f32.mrf.mxu0 }
 0x24a   : > { %v2419_v48 = vadd.f32 %v2418_v63, %v2330_v19  ;;  %v3440_v19 = vor.u32 %v4022_v15, %v3439_v60  ;;  %v4027_v60 = vld [vmem:[%s4409_s12 + $0x37c] sm:$0xf]  ;;  %v3477_v15 = vld [vmem:[%s4409_s12 + $0x39c] sm:$0xf0] }
 0x24c   : > { %v2508_v34 = vadd.f32 %v2507_v26, %v2419_v48  ;;  %2371 = vmatmul.bf16.gmra.mxu2 %v3404_v58  ;;  %2549 = vmatmul.bf16.gmra.mxu0 %v3412_v35  ;;  %v3447_v26 = vld [vmem:[%s4409_s12 + $0x338] sm:$0xf]  ;;  %v3444_v58 = vor.u32 %v4018_v16, %v3441_v5  ;;  %v4032_v5 = vld [vmem:[%s4409_s12 + $0x3a0] sm:$0xf0] }
 0x24d   : > { %2460 = vmatmul.bf16.gmra.mxu3 %v3408_v51  ;;  %v3448_v51 = vor.u32 %v4023_v43, %v3447_v26 }
 0x24e   : > { %v2583_v50 = vmax.f32 %v2508_v34, 0.0 }
 0x24f   : > { %v2332_v23 = vpop.f32.mrf.mxu2 }
 0x250   : > { %v2421_v11 = vpop.f32.mrf.mxu3  ;;  %v2613_v22 = vpack.c.bf16 %v2583_v50, %v2582_v9  ;;  %v2333_v45 = vadd.f32 %v2332_v23, %v4849_v37 }
 0x251   : > { %v2512_v55 = vpop.f32.mrf.mxu0 }
 0x252   : > { %2709 = vmatmul.bf16.gmra.mxu1 %v2613_v22  ;;  %v2422_v20 = vadd.f32 %v2421_v11, %v2333_v45  ;;  %v3475_v22 = vld [vmem:[%s4409_s12 + $0x378] sm:$0xf]  ;;  %v4031_v45 = vld [vmem:[%s4409_s12 + $0x398] sm:$0xf0] }
 0x254   : > { %v2511_v35 = vadd.f32 %v2510_v40, %v2422_v20 }
 0x256   : > { %v2584_v34 = vmax.f32 %v2511_v35, 0.0 }
 0x257   : > { %v2334_v30 = vpop.f32.mrf.mxu2 }
 0x258   : > { %v2423_v8 = vpop.f32.mrf.mxu3  ;;  %v2335_v63 = vadd.f32 %v2334_v30, %v4859_v7  ;;  %v3476_v30 = vor.u32 %v4031_v45, %v3475_v22  ;;  %v3519_v45 = vld [vmem:[%s4409_s12 + $0x3c8] sm:$0xf] }
 0x259   : > { %v2515_v0 = vpop.f32.mrf.mxu0 }
 0x25a   : > { %v2424_v37 = vadd.f32 %v2423_v8, %v2335_v63  ;;  %v3480_v8 = vor.u32 %v4027_v60, %v3477_v15  ;;  %v4041_v60 = vld [vmem:[%s4409_s12 + $0x3e8] sm:$0xf0] }
 0x25c   : > { %v2513_v48 = vadd.f32 %v2512_v55, %v2424_v37  ;;  %2376 = vmatmul.bf16.gmra.mxu2 %v3440_v19  ;;  %2554 = vmatmul.bf16.gmra.mxu0 %v3448_v51  ;;  %v3483_v55 = vld [vmem:[%s4409_s12 + $0x380] sm:$0xf] }
 0x25d   : > { %2465 = vmatmul.bf16.gmra.mxu3 %v3444_v58  ;;  %v3484_v63 = vor.u32 %v4032_v5, %v3483_v55 }
 0x25e   : > { %v2585_v9 = vmax.f32 %v2513_v48, 0.0 }
 0x25f   : > { %v2337_v50 = vpop.f32.mrf.mxu2 }
 0x260   : > { %v2426_v7 = vpop.f32.mrf.mxu3  ;;  %v2614_v23 = vpack.c.bf16 %v2585_v9, %v2584_v34  ;;  %v2338_v11 = vadd.f32 %v2337_v50, %v4869_v29  ;;  %v3511_v50 = vld [vmem:[%s4409_s12 + $0x3c0] sm:$0xf] }
 0x261   : > { %v2517_v40 = vpop.f32.mrf.mxu0 }
 0x262   : > { %2714 = vmatmul.bf16.gmra.mxu1 %v2614_v23  ;;  %v2427_v16 = vadd.f32 %v2426_v7, %v2338_v11  ;;  %v4040_v7 = vld [vmem:[%s4409_s12 + $0x3e0] sm:$0xf0]  ;;  %v3513_v11 = vld [vmem:[%s4409_s12 + $0x3e4] sm:$0xf0] }
 0x263   : > { %v4036_v23 = vld [vmem:[%s4409_s12 + $0x3c4] sm:$0xf]  ;;  %v3512_v5 = vor.u32 %v4040_v7, %v3511_v50  ;;  %v4050_v50 = vld [vmem:[%s4409_s12 + $0x430] sm:$0xf0] }
 0x264   : > { %v2516_v19 = vadd.f32 %v2515_v0, %v2427_v16 }
 0x266   : > { %v2586_v35 = vmax.f32 %v2516_v19, 0.0 }
 0x267   : > { %v2339_v20 = vpop.f32.mrf.mxu2 }
 0x268   : > { %v2428_v26 = vpop.f32.mrf.mxu3  ;;  %v2340_v43 = vadd.f32 %v2339_v20, %v4879_v14  ;;  %v3516_v20 = vor.u32 %v4036_v23, %v3513_v11 }
 0x269   : > { %v2520_v58 = vpop.f32.mrf.mxu0 }
 0x26a   : > { %v2429_v29 = vadd.f32 %v2428_v26, %v2340_v43  ;;  %v3520_v26 = vor.u32 %v4041_v60, %v3519_v45 }
 0x26c   : > { %v2518_v51 = vadd.f32 %v2517_v40, %v2429_v29  ;;  %2381 = vmatmul.bf16.gmra.mxu2 %v3476_v30  ;;  %2559 = vmatmul.bf16.gmra.mxu0 %v3484_v63  ;;  %v2256_v40 = vadd.f32 %v4885_v13, %v4901_v54 }
 0x26d   : > { %2470 = vmatmul.bf16.gmra.mxu3 %v3480_v8 }
 0x26e   : > { %v2587_v37 = vmax.f32 %v2518_v51, 0.0 }
 0x26f   : > { %v2342_v48 = vpop.f32.mrf.mxu2 }
 0x270   : > { %v2431_v14 = vpop.f32.mrf.mxu3  ;;  %v2615_v34 = vpack.c.bf16 %v2587_v37, %v2586_v35  ;;  %v2343_v9 = vadd.f32 %v2342_v48, %v4891_v47  ;;  %v3547_v35 = vld [vmem:[%s4409_s12 + $0x408] sm:$0xf]  ;;  %v4049_v37 = vld [vmem:[%s4409_s12 + $0x428] sm:$0xf0] }
 0x271   : > { %v2522_v0 = vpop.f32.mrf.mxu0  ;;  %v4045_v48 = vld [vmem:[%s4409_s12 + $0x40c] sm:$0xf] }
 0x272   : > { %2719 = vmatmul.bf16.gmra.mxu1 %v2615_v34  ;;  %v2432_v22 = vadd.f32 %v2431_v14, %v2343_v9  ;;  %v3549_v14 = vld [vmem:[%s4409_s12 + $0x42c] sm:$0xf0]  ;;  %v2261_v34 = vadd.f32 %v4907_v1, %v4920_v44 }
 0x274   : > { %v2521_v47 = vadd.f32 %v2520_v58, %v2432_v22  ;;  %v3552_v22 = vor.u32 %v4045_v48, %v3549_v14 }
 0x276   : > { %v2588_v13 = vmax.f32 %v2521_v47, 0.0 }
 0x277   : > { %v2344_v15 = vpop.f32.mrf.mxu2 }
 0x278   : > { %v2433_v16 = vpop.f32.mrf.mxu3  ;;  %v2345_v55 = vadd.f32 %v2344_v15, %v2256_v40  ;;  %v3548_v40 = vor.u32 %v4049_v37, %v3547_v35 }
 0x279   : > { %v2525_v30 = vpop.f32.mrf.mxu0 }
 0x27a   : > { %v2434_v43 = vadd.f32 %v2433_v16, %v2345_v55 }
 0x27c   : > { %v2523_v8 = vadd.f32 %v2522_v0, %v2434_v43  ;;  %2386 = vmatmul.bf16.gmra.mxu2 %v3512_v5  ;;  %2564 = vmatmul.bf16.gmra.mxu0 %v3520_v26  ;;  %v3555_v0 = vld [vmem:[%s4409_s12 + $0x410] sm:$0xf] }
 0x27d   : > { %2475 = vmatmul.bf16.gmra.mxu3 %v3516_v20  ;;  %v3556_v45 = vor.u32 %v4050_v50, %v3555_v0  ;;  %v3583_v43 = vld [vmem:[%s4409_s12 + $0x450] sm:$0xf] }
 0x27e   : > { %v2589_v54 = vmax.f32 %v2523_v8, 0.0  ;;  %v4054_v8 = vld [vmem:[%s4409_s12 + $0x454] sm:$0xf] }
 0x27f   : > { %v2347_v63 = vpop.f32.mrf.mxu2 }
 0x280   : > { %v2436_v19 = vpop.f32.mrf.mxu3  ;;  %v2616_v29 = vpack.c.bf16 %v2589_v54, %v2588_v13  ;;  %v2348_v51 = vadd.f32 %v2347_v63, %v4913_v17  ;;  %v3585_v13 = vld [vmem:[%s4409_s12 + $0x474] sm:$0xf0]  ;;  %v2266_v54 = vadd.f32 %v4923_v53, %v4936_v33 }
 0x281   : > { %v2527_v58 = vpop.f32.mrf.mxu0  ;;  %v3588_v48 = vor.u32 %v4054_v8, %v3585_v13 }
 0x282   : > { %2724 = vmatmul.bf16.gmra.mxu1 %v2616_v29  ;;  %v2437_v9 = vadd.f32 %v2436_v19, %v2348_v51  ;;  %v3591_v19 = vld [vmem:[%s4409_s12 + $0x458] sm:$0xf]  ;;  %v4059_v29 = vld [vmem:[%s4409_s12 + $0x478] sm:$0xf0] }
 0x283   : > { %v3592_v14 = vor.u32 %v4059_v29, %v3591_v19 }
 0x284   : > { %v2526_v17 = vadd.f32 %v2525_v30, %v2437_v9  ;;  %v4058_v30 = vld [vmem:[%s4409_s12 + $0x470] sm:$0xf0] }
 0x285   : > { %v3584_v37 = vor.u32 %v4058_v30, %v3583_v43 }
 0x286   : > { %v2590_v1 = vmax.f32 %v2526_v17, 0.0 }
 0x287   : > { %v2349_v7 = vpop.f32.mrf.mxu2 }
 0x288   : > { %v2438_v23 = vpop.f32.mrf.mxu3  ;;  %v2350_v11 = vadd.f32 %v2349_v7, %v2261_v34 }
 0x289   : > { %v2530_v15 = vpop.f32.mrf.mxu0 }
 0x28a   : > { %v2439_v60 = vadd.f32 %v2438_v23, %v2350_v11 }
 0x28c   : > { %v2528_v16 = vadd.f32 %v2527_v58, %v2439_v60  ;;  %2391 = vmatmul.bf16.gmra.mxu2 %v3548_v40  ;;  %2569 = vmatmul.bf16.gmra.mxu0 %v3556_v45 }
 0x28d   : > { %2480 = vmatmul.bf16.gmra.mxu3 %v3552_v22  ;;  %v2271_v22 = vadd.f32 %v4942_v32, %v4953_v21  ;;  %v2276_v32 = vadd.f32 %v4956_v31, %v4967_v12  ;;  %v5145_v12 = vld [vmem:[%s5243_s4] ss:$0 sm:$0xff] }
 0x28e   : > { %v2591_v44 = vmax.f32 %v2528_v16, 0.0 }
 0x28f   : > { %v2352_v55 = vpop.f32.mrf.mxu2 }
 0x290   : > { %v2441_v5 = vpop.f32.mrf.mxu3  ;;  %v2617_v20 = vpack.c.bf16 %v2591_v44, %v2590_v1  ;;  %v2353_v26 = vadd.f32 %v2352_v55, %v4929_v36 }
 0x291   : > { %v2532_v47 = vpop.f32.mrf.mxu0 }
 0x292   : > { %2729 = vmatmul.bf16.gmra.mxu1 %v2617_v20  ;;  %v2442_v63 = vadd.f32 %v2441_v5, %v2353_v26 }
 0x294   : > { %v2531_v34 = vadd.f32 %v2530_v15, %v2442_v63 }
 0x296   : > { %v2592_v50 = vmax.f32 %v2531_v34, 0.0 }
 0x297   : > { %v2354_v51 = vpop.f32.mrf.mxu2 }
 0x298   : > { %v2443_v58 = vpop.f32.mrf.mxu3  ;;  %v2355_v35 = vadd.f32 %v2354_v51, %v2266_v54  ;;  %v5139_v54 = vpop.f32.mrf.mxu1 }
 0x299   : > { %v2535_v9 = vpop.f32.mrf.mxu0 }
 0x29a   : > { %v2444_v36 = vadd.f32 %v2443_v58, %v2355_v35 }
 0x29c   : > { %v2533_v0 = vadd.f32 %v2532_v47, %v2444_v36  ;;  %2396 = vmatmul.bf16.gmra.mxu2 %v3584_v37  ;;  %2574 = vmatmul.bf16.gmra.mxu0 %v3592_v14 }
 0x29d   : > { %2485 = vmatmul.bf16.gmra.mxu3 %v3588_v48 }
 0x29e   : > { %v2593_v7 = vmax.f32 %v2533_v0, 0.0 }
 0x29f   : > { %v2357_v23 = vpop.f32.mrf.mxu2 }
 0x2a0   : > { %v2446_v53 = vpop.f32.mrf.mxu3  ;;  %v2618_v33 = vpack.c.bf16 %v2593_v7, %v2592_v50  ;;  %v2358_v11 = vadd.f32 %v2357_v23, %v4948_v62 }
 0x2a1   : > { %v2537_v40 = vpop.f32.mrf.mxu0 }
 0x2a2   : > { %2734 = vmatmul.bf16.gmra.mxu1 %v2618_v33  ;;  %v2447_v45 = vadd.f32 %v2446_v53, %v2358_v11 }
 0x2a4   : > { %v2536_v16 = vadd.f32 %v2535_v9, %v2447_v45  ;;  %v2281_v9 = vadd.f32 %v4973_v24, %v4984_v41 }
 0x2a6   : > { %v2594_v5 = vmax.f32 %v2536_v16, 0.0 }
 0x2a7   : > { %v2359_v17 = vpop.f32.mrf.mxu2 }
 0x2a8   : > { %v2448_v60 = vpop.f32.mrf.mxu3  ;;  %v2360_v15 = vadd.f32 %v2359_v17, %v2271_v22 }
 0x2a9   : > { %v2540_v44 = vpop.f32.mrf.mxu0 }
 0x2aa   : > { %v2449_v1 = vadd.f32 %v2448_v60, %v2360_v15 }
 0x2ac   : > { %v2538_v55 = vadd.f32 %v2537_v40, %v2449_v1 }
 0x2ae   : > { %v2595_v20 = vmax.f32 %v2538_v55, 0.0 }
 0x2af   : > { %v2362_v26 = vpop.f32.mrf.mxu2 }
 0x2b0   : > { %v2451_v47 = vpop.f32.mrf.mxu3  ;;  %v2619_v43 = vpack.c.bf16 %v2595_v20, %v2594_v5  ;;  %v2363_v62 = vadd.f32 %v2362_v26, %v4962_v49 }
 0x2b1   : > { %v2542_v30 = vpop.f32.mrf.mxu0 }
 0x2b2   : > { %2739 = vmatmul.bf16.gmra.mxu1 %v2619_v43  ;;  %v2452_v21 = vadd.f32 %v2451_v47, %v2363_v62  ;;  %v2286_v47 = vadd.f32 %v4987_v18, %v4998_v56 }
 0x2b4   : > { %v2541_v19 = vadd.f32 %v2540_v44, %v2452_v21 }
 0x2b6   : > { %v2596_v35 = vmax.f32 %v2541_v19, 0.0 }
 0x2b7   : > { %v2364_v8 = vpop.f32.mrf.mxu2 }
 0x2b8   : > { %v2453_v13 = vpop.f32.mrf.mxu3  ;;  %v2365_v63 = vadd.f32 %v2364_v8, %v2276_v32 }
 0x2b9   : > { %v2545_v51 = vpop.f32.mrf.mxu0 }
 0x2ba   : > { %v2454_v29 = vadd.f32 %v2453_v13, %v2365_v63 }
 0x2bc   : > { %v2543_v58 = vadd.f32 %v2542_v30, %v2454_v29 }
 0x2be   : > { %v2597_v37 = vmax.f32 %v2543_v58, 0.0 }
 0x2bf   : > { %v2367_v48 = vpop.f32.mrf.mxu2  ;;  %v2705_v14 = vpop.f32.mrf.mxu1 }
 0x2c0   : > { %v2456_v49 = vpop.f32.mrf.mxu3  ;;  %v2620_v34 = vpack.c.bf16 %v2597_v37, %v2596_v35  ;;  %v2368_v36 = vadd.f32 %v2367_v48, %v4979_v3  ;;  %v2706_v33 = vadd.f32 %v5145_v12, %v2705_v14 }
 0x2c1   : > { %v2547_v31 = vpop.f32.mrf.mxu0 }
 0x2c2   : > { %2744 = vmatmul.bf16.gmra.mxu1 %v2620_v34  ;;  %v2457_v0 = vadd.f32 %v2456_v49, %v2368_v36 }
 0x2c4   : > { %v2546_v11 = vadd.f32 %v2545_v51, %v2457_v0 }
 0x2c6   : > { %v2598_v17 = vmax.f32 %v2546_v11, 0.0 }
 0x2c7   : > { %v2369_v50 = vpop.f32.mrf.mxu2  ;;  %v2707_v53 = vpop.f32.mrf.mxu1 }
 0x2c8   : > { %v2458_v7 = vpop.f32.mrf.mxu3  ;;  %v2370_v23 = vadd.f32 %v2369_v50, %v2281_v9  ;;  %v2708_v3 = vadd.f32 %v5145_v12, %v2707_v53 }
 0x2c9   : > { %v2550_v22 = vpop.f32.mrf.mxu0 }
 0x2ca   : > { %v2459_v40 = vadd.f32 %v2458_v7, %v2370_v23  ;;  %v4143_v24 = vpack.c.bf16 %v2708_v3, %v2706_v33  ;;  %v2855_v41 = vadd.f32 %v2708_v3, %v2706_v33 }
 0x2cc   : > { %v2548_v45 = vadd.f32 %v2547_v31, %v2459_v40  ;;  %4144 = vst [vmem:[%s5155_s18] sm:$0xff] %v4143_v24   ;;  %v2291_v31 = vadd.f32 %v5004_v25, %v5015_v2 }
 0x2ce   : > { %v2599_v60 = vmax.f32 %v2548_v45, 0.0 }
 0x2cf   : > { %v2372_v15 = vpop.f32.mrf.mxu2  ;;  %v2710_v1 = vpop.f32.mrf.mxu1 }
 0x2d0   : > { %v2461_v16 = vpop.f32.mrf.mxu3  ;;  %v2621_v44 = vpack.c.bf16 %v2599_v60, %v2598_v17  ;;  %v2711_v55 = vadd.f32 %v5145_v12, %v2710_v1  ;;  %v2373_v5 = vadd.f32 %v2372_v15, %v4993_v39 }
 0x2d1   : > { %v2552_v20 = vpop.f32.mrf.mxu0 }
 0x2d2   : > { %2749 = vmatmul.bf16.gmra.mxu1 %v2621_v44  ;;  %v2856_v26 = vadd.f32 %v2855_v41, %v2711_v55  ;;  %v2462_v43 = vadd.f32 %v2461_v16, %v2373_v5  ;;  %v2296_v44 = vadd.f32 %v5018_v4, %v5029_v38 }
 0x2d4   : > { %v2551_v13 = vadd.f32 %v2550_v22, %v2462_v43 }
 0x2d6   : > { %v2600_v58 = vmax.f32 %v2551_v13, 0.0 }
 0x2d7   : > { %v2374_v62 = vpop.f32.mrf.mxu2  ;;  %v2712_v21 = vpop.f32.mrf.mxu1 }
 0x2d8   : > { %v2463_v30 = vpop.f32.mrf.mxu3  ;;  %v2375_v32 = vadd.f32 %v2374_v62, %v2286_v47  ;;  %v2713_v8 = vadd.f32 %v5145_v12, %v2712_v21 }
 0x2d9   : > { %v2555_v19 = vpop.f32.mrf.mxu0 }
 0x2da   : > { %v2464_v63 = vadd.f32 %v2463_v30, %v2375_v32  ;;  %v4148_v29 = vpack.c.bf16 %v2713_v8, %v2711_v55  ;;  %v2857_v51 = vadd.f32 %v2856_v26, %v2713_v8 }
 0x2dc   : > { %v2553_v39 = vadd.f32 %v2552_v20, %v2464_v63  ;;  %4220 = vst [vmem:[%s5155_s18 + $0x8] sm:$0xff] %v4148_v29  }
 0x2de   : > { %v2601_v35 = vmax.f32 %v2553_v39, 0.0 }
 0x2df   : > { %v2377_v37 = vpop.f32.mrf.mxu2  ;;  %v2715_v49 = vpop.f32.mrf.mxu1 }
 0x2e0   : > { %v2466_v48 = vpop.f32.mrf.mxu3  ;;  %v2622_v18 = vpack.c.bf16 %v2601_v35, %v2600_v58  ;;  %v2716_v56 = vadd.f32 %v5145_v12, %v2715_v49  ;;  %v2378_v14 = vadd.f32 %v2377_v37, %v5010_v27  ;;  %v2301_v37 = vadd.f32 %v5036_v61, %v5046_v6 }
 0x2e1   : > { %v2557_v34 = vpop.f32.mrf.mxu0 }
 0x2e2   : > { %2754 = vmatmul.bf16.gmra.mxu1 %v2622_v18  ;;  %v2858_v36 = vadd.f32 %v2857_v51, %v2716_v56  ;;  %v2467_v9 = vadd.f32 %v2466_v48, %v2378_v14 }
 0x2e4   : > { %v2556_v33 = vadd.f32 %v2555_v19, %v2467_v9 }
 0x2e6   : > { %v2602_v24 = vmax.f32 %v2556_v33, 0.0 }
 0x2e7   : > { %v2379_v0 = vpop.f32.mrf.mxu2  ;;  %v2717_v23 = vpop.f32.mrf.mxu1 }
 0x2e8   : > { %v2468_v50 = vpop.f32.mrf.mxu3  ;;  %v2380_v7 = vadd.f32 %v2379_v0, %v2291_v31  ;;  %v2718_v53 = vadd.f32 %v5145_v12, %v2717_v23 }
 0x2e9   : > { %v2560_v11 = vpop.f32.mrf.mxu0 }
 0x2ea   : > { %v2469_v3 = vadd.f32 %v2468_v50, %v2380_v7  ;;  %v4153_v40 = vpack.c.bf16 %v2718_v53, %v2716_v56  ;;  %v2859_v22 = vadd.f32 %v2858_v36, %v2718_v53 }
 0x2ec   : > { %v2558_v27 = vadd.f32 %v2557_v34, %v2469_v3  ;;  %4221 = vst [vmem:[%s5155_s18 + $0x10] sm:$0xff] %v4153_v40  }
 0x2ee   : > { %v2603_v41 = vmax.f32 %v2558_v27, 0.0 }
 0x2ef   : > { %v2382_v45 = vpop.f32.mrf.mxu2  ;;  %v2720_v60 = vpop.f32.mrf.mxu1 }
 0x2f0   : > { %v2471_v17 = vpop.f32.mrf.mxu3  ;;  %v2623_v25 = vpack.c.bf16 %v2603_v41, %v2602_v24  ;;  %v2721_v2 = vadd.f32 %v5145_v12, %v2720_v60  ;;  %v2383_v15 = vadd.f32 %v2382_v45, %v5024_v57 }
 0x2f1   : > { %v2562_v16 = vpop.f32.mrf.mxu0 }
 0x2f2   : > { %2759 = vmatmul.bf16.gmra.mxu1 %v2623_v25  ;;  %v2860_v1 = vadd.f32 %v2859_v22, %v2721_v2  ;;  %v2472_v55 = vadd.f32 %v2471_v17, %v2383_v15  ;;  %v2306_v22 = vadd.f32 %v5058_v46, %v5060_v52 }
 0x2f4   : > { %v2561_v62 = vadd.f32 %v2560_v11, %v2472_v55 }
 0x2f6   : > { %v2604_v13 = vmax.f32 %v2561_v62, 0.0 }
 0x2f7   : > { %v2384_v5 = vpop.f32.mrf.mxu2  ;;  %v2722_v47 = vpop.f32.mrf.mxu1 }
 0x2f8   : > { %v2473_v20 = vpop.f32.mrf.mxu3  ;;  %v2385_v26 = vadd.f32 %v2384_v5, %v2296_v44  ;;  %v2723_v43 = vadd.f32 %v5145_v12, %v2722_v47 }
 0x2f9   : > { %v2565_v32 = vpop.f32.mrf.mxu0 }
 0x2fa   : > { %v2474_v30 = vadd.f32 %v2473_v20, %v2385_v26  ;;  %v4158_v21 = vpack.c.bf16 %v2723_v43, %v2721_v2  ;;  %v2861_v8 = vadd.f32 %v2860_v1, %v2723_v43 }
 0x2fc   : > { %v2563_v57 = vadd.f32 %v2562_v16, %v2474_v30  ;;  %4222 = vst [vmem:[%s5155_s18 + $0x18] sm:$0xff] %v4158_v21   ;;  %v2311_v30 = vadd.f32 %v5139_v54, %v5072_v42 }
 0x2fe   : > { %v2605_v63 = vmax.f32 %v2563_v57, 0.0 }
 0x2ff   : > { %v2387_v19 = vpop.f32.mrf.mxu2  ;;  %v2725_v51 = vpop.f32.mrf.mxu1 }
 0x300   : > { %v2476_v29 = vpop.f32.mrf.mxu3  ;;  %v2624_v4 = vpack.c.bf16 %v2605_v63, %v2604_v13  ;;  %v2726_v38 = vadd.f32 %v5145_v12, %v2725_v51  ;;  %v2388_v39 = vadd.f32 %v2387_v19, %v5041_v59 }
 0x301   : > { %v2567_v58 = vpop.f32.mrf.mxu0 }
 0x302   : > { %2764 = vmatmul.bf16.gmra.mxu1 %v2624_v4  ;;  %v2862_v35 = vadd.f32 %v2861_v8, %v2726_v38  ;;  %v2477_v48 = vadd.f32 %v2476_v29, %v2388_v39 }
 0x304   : > { %v2566_v36 = vadd.f32 %v2565_v32, %v2477_v48 }
 0x306   : > { %v2606_v7 = vmax.f32 %v2566_v36, 0.0 }
 0x307   : > { %v2389_v49 = vpop.f32.mrf.mxu2  ;;  %v2727_v14 = vpop.f32.mrf.mxu1 }
 0x308   : > { %v2478_v18 = vpop.f32.mrf.mxu3  ;;  %v2390_v56 = vadd.f32 %v2389_v49, %v2301_v37  ;;  %v2728_v34 = vadd.f32 %v5145_v12, %v2727_v14 }
 0x309   : > { %v2570_v59 = vpop.f32.mrf.mxu0 }
 0x30a   : > { %v2479_v31 = vadd.f32 %v2478_v18, %v2390_v56  ;;  %v4163_v9 = vpack.c.bf16 %v2728_v34, %v2726_v38  ;;  %v2863_v0 = vadd.f32 %v2862_v35, %v2728_v34 }
 0x30c   : > { %v2568_v50 = vadd.f32 %v2567_v58, %v2479_v31  ;;  %4223 = vst [vmem:[%s5155_s18 + $0x20] sm:$0xff] %v4163_v9  }
 0x30e   : > { %v2607_v23 = vmax.f32 %v2568_v50, 0.0 }
 0x30f   : > { %v2392_v53 = vpop.f32.mrf.mxu2  ;;  %v2730_v3 = vpop.f32.mrf.mxu1 }
 0x310   : > { %v2481_v33 = vpop.f32.mrf.mxu3  ;;  %v2625_v61 = vpack.c.bf16 %v2607_v23, %v2606_v7  ;;  %v2731_v6 = vadd.f32 %v5145_v12, %v2730_v3  ;;  %v2393_v11 = vadd.f32 %v2392_v53, %v5053_v28 }
 0x311   : > { %v2572_v24 = vpop.f32.mrf.mxu0 }
 0x312   : > { %2769 = vmatmul.bf16.gmra.mxu1 %v2625_v61  ;;  %v2864_v40 = vadd.f32 %v2863_v0, %v2731_v6  ;;  %v2482_v27 = vadd.f32 %v2481_v33, %v2393_v11 }
 0x314   : > { %v2571_v2 = vadd.f32 %v2570_v59, %v2482_v27 }
 0x316   : > { %v2608_v28 = vmax.f32 %v2571_v2, 0.0 }
 0x317   : > { %v2394_v41 = vpop.f32.mrf.mxu2  ;;  %v2732_v60 = vpop.f32.mrf.mxu1 }
 0x318   : > { %v2483_v45 = vpop.f32.mrf.mxu3  ;;  %v2395_v17 = vadd.f32 %v2394_v41, %v2306_v22  ;;  %v2733_v25 = vadd.f32 %v5145_v12, %v2732_v60 }
 0x319   : > { %v2575_v52 = vpop.f32.mrf.mxu0 }
 0x31a   : > { %v2484_v15 = vadd.f32 %v2483_v45, %v2395_v17  ;;  %v4168_v16 = vpack.c.bf16 %v2733_v25, %v2731_v6  ;;  %v2865_v1 = vadd.f32 %v2864_v40, %v2733_v25 }
 0x31c   : > { %v2573_v44 = vadd.f32 %v2572_v24, %v2484_v15  ;;  %4224 = vst [vmem:[%s5155_s18 + $0x28] sm:$0xff] %v4168_v16  }
 0x31e   : > { %v2609_v55 = vmax.f32 %v2573_v44, 0.0 }
 0x31f   : > { %v2397_v5 = vpop.f32.mrf.mxu2  ;;  %v2735_v26 = vpop.f32.mrf.mxu1 }
 0x320   : > { %v2486_v20 = vpop.f32.mrf.mxu3  ;;  %v2626_v46 = vpack.c.bf16 %v2609_v55, %v2608_v28  ;;  %v2736_v47 = vadd.f32 %v5145_v12, %v2735_v26  ;;  %v2398_v43 = vadd.f32 %v2397_v5, %v5067_v10  ;;  %v4303_v26 = vmov 0.0  }
 0x321   : > { %v2577_v51 = vpop.f32.mrf.mxu0  ;;  %2853 = vst [vmem:[%s5218_s25] sm:$0x1] %v4303_v26 }
 0x322   : > { %2774 = vmatmul.bf16.gmra.mxu1 %v2626_v46  ;;  %v2866_v62 = vadd.f32 %v2865_v1, %v2736_v47  ;;  %v2487_v32 = vadd.f32 %v2486_v20, %v2398_v43 }
 0x324   : > { %v2576_v19 = vadd.f32 %v2575_v52, %v2487_v32 }
 0x326   : > { %v2610_v39 = vmax.f32 %v2576_v19, 0.0 }
 0x327   : > { %v2399_v21 = vpop.f32.mrf.mxu2  ;;  %v2737_v57 = vpop.f32.mrf.mxu1 }
 0x328   : > { %v2400_v8 = vadd.f32 %v2399_v21, %v2311_v30  ;;  %v2488_v13 = vpop.f32.mrf.mxu3  ;;  %v2738_v63 = vadd.f32 %v5145_v12, %v2737_v57 }
 0x32a   : > { %v2489_v29 = vadd.f32 %v2488_v13, %v2400_v8  ;;  %v4173_v4 = vpack.c.bf16 %v2738_v63, %v2736_v47  ;;  %v2867_v38 = vadd.f32 %v2866_v62, %v2738_v63 }
 0x32c   : > { %v2578_v10 = vadd.f32 %v2577_v51, %v2489_v29  ;;  %4225 = vst [vmem:[%s5155_s18 + $0x30] sm:$0xff] %v4173_v4  }
 0x32e   : > { %v2611_v58 = vmax.f32 %v2578_v10, 0.0 }
 0x32f   : > { %v2740_v35 = vpop.f32.mrf.mxu1 }
 0x330   : > { %v2627_v37 = vpack.c.bf16 %v2611_v58, %v2610_v39  ;;  %v2741_v42 = vadd.f32 %v5145_v12, %v2740_v35 }
 0x332   : > { %2779 = vmatmul.bf16.gmra.mxu1 %v2627_v37  ;;  %v2868_v54 = vadd.f32 %v2867_v38, %v2741_v42 }
 0x337   : > { %v2742_v48 = vpop.f32.mrf.mxu1 }
 0x338   : > { %v2743_v49 = vadd.f32 %v5145_v12, %v2742_v48 }
 0x33a   : > { %v4178_v18 = vpack.c.bf16 %v2743_v49, %v2741_v42  ;;  %v2869_v56 = vadd.f32 %v2868_v54, %v2743_v49 }
 0x33c   : > { %4226 = vst [vmem:[%s5155_s18 + $0x38] sm:$0xff] %v4178_v18  }
 0x33f   : > { %v2745_v14 = vpop.f32.mrf.mxu1 }
 0x340   : > { %v2746_v34 = vadd.f32 %v5145_v12, %v2745_v14 }
 0x342   : > { %v2870_v36 = vadd.f32 %v2869_v56, %v2746_v34  ;;  %v2854_v56 = vld [vmem:[%s5218_s25] sm:$0x1] }
 0x347   : > { %v2747_v31 = vpop.f32.mrf.mxu1 }
 0x348   : > { %v2748_v9 = vadd.f32 %v5145_v12, %v2747_v31 }
 0x34a   : > { %v4183_v0 = vpack.c.bf16 %v2748_v9, %v2746_v34  ;;  %v2871_v50 = vadd.f32 %v2870_v36, %v2748_v9 }
 0x34c   : > { %4227 = vst [vmem:[%s5155_s18 + $0x40] sm:$0xff] %v4183_v0  }
 0x34f   : > { %v2750_v59 = vpop.f32.mrf.mxu1 }
 0x350   : > { %v2751_v7 = vadd.f32 %v5145_v12, %v2750_v59 }
 0x352   : > { %v2872_v23 = vadd.f32 %v2871_v50, %v2751_v7 }
 0x357   : > { %v2752_v53 = vpop.f32.mrf.mxu1 }
 0x358   : > { %v2753_v33 = vadd.f32 %v5145_v12, %v2752_v53 }
 0x35a   : > { %v4188_v3 = vpack.c.bf16 %v2753_v33, %v2751_v7  ;;  %v2873_v61 = vadd.f32 %v2872_v23, %v2753_v33 }
 0x35c   : > { %4228 = vst [vmem:[%s5155_s18 + $0x48] sm:$0xff] %v4188_v3  }
 0x35f   : > { %v2755_v6 = vpop.f32.mrf.mxu1 }
 0x360   : > { %v2756_v40 = vadd.f32 %v5145_v12, %v2755_v6 }
 0x362   : > { %v2874_v52 = vadd.f32 %v2873_v61, %v2756_v40 }
 0x367   : > { %v2757_v11 = vpop.f32.mrf.mxu1 }
 0x368   : > { %v2758_v22 = vadd.f32 %v5145_v12, %v2757_v11 }
 0x36a   : > { %v4193_v27 = vpack.c.bf16 %v2758_v22, %v2756_v40  ;;  %v2875_v47 = vadd.f32 %v2874_v52, %v2758_v22 }
 0x36c   : > { %4229 = vst [vmem:[%s5155_s18 + $0x50] sm:$0xff] %v4193_v27  }
 0x36f   : > { %v2760_v24 = vpop.f32.mrf.mxu1 }
 0x370   : > { %v2761_v45 = vadd.f32 %v5145_v12, %v2760_v24 }
 0x372   : > { %v2876_v62 = vadd.f32 %v2875_v47, %v2761_v45 }
 0x377   : > { %v2762_v41 = vpop.f32.mrf.mxu1 }
 0x378   : > { %v2763_v17 = vadd.f32 %v5145_v12, %v2762_v41 }
 0x37a   : > { %v4198_v60 = vpack.c.bf16 %v2763_v17, %v2761_v45  ;;  %v2877_v21 = vadd.f32 %v2876_v62, %v2763_v17 }
 0x37c   : > { %4230 = vst [vmem:[%s5155_s18 + $0x58] sm:$0xff] %v4198_v60  }
 0x37f   : > { %v2765_v25 = vpop.f32.mrf.mxu1 }
 0x380   : > { %v2766_v15 = vadd.f32 %v5145_v12, %v2765_v25 }
 0x382   : > { %v2878_v57 = vadd.f32 %v2877_v21, %v2766_v15 }
 0x387   : > { %v2767_v2 = vpop.f32.mrf.mxu1 }
 0x388   : > { %v2768_v16 = vadd.f32 %v5145_v12, %v2767_v2 }
 0x38a   : > { %v4203_v1 = vpack.c.bf16 %v2768_v16, %v2766_v15  ;;  %v2879_v13 = vadd.f32 %v2878_v57, %v2768_v16 }
 0x38c   : > { %4231 = vst [vmem:[%s5155_s18 + $0x60] sm:$0xff] %v4203_v1  }
 0x38f   : > { %v2770_v44 = vpop.f32.mrf.mxu1 }
 0x390   : > { %v2771_v55 = vadd.f32 %v5145_v12, %v2770_v44 }
 0x392   : > { %v2880_v19 = vadd.f32 %v2879_v13, %v2771_v55 }
 0x397   : > { %v2772_v28 = vpop.f32.mrf.mxu1 }
 0x398   : > { %v2773_v5 = vadd.f32 %v5145_v12, %v2772_v28 }
 0x39a   : > { %v4208_v20 = vpack.c.bf16 %v2773_v5, %v2771_v55  ;;  %v2881_v29 = vadd.f32 %v2880_v19, %v2773_v5 }
 0x39c   : > { %4232 = vst [vmem:[%s5155_s18 + $0x68] sm:$0xff] %v4208_v20  }
 0x39f   : > { %v2775_v46 = vpop.f32.mrf.mxu1 }
 0x3a0   : > { %v2776_v30 = vadd.f32 %v5145_v12, %v2775_v46 }
 0x3a2   : > { %v2882_v51 = vadd.f32 %v2881_v29, %v2776_v30 }
 0x3a7   : > { %v2777_v43 = vpop.f32.mrf.mxu1 }
 0x3a8   : > { %v2778_v32 = vadd.f32 %v5145_v12, %v2777_v43 }
 0x3aa   : > { %v4213_v8 = vpack.c.bf16 %v2778_v32, %v2776_v30  ;;  %v2883_v38 = vadd.f32 %v2882_v51, %v2778_v32 }
 0x3ac   : > { %4233 = vst [vmem:[%s5155_s18 + $0x70] sm:$0xff] %v4213_v8  }
 0x3af   : > { %v2780_v63 = vpop.f32.mrf.mxu1 }
 0x3b0   : > { %v2781_v4 = vadd.f32 %v5145_v12, %v2780_v63 }
 0x3b2   : > { %v2884_v39 = vadd.f32 %v2883_v38, %v2781_v4 }
 0x3b7   : > { %v2782_v10 = vpop.f32.mrf.mxu1 }
 0x3b8   : > { %v2783_v58 = vadd.f32 %v5145_v12, %v2782_v10 }
 0x3ba   : > { %v4218_v35 = vpack.c.bf16 %v2783_v58, %v2781_v4  ;;  %v2885_v37 = vadd.f32 %v2884_v39, %v2783_v58 }
 0x3bc   : > { %4234 = vst [vmem:[%s5155_s18 + $0x78] sm:$0xff] %v4218_v35   ;;  %v2886_v42 = vrot.slane %v2885_v37, 4 }
 0x3be   : > { %v2887_v54 = vadd.f32 %v2886_v42, %v2885_v37 }
 0x3c0   : > { %v2888_v48 = vrot.slane %v2887_v54, 2 }
 0x3c2   : > { %v2889_v49 = vadd.f32 %v2888_v48, %v2887_v54 }
 0x3c4   : > { %v2890_v18 = vrot.slane %v2889_v49, 1 }
 0x3c6   : > { %v2891_v14 = vadd.f32 %v2890_v18, %v2889_v49 }
 0x3c8   : > { %v2892_v34 = vadd.f32 %v2891_v14, %v2854_v56 }
 0x3ca   : > { %2893 = vst [vmem:[%s5218_s25] sm:$0x1] %v2892_v34 }
 0x3cb PF: > { %s17_s23 = sadd.s32 1, %s4301_s23   ;;  %s5246_s21 = smov %s4297_s22 }
 0x3cc   : > { %p14_p5 = scmp.ge.s32.totalorder %s17_s23, 4   ;;  %s5247_s22 = smov %s5249_s24 }
 0x3ce   :  { %16 = sbr.rel (!%p14_p5) target bundleno = 2 (0x2), region = 86 }

</bundles_post_ra>
